<compile_context>
chip_gen: v7x
topology: tpu7x:2x2x1
jax: 0.10.0
libtpu: 0.0.40
codegen_flags: <defaults>
</compile_context>

<pallas_src>
import functools

import jax
import jax.numpy as jnp
from jax import lax
from jax.experimental import pallas as pl
from jax.experimental.pallas import tpu as pltpu

EPS = 1e-5


# ----------------------------- compiler params ----------------------------- #

def _vmem_limit_bytes():
    # v7x has 64 MiB VMEM per TensorCore; v5e/v6e have 128 MiB.
    try:
        kind = jax.devices()[0].device_kind.lower()
    except Exception:
        kind = ""
    return (48 if "v7" in kind else 96) * 1024 * 1024


def _compiler_params():
    return pltpu.CompilerParams(dimension_semantics=("parallel",),
                                vmem_limit_bytes=_vmem_limit_bytes())


# ----------------------------- Pallas kernels ------------------------------ #

def _densify(st_ref, acc, rows, cols, cout):
    """(rows*cols, cout) f32 -> (rows, cols*cout) lane-dense, via VMEM staging."""
    st_ref[...] = acc.reshape(rows, cols, cout)
    return jnp.concatenate([st_ref[:, w, :] for w in range(cols)], axis=-1)


def _bn_relu_conv3x3_s1_kernel(res_kind, x_ref, scale_ref, shift_ref, w_ref,
                               *rest):
    """Fused BN+ReLU -> 3x3 stride-1 'same' conv (+ optional fused residual).

    x_ref       : (1, H, W, C)        one batch element (grid over N)
    scale/shift : (1, C)              folded inference-BN affine
    w_ref       : (3, 3, C, Cout)     bf16 HWIO weights
    res_kind:
      None             - no residual
      "dense_same"     - res_ref (1, H, W*Cout): identity shortcut (lane-dense)
      "even_subsample" - res_ref (1, H, 2, W, 2*Cr): parity view of the
                         pre-downsample input; the kernel reads parity (0, 0)
                         and zero-pads channels Cr -> Cout, matching
                         torch.cat((d, 0*d), dim=1).
    o_ref       : (1, H, W*Cout)      lane-dense output
    xp_ref      : (H+2, W+2, C) f32   zero-padded activation scratch
    st_ref      : (H, W, Cout)  f32   staging scratch for the dense transpose
    """
    if res_kind is None:
        res_ref = None
        o_ref, xp_ref, st_ref = rest
    else:
        res_ref, o_ref, xp_ref, st_ref = rest

    _, H, W, C = x_ref.shape
    Cout = w_ref.shape[-1]
    f32 = jnp.float32

    # Re-zero only the 1-element border strips (interior is overwritten below).
    xp_ref[0:1, :, :] = jnp.zeros((1, W + 2, C), f32)
    xp_ref[H + 1:H + 2, :, :] = jnp.zeros((1, W + 2, C), f32)
    xp_ref[:, 0:1, :] = jnp.zeros((H + 2, 1, C), f32)
    xp_ref[:, W + 1:W + 2, :] = jnp.zeros((H + 2, 1, C), f32)

    # Fused inference BN + ReLU (f32), written into the padded scratch.
    y = jnp.maximum(x_ref[0] * scale_ref[...] + shift_ref[...], 0.0)
    xp_ref[1:H + 1, 1:W + 1, :] = y

    # 9 accumulating matmuls (K = C), bf16 operands, f32 accumulation.
    acc = jnp.zeros((H * W, Cout), f32)
    for di in range(3):
        for dj in range(3):
            win = xp_ref[di:di + H, dj:dj + W, :].reshape(H * W, C)
            acc = acc + jnp.dot(win.astype(jnp.bfloat16), w_ref[di, dj],
                                preferred_element_type=f32)

    if res_kind == "even_subsample":
        # Fused shortcut: even-parity subsample of raw x + zero channel pad.
        Cr = res_ref.shape[-1] // 2
        r = res_ref[0, :, 0, :, 0:Cr].reshape(H * W, Cr).astype(f32)
        acc = acc + jnp.concatenate(
            [r, jnp.zeros((H * W, Cout - Cr), f32)], axis=-1)

    out = _densify(st_ref, acc, H, W, Cout)      # (H, W*Cout) lane-dense
    if res_kind == "dense_same":
        out = out + res_ref[0]                   # identity shortcut, dense add
    o_ref[0] = out.astype(o_ref.dtype)


# tap index d -> (input parity, offset into the leading-zero-padded half grid)
#   d=0 reads y(2i-1) -> parity 1 at half-index i-1 -> padded offset 0
#   d=1 reads y(2i)   -> parity 0 at half-index i   -> padded offset 1
#   d=2 reads y(2i+1) -> parity 1 at half-index i   -> padded offset 1
_PHASE = ((1, 0), (0, 1), (1, 1))


def _bn_relu_conv3x3_s2_kernel(x_ref, scale_ref, shift_ref, w_ref, o_ref,
                               pp_ref, st_ref):
    """Fused BN+ReLU -> 3x3 stride-2 pad-1 conv (only strided outputs computed).

    x_ref  : (1, Hh, 2, Wh, 2*C)       free parity view of one NHWC element
    w_ref  : (3, 3, C, Cout)           bf16 HWIO weights
    o_ref  : (1, Hh, Wh*Cout)          lane-dense output
    pp_ref : (2, 2, Hh+1, Wh+1, C) f32 parity-plane scratch, 1 leading zero pad
    st_ref : (Hh, Wh, Cout) f32        staging scratch for the dense transpose
    """
    _, Hh, _, Wh, C2 = x_ref.shape
    C = C2 // 2
    Cout = w_ref.shape[-1]
    f32 = jnp.float32

    # Re-zero only the leading pad row / column of every parity plane.
    pp_ref[:, :, 0:1, :, :] = jnp.zeros((2, 2, 1, Wh + 1, C), f32)
    pp_ref[:, :, :, 0:1, :] = jnp.zeros((2, 2, Hh + 1, 1, C), f32)

    # Fused inference BN + ReLU per parity plane (plain lane slices, no
    # strided reads and no (2, C) minor-dim blocked DMA).
    for p in range(2):
        for q in range(2):
            xpq = x_ref[0, :, p, :, q * C:(q + 1) * C]          # (Hh, Wh, C)
            pp_ref[p, q, 1:, 1:, :] = jnp.maximum(
                xpq * scale_ref[...] + shift_ref[...], 0.0)

    acc = jnp.zeros((Hh * Wh, Cout), f32)
    for di in range(3):
        rp, ro = _PHASE[di]
        for dj in range(3):
            cp, co = _PHASE[dj]
            win = pp_ref[rp, cp, ro:ro + Hh, co:co + Wh, :].reshape(Hh * Wh, C)
            acc = acc + jnp.dot(win.astype(jnp.bfloat16), w_ref[di, dj],
                                preferred_element_type=f32)

    o_ref[0] = _densify(st_ref, acc, Hh, Wh, Cout).astype(o_ref.dtype)


# ----------------------------- Pallas wrappers ----------------------------- #

def bn_relu_conv3x3_s1(x, scale, shift, w, residual=None, res_kind=None):
    """relu(x*scale+shift) -> 3x3 stride-1 'same' conv (+ fused residual)."""
    N, H, W, C = x.shape
    Cout = w.shape[-1]

    in_specs = [
        pl.BlockSpec((1, H, W, C), lambda n: (n, 0, 0, 0)),
        pl.BlockSpec((1, C), lambda n: (0, 0)),
        pl.BlockSpec((1, C), lambda n: (0, 0)),
        pl.BlockSpec((3, 3, C, Cout), lambda n: (0, 0, 0, 0)),
    ]
    args = [x, scale, shift, w]
    if res_kind == "dense_same":
        in_specs.append(pl.BlockSpec((1, H, W * Cout), lambda n: (n, 0, 0)))
        args.append(residual)
    elif res_kind == "even_subsample":
        Cr2 = residual.shape[-1]
        # Block selects row-parity 0 (even rows) of the pre-downsample input.
        in_specs.append(
            pl.BlockSpec((1, H, 1, W, Cr2), lambda n: (n, 0, 0, 0, 0)))
        args.append(residual)

    out = pl.pallas_call(
        functools.partial(_bn_relu_conv3x3_s1_kernel, res_kind),
        out_shape=jax.ShapeDtypeStruct((N, H, W * Cout), x.dtype),
        grid_spec=pltpu.PrefetchScalarGridSpec(
            num_scalar_prefetch=0, grid=(N,),
            in_specs=in_specs,
            out_specs=pl.BlockSpec((1, H, W * Cout), lambda n: (n, 0, 0)),
            scratch_shapes=[pltpu.VMEM((H + 2, W + 2, C), jnp.float32),
                            pltpu.VMEM((H, W, Cout), jnp.float32)]),
        compiler_params=_compiler_params(),
    )(*args)
    return out.reshape(N, H, W, Cout)   # free row-major reinterpretation


def bn_relu_conv3x3_s2(x, scale, shift, w):
    """relu(x*scale+shift) -> 3x3 stride-2 pad-1 conv (stride-aware)."""
    N, H, W, C = x.shape
    assert H % 2 == 0 and W % 2 == 0, "stride-2 path assumes even H, W"
    # TODO(synk): odd spatial sizes (ceil-mode stride-2 output) not handled.
    Hh, Wh = H // 2, W // 2
    Cout = w.shape[-1]
    x5 = x.reshape(N, Hh, 2, Wh, 2 * C)   # free row-major parity view

    out = pl.pallas_call(
        _bn_relu_conv3x3_s2_kernel,
        out_shape=jax.ShapeDtypeStruct((N, Hh, Wh * Cout), x.dtype),
        grid_spec=pltpu.PrefetchScalarGridSpec(
            num_scalar_prefetch=0, grid=(N,),
            in_specs=[
                pl.BlockSpec((1, Hh, 2, Wh, 2 * C), lambda n: (n, 0, 0, 0, 0)),
                pl.BlockSpec((1, C), lambda n: (0, 0)),
                pl.BlockSpec((1, C), lambda n: (0, 0)),
                pl.BlockSpec((3, 3, C, Cout), lambda n: (0, 0, 0, 0)),
            ],
            out_specs=pl.BlockSpec((1, Hh, Wh * Cout), lambda n: (n, 0, 0)),
            scratch_shapes=[pltpu.VMEM((2, 2, Hh + 1, Wh + 1, C), jnp.float32),
                            pltpu.VMEM((Hh, Wh, Cout), jnp.float32)]),
        compiler_params=_compiler_params(),
    )(x5, scale, shift, w)
    return out.reshape(N, Hh, Wh, Cout)


# ------------------------------ module logic ------------------------------- #

def _bn_affine(gamma, beta, mean, var):
    s = gamma / jnp.sqrt(var + EPS)
    return s.reshape(1, -1), (beta - mean * s).reshape(1, -1)


def residual_module_forward_nhwc(x, params, stride):
    """ResidualModule forward (float mode, inference BN), NHWC in/out."""
    N, H, W, Cin = x.shape
    Cout = params["conv1_w"].shape[-1]

    s1, b1 = _bn_affine(params["bn1_gamma"], params["bn1_beta"],
                        params["bn1_mean"], params["bn1_var"])
    s2, b2 = _bn_affine(params["bn2_gamma"], params["bn2_beta"],
                        params["bn2_mean"], params["bn2_var"])

    # bf16 weights feed the MXU directly; accumulation stays f32 in-kernel.
    w1 = params["conv1_w"].astype(jnp.bfloat16)   # (3, 3, Cin,  Cout) HWIO
    w2 = params["conv2_w"].astype(jnp.bfloat16)   # (3, 3, Cout, Cout) HWIO

    if stride == 1 and Cin == Cout:
        h = bn_relu_conv3x3_s1(x, s1, b1, w1)                  # conv1
        res = x.reshape(N, H, W * Cin)          # free lane-dense identity view
        out = bn_relu_conv3x3_s1(h, s2, b2, w2, residual=res,
                                 res_kind="dense_same")        # conv2 + x
    elif stride == 2:
        # torch.cat((d, 0*d), 1) shortcut only type-checks when Cout == 2*Cin.
        assert Cout == 2 * Cin, "downsample shortcut requires Cout == 2*Cin"
        h = bn_relu_conv3x3_s2(x, s1, b1, w1)                  # strided conv1
        res = x.reshape(N, H // 2, 2, W // 2, 2 * Cin)  # free parity view of x
        out = bn_relu_conv3x3_s1(h, s2, b2, w2, residual=res,
                                 res_kind="even_subsample")    # conv2 + pad(d)
    else:
        raise NotImplementedError(
            "Supported configs: stride=1 with Cin==Cout (identity shortcut) "
            "or stride=2 with Cout==2*Cin (zero-pad shortcut).")
    return out


def residual_module_forward(x_nchw, params, stride):
    """NCHW wrapper matching the PyTorch module.  For stacked blocks prefer
    residual_module_forward_nhwc end-to-end (transpose once at the network
    boundary) to avoid two full-tensor HBM transposes per block."""
    x = jnp.transpose(x_nchw, (0, 2, 3, 1))            # NCHW -> NHWC
    out = residual_module_forward_nhwc(x, params, stride)
    return jnp.transpose(out, (0, 3, 1, 2))            # NHWC -> NCHW


def init_params(key, cin, cout):
    ks = jax.random.split(key, 10)
    return {
        "bn1_gamma": 1.0 + 0.1 * jax.random.normal(ks[0], (cin,), jnp.float32),
        "bn1_beta": 0.1 * jax.random.normal(ks[1], (cin,), jnp.float32),
        "bn1_mean": 0.1 * jax.random.normal(ks[2], (cin,), jnp.float32),
        "bn1_var": 1.0 + 0.1 * jnp.abs(jax.random.normal(ks[3], (cin,), jnp.float32)),
        "conv1_w": 0.1 * jax.random.normal(ks[4], (3, 3, cin, cout), jnp.float32),
        "bn2_gamma": 1.0 + 0.1 * jax.random.normal(ks[5], (cout,), jnp.float32),
        "bn2_beta": 0.1 * jax.random.normal(ks[6], (cout,), jnp.float32),
        "bn2_mean": 0.1 * jax.random.normal(ks[7], (cout,), jnp.float32),
        "bn2_var": 1.0 + 0.1 * jnp.abs(jax.random.normal(ks[8], (cout,), jnp.float32)),
        "conv2_w": 0.1 * jax.random.normal(ks[9], (3, 3, cout, cout), jnp.float32),
    }


# ------------------------------ pure-JAX ref -------------------------------- #

def reference_forward(x_nchw, params, stride):
    x = jnp.transpose(x_nchw, (0, 2, 3, 1))
    cin = x.shape[-1]
    cout = params["conv1_w"].shape[-1]
    s1, b1 = _bn_affine(params["bn1_gamma"], params["bn1_beta"],
                        params["bn1_mean"], params["bn1_var"])
    s2, b2 = _bn_affine(params["bn2_gamma"], params["bn2_beta"],
                        params["bn2_mean"], params["bn2_var"])
    dn = ("NHWC", "HWIO", "NHWC")
    h = jnp.maximum(x * s1 + b1, 0.0)
    c1 = lax.conv_general_dilated(h, params["conv1_w"], (stride, stride),
                                  ((1, 1), (1, 1)), dimension_numbers=dn)
    h2 = jnp.maximum(c1 * s2 + b2, 0.0)
    c2 = lax.conv_general_dilated(h2, params["conv2_w"], (1, 1),
                                  ((1, 1), (1, 1)), dimension_numbers=dn)
    if (cin == cout) and (stride == 1):
        res = x
    else:
        d = x[:, ::2, ::2, :]
        res = jnp.concatenate([d, d * 0.0], axis=-1)
    return jnp.transpose(c2 + res, (0, 3, 1, 2))


# ---------------------------------- main ------------------------------------ #

if __name__ == "__main__":
    key = jax.random.PRNGKey(0)
    configs = [
        # (N, Cin, H, W, Cout, stride)
        (2, 4, 16, 16, 8, 2),   # downsample block: strided conv1 + padded shortcut
        (2, 8, 16, 16, 8, 1),   # identity block
    ]
    for (N, Cin, H, W, Cout, stride) in configs:
        key, kx, kp = jax.random.split(key, 3)
        x = jax.random.normal(kx, (N, Cin, H, W), jnp.float32)
        params = init_params(kp, Cin, Cout)

        fwd = jax.jit(functools.partial(residual_module_forward, stride=stride))
        out = jax.block_until_ready(fwd(x, params))

        ref = reference_forward(x, params, stride)
        assert out.shape == ref.shape, (out.shape, ref.shape)
        err = float(jnp.max(jnp.abs(out - ref)))
        # bf16 matmul operands with f32 accumulation -> loosened tolerance.
        assert jnp.allclose(out, ref, atol=3e-2, rtol=3e-2), err

    print("KERNEL_OK")
</pallas_src>

<mosaic_0001>
module attributes {stable_mosaic.version = 11 : i64} {
  func.func @_bn_relu_conv3x3_s2_kernel(%arg0: i32, %arg1: memref<1x8x2x8x8xf32, #tpu.memory_space<vmem>>, %arg2: memref<1x4xf32, #tpu.memory_space<vmem>>, %arg3: memref<1x4xf32, #tpu.memory_space<vmem>>, %arg4: memref<3x3x4x8xbf16, #tpu.memory_space<vmem>>, %arg5: memref<1x8x64xf32, #tpu.memory_space<vmem>>, %arg6: memref<2x2x9x9x4xf32, #tpu.memory_space<vmem>>, %arg7: memref<8x8x8xf32, #tpu.memory_space<vmem>>) attributes {dimension_semantics = [#tpu.dimension_semantics<parallel>], iteration_bounds = array<i64: 2>, scalar_prefetch = 0 : i64, scratch_operands = 2 : i64, tpu.core_type = #tpu.core_type<tc>, window_params = [{transform_indices = @transform_0, window_bounds = array<i64: 1, 8, 2, 8, 8>}, {pipeline_mode = #tpu.pipeline_mode<synchronous>, transform_indices = @transform_1, window_bounds = array<i64: 1, 4>}, {pipeline_mode = #tpu.pipeline_mode<synchronous>, transform_indices = @transform_2, window_bounds = array<i64: 1, 4>}, {pipeline_mode = #tpu.pipeline_mode<synchronous>, transform_indices = @transform_3, window_bounds = array<i64: 3, 3, 4, 8>}, {transform_indices = @transform_4, window_bounds = array<i64: 1, 8, 64>}]} {
    %cst = arith.constant 0.000000e+00 : f32
    %0 = vector.broadcast %cst : f32 to vector<2x2x1x9x4xf32>
    %c0 = arith.constant 0 : index
    %c0_0 = arith.constant 0 : index
    %c0_1 = arith.constant 0 : index
    %c0_2 = arith.constant 0 : index
    %c0_3 = arith.constant 0 : index
    %1 = vector.load %arg6[%c0, %c0_0, %c0_1, %c0_2, %c0_3] : memref<2x2x9x9x4xf32, #tpu.memory_space<vmem>>, vector<2x2x1x9x4xf32>
    tpu.vector_store %arg6[%c0, %c0_0, %c0_1, %c0_2, %c0_3], %0 {strides = array<i32>} : memref<2x2x9x9x4xf32, #tpu.memory_space<vmem>>, vector<2x2x1x9x4xf32>,
    %cst_4 = arith.constant 0.000000e+00 : f32
    %2 = vector.broadcast %cst_4 : f32 to vector<2x2x9x1x4xf32>
    %c0_5 = arith.constant 0 : index
    %c0_6 = arith.constant 0 : index
    %c0_7 = arith.constant 0 : index
    %c0_8 = arith.constant 0 : index
    %c0_9 = arith.constant 0 : index
    %3 = vector.load %arg6[%c0_5, %c0_6, %c0_7, %c0_8, %c0_9] : memref<2x2x9x9x4xf32, #tpu.memory_space<vmem>>, vector<2x2x9x1x4xf32>
    tpu.vector_store %arg6[%c0_5, %c0_6, %c0_7, %c0_8, %c0_9], %2 {strides = array<i32>} : memref<2x2x9x9x4xf32, #tpu.memory_space<vmem>>, vector<2x2x9x1x4xf32>,
    %c0_10 = arith.constant 0 : index
    %c0_11 = arith.constant 0 : index
    %c0_12 = arith.constant 0 : index
    %c0_13 = arith.constant 0 : index
    %c0_14 = arith.constant 0 : index
    %4 = vector.load %arg1[%c0_10, %c0_11, %c0_12, %c0_13, %c0_14] : memref<1x8x2x8x8xf32, #tpu.memory_space<vmem>>, vector<1x8x1x8x4xf32>
    %5 = vector.shape_cast %4 : vector<1x8x1x8x4xf32> to vector<8x8x4xf32>
    %c0_15 = arith.constant 0 : index
    %c0_16 = arith.constant 0 : index
    %6 = vector.load %arg2[%c0_15, %c0_16] : memref<1x4xf32, #tpu.memory_space<vmem>>, vector<1x4xf32>
    %7 = vector.shape_cast %6 : vector<1x4xf32> to vector<1x1x4xf32>
    %8 = vector.broadcast %7 : vector<1x1x4xf32> to vector<8x8x4xf32>
    %9 = arith.mulf %5, %8 : vector<8x8x4xf32>
    %c0_17 = arith.constant 0 : index
    %c0_18 = arith.constant 0 : index
    %10 = vector.load %arg3[%c0_17, %c0_18] : memref<1x4xf32, #tpu.memory_space<vmem>>, vector<1x4xf32>
    %11 = vector.shape_cast %10 : vector<1x4xf32> to vector<1x1x4xf32>
    %12 = vector.broadcast %11 : vector<1x1x4xf32> to vector<8x8x4xf32>
    %13 = arith.addf %9, %12 : vector<8x8x4xf32>
    %cst_19 = arith.constant 0.000000e+00 : f32
    %14 = vector.broadcast %cst_19 : f32 to vector<8x8x4xf32>
    %15 = arith.maximumf %13, %14 : vector<8x8x4xf32>
    %c0_20 = arith.constant 0 : index
    %c0_21 = arith.constant 0 : index
    %c1 = arith.constant 1 : index
    %c1_22 = arith.constant 1 : index
    %c0_23 = arith.constant 0 : index
    %16 = vector.load %arg6[%c0_20, %c0_21, %c1, %c1_22, %c0_23] : memref<2x2x9x9x4xf32, #tpu.memory_space<vmem>>, vector<1x1x8x8x4xf32>
    %17 = vector.shape_cast %16 : vector<1x1x8x8x4xf32> to vector<8x8x4xf32>
    %18 = vector.shape_cast %15 : vector<8x8x4xf32> to vector<1x1x8x8x4xf32>
    tpu.vector_store %arg6[%c0_20, %c0_21, %c1, %c1_22, %c0_23], %18 {strides = array<i32>} : memref<2x2x9x9x4xf32, #tpu.memory_space<vmem>>, vector<1x1x8x8x4xf32>,
    %c0_24 = arith.constant 0 : index
    %c0_25 = arith.constant 0 : index
    %c0_26 = arith.constant 0 : index
    %c0_27 = arith.constant 0 : index
    %c4 = arith.constant 4 : index
    %19 = vector.load %arg1[%c0_24, %c0_25, %c0_26, %c0_27, %c4] : memref<1x8x2x8x8xf32, #tpu.memory_space<vmem>>, vector<1x8x1x8x4xf32>
    %20 = vector.shape_cast %19 : vector<1x8x1x8x4xf32> to vector<8x8x4xf32>
    %c0_28 = arith.constant 0 : index
    %c0_29 = arith.constant 0 : index
    %21 = vector.load %arg2[%c0_28, %c0_29] : memref<1x4xf32, #tpu.memory_space<vmem>>, vector<1x4xf32>
    %22 = vector.shape_cast %21 : vector<1x4xf32> to vector<1x1x4xf32>
    %23 = vector.broadcast %22 : vector<1x1x4xf32> to vector<8x8x4xf32>
    %24 = arith.mulf %20, %23 : vector<8x8x4xf32>
    %c0_30 = arith.constant 0 : index
    %c0_31 = arith.constant 0 : index
    %25 = vector.load %arg3[%c0_30, %c0_31] : memref<1x4xf32, #tpu.memory_space<vmem>>, vector<1x4xf32>
    %26 = vector.shape_cast %25 : vector<1x4xf32> to vector<1x1x4xf32>
    %27 = vector.broadcast %26 : vector<1x1x4xf32> to vector<8x8x4xf32>
    %28 = arith.addf %24, %27 : vector<8x8x4xf32>
    %cst_32 = arith.constant 0.000000e+00 : f32
    %29 = vector.broadcast %cst_32 : f32 to vector<8x8x4xf32>
    %30 = arith.maximumf %28, %29 : vector<8x8x4xf32>
    %c0_33 = arith.constant 0 : index
    %c1_34 = arith.constant 1 : index
    %c1_35 = arith.constant 1 : index
    %c1_36 = arith.constant 1 : index
    %c0_37 = arith.constant 0 : index
    %31 = vector.load %arg6[%c0_33, %c1_34, %c1_35, %c1_36, %c0_37] : memref<2x2x9x9x4xf32, #tpu.memory_space<vmem>>, vector<1x1x8x8x4xf32>
    %32 = vector.shape_cast %31 : vector<1x1x8x8x4xf32> to vector<8x8x4xf32>
    %33 = vector.shape_cast %30 : vector<8x8x4xf32> to vector<1x1x8x8x4xf32>
    tpu.vector_store %arg6[%c0_33, %c1_34, %c1_35, %c1_36, %c0_37], %33 {strides = array<i32>} : memref<2x2x9x9x4xf32, #tpu.memory_space<vmem>>, vector<1x1x8x8x4xf32>,
    %c0_38 = arith.constant 0 : index
    %c0_39 = arith.constant 0 : index
    %c1_40 = arith.constant 1 : index
    %c0_41 = arith.constant 0 : index
    %c0_42 = arith.constant 0 : index
    %34 = vector.load %arg1[%c0_38, %c0_39, %c1_40, %c0_41, %c0_42] : memref<1x8x2x8x8xf32, #tpu.memory_space<vmem>>, vector<1x8x1x8x4xf32>
    %35 = vector.shape_cast %34 : vector<1x8x1x8x4xf32> to vector<8x8x4xf32>
    %c0_43 = arith.constant 0 : index
    %c0_44 = arith.constant 0 : index
    %36 = vector.load %arg2[%c0_43, %c0_44] : memref<1x4xf32, #tpu.memory_space<vmem>>, vector<1x4xf32>
    %37 = vector.shape_cast %36 : vector<1x4xf32> to vector<1x1x4xf32>
    %38 = vector.broadcast %37 : vector<1x1x4xf32> to vector<8x8x4xf32>
    %39 = arith.mulf %35, %38 : vector<8x8x4xf32>
    %c0_45 = arith.constant 0 : index
    %c0_46 = arith.constant 0 : index
    %40 = vector.load %arg3[%c0_45, %c0_46] : memref<1x4xf32, #tpu.memory_space<vmem>>, vector<1x4xf32>
    %41 = vector.shape_cast %40 : vector<1x4xf32> to vector<1x1x4xf32>
    %42 = vector.broadcast %41 : vector<1x1x4xf32> to vector<8x8x4xf32>
    %43 = arith.addf %39, %42 : vector<8x8x4xf32>
    %cst_47 = arith.constant 0.000000e+00 : f32
    %44 = vector.broadcast %cst_47 : f32 to vector<8x8x4xf32>
    %45 = arith.maximumf %43, %44 : vector<8x8x4xf32>
    %c1_48 = arith.constant 1 : index
    %c0_49 = arith.constant 0 : index
    %c1_50 = arith.constant 1 : index
    %c1_51 = arith.constant 1 : index
    %c0_52 = arith.constant 0 : index
    %46 = vector.load %arg6[%c1_48, %c0_49, %c1_50, %c1_51, %c0_52] : memref<2x2x9x9x4xf32, #tpu.memory_space<vmem>>, vector<1x1x8x8x4xf32>
    %47 = vector.shape_cast %46 : vector<1x1x8x8x4xf32> to vector<8x8x4xf32>
    %48 = vector.shape_cast %45 : vector<8x8x4xf32> to vector<1x1x8x8x4xf32>
    tpu.vector_store %arg6[%c1_48, %c0_49, %c1_50, %c1_51, %c0_52], %48 {strides = array<i32>} : memref<2x2x9x9x4xf32, #tpu.memory_space<vmem>>, vector<1x1x8x8x4xf32>,
    %c0_53 = arith.constant 0 : index
    %c0_54 = arith.constant 0 : index
    %c1_55 = arith.constant 1 : index
    %c0_56 = arith.constant 0 : index
    %c4_57 = arith.constant 4 : index
    %49 = vector.load %arg1[%c0_53, %c0_54, %c1_55, %c0_56, %c4_57] : memref<1x8x2x8x8xf32, #tpu.memory_space<vmem>>, vector<1x8x1x8x4xf32>
    %50 = vector.shape_cast %49 : vector<1x8x1x8x4xf32> to vector<8x8x4xf32>
    %c0_58 = arith.constant 0 : index
    %c0_59 = arith.constant 0 : index
    %51 = vector.load %arg2[%c0_58, %c0_59] : memref<1x4xf32, #tpu.memory_space<vmem>>, vector<1x4xf32>
    %52 = vector.shape_cast %51 : vector<1x4xf32> to vector<1x1x4xf32>
    %53 = vector.broadcast %52 : vector<1x1x4xf32> to vector<8x8x4xf32>
    %54 = arith.mulf %50, %53 : vector<8x8x4xf32>
    %c0_60 = arith.constant 0 : index
    %c0_61 = arith.constant 0 : index
    %55 = vector.load %arg3[%c0_60, %c0_61] : memref<1x4xf32, #tpu.memory_space<vmem>>, vector<1x4xf32>
    %56 = vector.shape_cast %55 : vector<1x4xf32> to vector<1x1x4xf32>
    %57 = vector.broadcast %56 : vector<1x1x4xf32> to vector<8x8x4xf32>
    %58 = arith.addf %54, %57 : vector<8x8x4xf32>
    %cst_62 = arith.constant 0.000000e+00 : f32
    %59 = vector.broadcast %cst_62 : f32 to vector<8x8x4xf32>
    %60 = arith.maximumf %58, %59 : vector<8x8x4xf32>
    %c1_63 = arith.constant 1 : index
    %c1_64 = arith.constant 1 : index
    %c1_65 = arith.constant 1 : index
    %c1_66 = arith.constant 1 : index
    %c0_67 = arith.constant 0 : index
    %61 = vector.load %arg6[%c1_63, %c1_64, %c1_65, %c1_66, %c0_67] : memref<2x2x9x9x4xf32, #tpu.memory_space<vmem>>, vector<1x1x8x8x4xf32>
    %62 = vector.shape_cast %61 : vector<1x1x8x8x4xf32> to vector<8x8x4xf32>
    %63 = vector.shape_cast %60 : vector<8x8x4xf32> to vector<1x1x8x8x4xf32>
    tpu.vector_store %arg6[%c1_63, %c1_64, %c1_65, %c1_66, %c0_67], %63 {strides = array<i32>} : memref<2x2x9x9x4xf32, #tpu.memory_space<vmem>>, vector<1x1x8x8x4xf32>,
    %cst_68 = arith.constant 0.000000e+00 : f32
    %64 = vector.broadcast %cst_68 : f32 to vector<64x8xf32>
    %c1_69 = arith.constant 1 : index
    %c1_70 = arith.constant 1 : index
    %c0_71 = arith.constant 0 : index
    %c0_72 = arith.constant 0 : index
    %c0_73 = arith.constant 0 : index
    %65 = vector.load %arg6[%c1_69, %c1_70, %c0_71, %c0_72, %c0_73] : memref<2x2x9x9x4xf32, #tpu.memory_space<vmem>>, vector<1x1x8x8x4xf32>
    %66 = vector.shape_cast %65 : vector<1x1x8x8x4xf32> to vector<8x8x4xf32>
    %67 = vector.shape_cast %66 : vector<8x8x4xf32> to vector<64x4xf32>
    %68 = arith.truncf %67 : vector<64x4xf32> to vector<64x4xbf16>
    %c0_74 = arith.constant 0 : index
    %c0_75 = arith.constant 0 : index
    %c0_76 = arith.constant 0 : index
    %c0_77 = arith.constant 0 : index
    %69 = vector.load %arg4[%c0_74, %c0_75, %c0_76, %c0_77] : memref<3x3x4x8xbf16, #tpu.memory_space<vmem>>, vector<1x1x4x8xbf16>
    %70 = vector.shape_cast %69 : vector<1x1x4x8xbf16> to vector<4x8xbf16>
    %cst_78 = arith.constant dense<0.000000e+00> : vector<64x8xf32>
    %71 = tpu.matmul %68, %70, %cst_78 {dimension_numbers = #tpu.dot_dimension_numbers<[1], [0], [0], [1], [0, 0, 1, 1], [], []>} : vector<64x4xbf16>, vector<4x8xbf16>, vector<64x8xf32> -> vector<64x8xf32>
    %72 = arith.addf %64, %71 : vector<64x8xf32>
    %c1_79 = arith.constant 1 : index
    %c0_80 = arith.constant 0 : index
    %c0_81 = arith.constant 0 : index
    %c1_82 = arith.constant 1 : index
    %c0_83 = arith.constant 0 : index
    %73 = vector.load %arg6[%c1_79, %c0_80, %c0_81, %c1_82, %c0_83] : memref<2x2x9x9x4xf32, #tpu.memory_space<vmem>>, vector<1x1x8x8x4xf32>
    %74 = vector.shape_cast %73 : vector<1x1x8x8x4xf32> to vector<8x8x4xf32>
    %75 = vector.shape_cast %74 : vector<8x8x4xf32> to vector<64x4xf32>
    %76 = arith.truncf %75 : vector<64x4xf32> to vector<64x4xbf16>
    %c0_84 = arith.constant 0 : index
    %c1_85 = arith.constant 1 : index
    %c0_86 = arith.constant 0 : index
    %c0_87 = arith.constant 0 : index
    %77 = vector.load %arg4[%c0_84, %c1_85, %c0_86, %c0_87] : memref<3x3x4x8xbf16, #tpu.memory_space<vmem>>, vector<1x1x4x8xbf16>
    %78 = vector.shape_cast %77 : vector<1x1x4x8xbf16> to vector<4x8xbf16>
    %cst_88 = arith.constant dense<0.000000e+00> : vector<64x8xf32>
    %79 = tpu.matmul %76, %78, %cst_88 {dimension_numbers = #tpu.dot_dimension_numbers<[1], [0], [0], [1], [0, 0, 1, 1], [], []>} : vector<64x4xbf16>, vector<4x8xbf16>, vector<64x8xf32> -> vector<64x8xf32>
    %80 = arith.addf %72, %79 : vector<64x8xf32>
    %c1_89 = arith.constant 1 : index
    %c1_90 = arith.constant 1 : index
    %c0_91 = arith.constant 0 : index
    %c1_92 = arith.constant 1 : index
    %c0_93 = arith.constant 0 : index
    %81 = vector.load %arg6[%c1_89, %c1_90, %c0_91, %c1_92, %c0_93] : memref<2x2x9x9x4xf32, #tpu.memory_space<vmem>>, vector<1x1x8x8x4xf32>
    %82 = vector.shape_cast %81 : vector<1x1x8x8x4xf32> to vector<8x8x4xf32>
    %83 = vector.shape_cast %82 : vector<8x8x4xf32> to vector<64x4xf32>
    %84 = arith.truncf %83 : vector<64x4xf32> to vector<64x4xbf16>
    %c0_94 = arith.constant 0 : index
    %c2 = arith.constant 2 : index
    %c0_95 = arith.constant 0 : index
    %c0_96 = arith.constant 0 : index
    %85 = vector.load %arg4[%c0_94, %c2, %c0_95, %c0_96] : memref<3x3x4x8xbf16, #tpu.memory_space<vmem>>, vector<1x1x4x8xbf16>
    %86 = vector.shape_cast %85 : vector<1x1x4x8xbf16> to vector<4x8xbf16>
    %cst_97 = arith.constant dense<0.000000e+00> : vector<64x8xf32>
    %87 = tpu.matmul %84, %86, %cst_97 {dimension_numbers = #tpu.dot_dimension_numbers<[1], [0], [0], [1], [0, 0, 1, 1], [], []>} : vector<64x4xbf16>, vector<4x8xbf16>, vector<64x8xf32> -> vector<64x8xf32>
    %88 = arith.addf %80, %87 : vector<64x8xf32>
    %c0_98 = arith.constant 0 : index
    %c1_99 = arith.constant 1 : index
    %c1_100 = arith.constant 1 : index
    %c0_101 = arith.constant 0 : index
    %c0_102 = arith.constant 0 : index
    %89 = vector.load %arg6[%c0_98, %c1_99, %c1_100, %c0_101, %c0_102] : memref<2x2x9x9x4xf32, #tpu.memory_space<vmem>>, vector<1x1x8x8x4xf32>
    %90 = vector.shape_cast %89 : vector<1x1x8x8x4xf32> to vector<8x8x4xf32>
    %91 = vector.shape_cast %90 : vector<8x8x4xf32> to vector<64x4xf32>
    %92 = arith.truncf %91 : vector<64x4xf32> to vector<64x4xbf16>
    %c1_103 = arith.constant 1 : index
    %c0_104 = arith.constant 0 : index
    %c0_105 = arith.constant 0 : index
    %c0_106 = arith.constant 0 : index
    %93 = vector.load %arg4[%c1_103, %c0_104, %c0_105, %c0_106] : memref<3x3x4x8xbf16, #tpu.memory_space<vmem>>, vector<1x1x4x8xbf16>
    %94 = vector.shape_cast %93 : vector<1x1x4x8xbf16> to vector<4x8xbf16>
    %cst_107 = arith.constant dense<0.000000e+00> : vector<64x8xf32>
    %95 = tpu.matmul %92, %94, %cst_107 {dimension_numbers = #tpu.dot_dimension_numbers<[1], [0], [0], [1], [0, 0, 1, 1], [], []>} : vector<64x4xbf16>, vector<4x8xbf16>, vector<64x8xf32> -> vector<64x8xf32>
    %96 = arith.addf %88, %95 : vector<64x8xf32>
    %c0_108 = arith.constant 0 : index
    %c0_109 = arith.constant 0 : index
    %c1_110 = arith.constant 1 : index
    %c1_111 = arith.constant 1 : index
    %c0_112 = arith.constant 0 : index
    %97 = vector.load %arg6[%c0_108, %c0_109, %c1_110, %c1_111, %c0_112] : memref<2x2x9x9x4xf32, #tpu.memory_space<vmem>>, vector<1x1x8x8x4xf32>
    %98 = vector.shape_cast %97 : vector<1x1x8x8x4xf32> to vector<8x8x4xf32>
    %99 = vector.shape_cast %98 : vector<8x8x4xf32> to vector<64x4xf32>
    %100 = arith.truncf %99 : vector<64x4xf32> to vector<64x4xbf16>
    %c1_113 = arith.constant 1 : index
    %c1_114 = arith.constant 1 : index
    %c0_115 = arith.constant 0 : index
    %c0_116 = arith.constant 0 : index
    %101 = vector.load %arg4[%c1_113, %c1_114, %c0_115, %c0_116] : memref<3x3x4x8xbf16, #tpu.memory_space<vmem>>, vector<1x1x4x8xbf16>
    %102 = vector.shape_cast %101 : vector<1x1x4x8xbf16> to vector<4x8xbf16>
    %cst_117 = arith.constant dense<0.000000e+00> : vector<64x8xf32>
    %103 = tpu.matmul %100, %102, %cst_117 {dimension_numbers = #tpu.dot_dimension_numbers<[1], [0], [0], [1], [0, 0, 1, 1], [], []>} : vector<64x4xbf16>, vector<4x8xbf16>, vector<64x8xf32> -> vector<64x8xf32>
    %104 = arith.addf %96, %103 : vector<64x8xf32>
    %c0_118 = arith.constant 0 : index
    %c1_119 = arith.constant 1 : index
    %c1_120 = arith.constant 1 : index
    %c1_121 = arith.constant 1 : index
    %c0_122 = arith.constant 0 : index
    %105 = vector.load %arg6[%c0_118, %c1_119, %c1_120, %c1_121, %c0_122] : memref<2x2x9x9x4xf32, #tpu.memory_space<vmem>>, vector<1x1x8x8x4xf32>
    %106 = vector.shape_cast %105 : vector<1x1x8x8x4xf32> to vector<8x8x4xf32>
    %107 = vector.shape_cast %106 : vector<8x8x4xf32> to vector<64x4xf32>
    %108 = arith.truncf %107 : vector<64x4xf32> to vector<64x4xbf16>
    %c1_123 = arith.constant 1 : index
    %c2_124 = arith.constant 2 : index
    %c0_125 = arith.constant 0 : index
    %c0_126 = arith.constant 0 : index
    %109 = vector.load %arg4[%c1_123, %c2_124, %c0_125, %c0_126] : memref<3x3x4x8xbf16, #tpu.memory_space<vmem>>, vector<1x1x4x8xbf16>
    %110 = vector.shape_cast %109 : vector<1x1x4x8xbf16> to vector<4x8xbf16>
    %cst_127 = arith.constant dense<0.000000e+00> : vector<64x8xf32>
    %111 = tpu.matmul %108, %110, %cst_127 {dimension_numbers = #tpu.dot_dimension_numbers<[1], [0], [0], [1], [0, 0, 1, 1], [], []>} : vector<64x4xbf16>, vector<4x8xbf16>, vector<64x8xf32> -> vector<64x8xf32>
    %112 = arith.addf %104, %111 : vector<64x8xf32>
    %c1_128 = arith.constant 1 : index
    %c1_129 = arith.constant 1 : index
    %c1_130 = arith.constant 1 : index
    %c0_131 = arith.constant 0 : index
    %c0_132 = arith.constant 0 : index
    %113 = vector.load %arg6[%c1_128, %c1_129, %c1_130, %c0_131, %c0_132] : memref<2x2x9x9x4xf32, #tpu.memory_space<vmem>>, vector<1x1x8x8x4xf32>
    %114 = vector.shape_cast %113 : vector<1x1x8x8x4xf32> to vector<8x8x4xf32>
    %115 = vector.shape_cast %114 : vector<8x8x4xf32> to vector<64x4xf32>
    %116 = arith.truncf %115 : vector<64x4xf32> to vector<64x4xbf16>
    %c2_133 = arith.constant 2 : index
    %c0_134 = arith.constant 0 : index
    %c0_135 = arith.constant 0 : index
    %c0_136 = arith.constant 0 : index
    %117 = vector.load %arg4[%c2_133, %c0_134, %c0_135, %c0_136] : memref<3x3x4x8xbf16, #tpu.memory_space<vmem>>, vector<1x1x4x8xbf16>
    %118 = vector.shape_cast %117 : vector<1x1x4x8xbf16> to vector<4x8xbf16>
    %cst_137 = arith.constant dense<0.000000e+00> : vector<64x8xf32>
    %119 = tpu.matmul %116, %118, %cst_137 {dimension_numbers = #tpu.dot_dimension_numbers<[1], [0], [0], [1], [0, 0, 1, 1], [], []>} : vector<64x4xbf16>, vector<4x8xbf16>, vector<64x8xf32> -> vector<64x8xf32>
    %120 = arith.addf %112, %119 : vector<64x8xf32>
    %c1_138 = arith.constant 1 : index
    %c0_139 = arith.constant 0 : index
    %c1_140 = arith.constant 1 : index
    %c1_141 = arith.constant 1 : index
    %c0_142 = arith.constant 0 : index
    %121 = vector.load %arg6[%c1_138, %c0_139, %c1_140, %c1_141, %c0_142] : memref<2x2x9x9x4xf32, #tpu.memory_space<vmem>>, vector<1x1x8x8x4xf32>
    %122 = vector.shape_cast %121 : vector<1x1x8x8x4xf32> to vector<8x8x4xf32>
    %123 = vector.shape_cast %122 : vector<8x8x4xf32> to vector<64x4xf32>
    %124 = arith.truncf %123 : vector<64x4xf32> to vector<64x4xbf16>
    %c2_143 = arith.constant 2 : index
    %c1_144 = arith.constant 1 : index
    %c0_145 = arith.constant 0 : index
    %c0_146 = arith.constant 0 : index
    %125 = vector.load %arg4[%c2_143, %c1_144, %c0_145, %c0_146] : memref<3x3x4x8xbf16, #tpu.memory_space<vmem>>, vector<1x1x4x8xbf16>
    %126 = vector.shape_cast %125 : vector<1x1x4x8xbf16> to vector<4x8xbf16>
    %cst_147 = arith.constant dense<0.000000e+00> : vector<64x8xf32>
    %127 = tpu.matmul %124, %126, %cst_147 {dimension_numbers = #tpu.dot_dimension_numbers<[1], [0], [0], [1], [0, 0, 1, 1], [], []>} : vector<64x4xbf16>, vector<4x8xbf16>, vector<64x8xf32> -> vector<64x8xf32>
    %128 = arith.addf %120, %127 : vector<64x8xf32>
    %c1_148 = arith.constant 1 : index
    %c1_149 = arith.constant 1 : index
    %c1_150 = arith.constant 1 : index
    %c1_151 = arith.constant 1 : index
    %c0_152 = arith.constant 0 : index
    %129 = vector.load %arg6[%c1_148, %c1_149, %c1_150, %c1_151, %c0_152] : memref<2x2x9x9x4xf32, #tpu.memory_space<vmem>>, vector<1x1x8x8x4xf32>
    %130 = vector.shape_cast %129 : vector<1x1x8x8x4xf32> to vector<8x8x4xf32>
    %131 = vector.shape_cast %130 : vector<8x8x4xf32> to vector<64x4xf32>
    %132 = arith.truncf %131 : vector<64x4xf32> to vector<64x4xbf16>
    %c2_153 = arith.constant 2 : index
    %c2_154 = arith.constant 2 : index
    %c0_155 = arith.constant 0 : index
    %c0_156 = arith.constant 0 : index
    %133 = vector.load %arg4[%c2_153, %c2_154, %c0_155, %c0_156] : memref<3x3x4x8xbf16, #tpu.memory_space<vmem>>, vector<1x1x4x8xbf16>
    %134 = vector.shape_cast %133 : vector<1x1x4x8xbf16> to vector<4x8xbf16>
    %cst_157 = arith.constant dense<0.000000e+00> : vector<64x8xf32>
    %135 = tpu.matmul %132, %134, %cst_157 {dimension_numbers = #tpu.dot_dimension_numbers<[1], [0], [0], [1], [0, 0, 1, 1], [], []>} : vector<64x4xbf16>, vector<4x8xbf16>, vector<64x8xf32> -> vector<64x8xf32>
    %136 = arith.addf %128, %135 : vector<64x8xf32>
    %137 = vector.shape_cast %136 : vector<64x8xf32> to vector<8x8x8xf32>
    %c0_158 = arith.constant 0 : index
    %c0_159 = arith.constant 0 : index
    %c0_160 = arith.constant 0 : index
    %138 = vector.load %arg7[%c0_158, %c0_159, %c0_160] : memref<8x8x8xf32, #tpu.memory_space<vmem>>, vector<8x8x8xf32>
    tpu.vector_store %arg7[%c0_158, %c0_159, %c0_160], %137 {strides = array<i32>} : memref<8x8x8xf32, #tpu.memory_space<vmem>>, vector<8x8x8xf32>,
    %c0_161 = arith.constant 0 : index
    %c0_162 = arith.constant 0 : index
    %c0_163 = arith.constant 0 : index
    %139 = vector.load %arg7[%c0_161, %c0_162, %c0_163] : memref<8x8x8xf32, #tpu.memory_space<vmem>>, vector<8x1x8xf32>
    %140 = vector.shape_cast %139 : vector<8x1x8xf32> to vector<8x8xf32>
    %c0_164 = arith.constant 0 : index
    %c1_165 = arith.constant 1 : index
    %c0_166 = arith.constant 0 : index
    %141 = vector.load %arg7[%c0_164, %c1_165, %c0_166] : memref<8x8x8xf32, #tpu.memory_space<vmem>>, vector<8x1x8xf32>
    %142 = vector.shape_cast %141 : vector<8x1x8xf32> to vector<8x8xf32>
    %c0_167 = arith.constant 0 : index
    %c2_168 = arith.constant 2 : index
    %c0_169 = arith.constant 0 : index
    %143 = vector.load %arg7[%c0_167, %c2_168, %c0_169] : memref<8x8x8xf32, #tpu.memory_space<vmem>>, vector<8x1x8xf32>
    %144 = vector.shape_cast %143 : vector<8x1x8xf32> to vector<8x8xf32>
    %c0_170 = arith.constant 0 : index
    %c3 = arith.constant 3 : index
    %c0_171 = arith.constant 0 : index
    %145 = vector.load %arg7[%c0_170, %c3, %c0_171] : memref<8x8x8xf32, #tpu.memory_space<vmem>>, vector<8x1x8xf32>
    %146 = vector.shape_cast %145 : vector<8x1x8xf32> to vector<8x8xf32>
    %c0_172 = arith.constant 0 : index
    %c4_173 = arith.constant 4 : index
    %c0_174 = arith.constant 0 : index
    %147 = vector.load %arg7[%c0_172, %c4_173, %c0_174] : memref<8x8x8xf32, #tpu.memory_space<vmem>>, vector<8x1x8xf32>
    %148 = vector.shape_cast %147 : vector<8x1x8xf32> to vector<8x8xf32>
    %c0_175 = arith.constant 0 : index
    %c5 = arith.constant 5 : index
    %c0_176 = arith.constant 0 : index
    %149 = vector.load %arg7[%c0_175, %c5, %c0_176] : memref<8x8x8xf32, #tpu.memory_space<vmem>>, vector<8x1x8xf32>
    %150 = vector.shape_cast %149 : vector<8x1x8xf32> to vector<8x8xf32>
    %c0_177 = arith.constant 0 : index
    %c6 = arith.constant 6 : index
    %c0_178 = arith.constant 0 : index
    %151 = vector.load %arg7[%c0_177, %c6, %c0_178] : memref<8x8x8xf32, #tpu.memory_space<vmem>>, vector<8x1x8xf32>
    %152 = vector.shape_cast %151 : vector<8x1x8xf32> to vector<8x8xf32>
    %c0_179 = arith.constant 0 : index
    %c7 = arith.constant 7 : index
    %c0_180 = arith.constant 0 : index
    %153 = vector.load %arg7[%c0_179, %c7, %c0_180] : memref<8x8x8xf32, #tpu.memory_space<vmem>>, vector<8x1x8xf32>
    %154 = vector.shape_cast %153 : vector<8x1x8xf32> to vector<8x8xf32>
    %155 = tpu.concatenate %140, %142, %144, %146, %148, %150, %152, %154 in 1 : vector<8x8xf32>, vector<8x8xf32>, vector<8x8xf32>, vector<8x8xf32>, vector<8x8xf32>, vector<8x8xf32>, vector<8x8xf32>, vector<8x8xf32> -> vector<8x64xf32>
    %c0_181 = arith.constant 0 : index
    %c0_182 = arith.constant 0 : index
    %c0_183 = arith.constant 0 : index
    %156 = vector.load %arg5[%c0_181, %c0_182, %c0_183] : memref<1x8x64xf32, #tpu.memory_space<vmem>>, vector<1x8x64xf32>
    %157 = vector.shape_cast %156 : vector<1x8x64xf32> to vector<8x64xf32>
    %158 = vector.shape_cast %155 : vector<8x64xf32> to vector<1x8x64xf32>
    tpu.vector_store %arg5[%c0_181, %c0_182, %c0_183], %158 {strides = array<i32>} : memref<1x8x64xf32, #tpu.memory_space<vmem>>, vector<1x8x64xf32>,
    return
  }
  func.func @transform_0(%arg0: i32) -> (i32, i32, i32, i32, i32) {
    %c0_i32 = arith.constant 0 : i32
    %c0_i32_0 = arith.constant 0 : i32
    %c0_i32_1 = arith.constant 0 : i32
    %c0_i32_2 = arith.constant 0 : i32
    %c0_i32_3 = arith.constant 0 : i32
    return %arg0, %c0_i32, %c0_i32_0, %c0_i32_1, %c0_i32_2 : i32, i32, i32, i32, i32
  }
  func.func @transform_1(%arg0: i32) -> (i32, i32) {
    %c0_i32 = arith.constant 0 : i32
    %c0_i32_0 = arith.constant 0 : i32
    %c0_i32_1 = arith.constant 0 : i32
    return %c0_i32, %c0_i32_0 : i32, i32
  }
  func.func @transform_2(%arg0: i32) -> (i32, i32) {
    %c0_i32 = arith.constant 0 : i32
    %c0_i32_0 = arith.constant 0 : i32
    %c0_i32_1 = arith.constant 0 : i32
    return %c0_i32, %c0_i32_0 : i32, i32
  }
  func.func @transform_3(%arg0: i32) -> (i32, i32, i32, i32) {
    %c0_i32 = arith.constant 0 : i32
    %c0_i32_0 = arith.constant 0 : i32
    %c0_i32_1 = arith.constant 0 : i32
    %c0_i32_2 = arith.constant 0 : i32
    %c0_i32_3 = arith.constant 0 : i32
    return %c0_i32, %c0_i32_0, %c0_i32_1, %c0_i32_2 : i32, i32, i32, i32
  }
  func.func @transform_4(%arg0: i32) -> (i32, i32, i32) {
    %c0_i32 = arith.constant 0 : i32
    %c0_i32_0 = arith.constant 0 : i32
    %c0_i32_1 = arith.constant 0 : i32
    return %arg0, %c0_i32, %c0_i32_0 : i32, i32, i32
  }
}

module attributes {stable_mosaic.version = 11 : i64} {
  func.func @_bn_relu_conv3x3_s1_kernel(%arg0: i32, %arg1: memref<1x8x8x8xf32, #tpu.memory_space<vmem>>, %arg2: memref<1x8xf32, #tpu.memory_space<vmem>>, %arg3: memref<1x8xf32, #tpu.memory_space<vmem>>, %arg4: memref<3x3x8x8xbf16, #tpu.memory_space<vmem>>, %arg5: memref<1x8x1x8x8xf32, #tpu.memory_space<vmem>>, %arg6: memref<1x8x64xf32, #tpu.memory_space<vmem>>, %arg7: memref<10x10x8xf32, #tpu.memory_space<vmem>>, %arg8: memref<8x8x8xf32, #tpu.memory_space<vmem>>) attributes {dimension_semantics = [#tpu.dimension_semantics<parallel>], iteration_bounds = array<i64: 2>, scalar_prefetch = 0 : i64, scratch_operands = 2 : i64, tpu.core_type = #tpu.core_type<tc>, window_params = [{transform_indices = @transform_0, window_bounds = array<i64: 1, 8, 8, 8>}, {pipeline_mode = #tpu.pipeline_mode<synchronous>, transform_indices = @transform_1, window_bounds = array<i64: 1, 8>}, {pipeline_mode = #tpu.pipeline_mode<synchronous>, transform_indices = @transform_2, window_bounds = array<i64: 1, 8>}, {pipeline_mode = #tpu.pipeline_mode<synchronous>, transform_indices = @transform_3, window_bounds = array<i64: 3, 3, 8, 8>}, {transform_indices = @transform_4, window_bounds = array<i64: 1, 8, 1, 8, 8>}, {transform_indices = @transform_5, window_bounds = array<i64: 1, 8, 64>}]} {
    %cst = arith.constant 0.000000e+00 : f32
    %0 = vector.broadcast %cst : f32 to vector<1x10x8xf32>
    %c0 = arith.constant 0 : index
    %c0_0 = arith.constant 0 : index
    %c0_1 = arith.constant 0 : index
    %1 = vector.load %arg7[%c0, %c0_0, %c0_1] : memref<10x10x8xf32, #tpu.memory_space<vmem>>, vector<1x10x8xf32>
    tpu.vector_store %arg7[%c0, %c0_0, %c0_1], %0 {strides = array<i32>} : memref<10x10x8xf32, #tpu.memory_space<vmem>>, vector<1x10x8xf32>,
    %cst_2 = arith.constant 0.000000e+00 : f32
    %2 = vector.broadcast %cst_2 : f32 to vector<1x10x8xf32>
    %c9 = arith.constant 9 : index
    %c0_3 = arith.constant 0 : index
    %c0_4 = arith.constant 0 : index
    %3 = vector.load %arg7[%c9, %c0_3, %c0_4] : memref<10x10x8xf32, #tpu.memory_space<vmem>>, vector<1x10x8xf32>
    tpu.vector_store %arg7[%c9, %c0_3, %c0_4], %2 {strides = array<i32>} : memref<10x10x8xf32, #tpu.memory_space<vmem>>, vector<1x10x8xf32>,
    %cst_5 = arith.constant 0.000000e+00 : f32
    %4 = vector.broadcast %cst_5 : f32 to vector<10x1x8xf32>
    %c0_6 = arith.constant 0 : index
    %c0_7 = arith.constant 0 : index
    %c0_8 = arith.constant 0 : index
    %5 = vector.load %arg7[%c0_6, %c0_7, %c0_8] : memref<10x10x8xf32, #tpu.memory_space<vmem>>, vector<10x1x8xf32>
    tpu.vector_store %arg7[%c0_6, %c0_7, %c0_8], %4 {strides = array<i32>} : memref<10x10x8xf32, #tpu.memory_space<vmem>>, vector<10x1x8xf32>,
    %cst_9 = arith.constant 0.000000e+00 : f32
    %6 = vector.broadcast %cst_9 : f32 to vector<10x1x8xf32>
    %c0_10 = arith.constant 0 : index
    %c9_11 = arith.constant 9 : index
    %c0_12 = arith.constant 0 : index
    %7 = vector.load %arg7[%c0_10, %c9_11, %c0_12] : memref<10x10x8xf32, #tpu.memory_space<vmem>>, vector<10x1x8xf32>
    tpu.vector_store %arg7[%c0_10, %c9_11, %c0_12], %6 {strides = array<i32>} : memref<10x10x8xf32, #tpu.memory_space<vmem>>, vector<10x1x8xf32>,
    %c0_13 = arith.constant 0 : index
    %c0_14 = arith.constant 0 : index
    %c0_15 = arith.constant 0 : index
    %c0_16 = arith.constant 0 : index
    %8 = vector.load %arg1[%c0_13, %c0_14, %c0_15, %c0_16] : memref<1x8x8x8xf32, #tpu.memory_space<vmem>>, vector<1x8x8x8xf32>
    %9 = vector.shape_cast %8 : vector<1x8x8x8xf32> to vector<8x8x8xf32>
    %c0_17 = arith.constant 0 : index
    %c0_18 = arith.constant 0 : index
    %10 = vector.load %arg2[%c0_17, %c0_18] : memref<1x8xf32, #tpu.memory_space<vmem>>, vector<1x8xf32>
    %11 = vector.shape_cast %10 : vector<1x8xf32> to vector<1x1x8xf32>
    %12 = vector.broadcast %11 : vector<1x1x8xf32> to vector<8x8x8xf32>
    %13 = arith.mulf %9, %12 : vector<8x8x8xf32>
    %c0_19 = arith.constant 0 : index
    %c0_20 = arith.constant 0 : index
    %14 = vector.load %arg3[%c0_19, %c0_20] : memref<1x8xf32, #tpu.memory_space<vmem>>, vector<1x8xf32>
    %15 = vector.shape_cast %14 : vector<1x8xf32> to vector<1x1x8xf32>
    %16 = vector.broadcast %15 : vector<1x1x8xf32> to vector<8x8x8xf32>
    %17 = arith.addf %13, %16 : vector<8x8x8xf32>
    %cst_21 = arith.constant 0.000000e+00 : f32
    %18 = vector.broadcast %cst_21 : f32 to vector<8x8x8xf32>
    %19 = arith.maximumf %17, %18 : vector<8x8x8xf32>
    %c1 = arith.constant 1 : index
    %c1_22 = arith.constant 1 : index
    %c0_23 = arith.constant 0 : index
    %20 = vector.load %arg7[%c1, %c1_22, %c0_23] : memref<10x10x8xf32, #tpu.memory_space<vmem>>, vector<8x8x8xf32>
    tpu.vector_store %arg7[%c1, %c1_22, %c0_23], %19 {strides = array<i32>} : memref<10x10x8xf32, #tpu.memory_space<vmem>>, vector<8x8x8xf32>,
    %cst_24 = arith.constant 0.000000e+00 : f32
    %21 = vector.broadcast %cst_24 : f32 to vector<64x8xf32>
    %c0_25 = arith.constant 0 : index
    %c0_26 = arith.constant 0 : index
    %c0_27 = arith.constant 0 : index
    %22 = vector.load %arg7[%c0_25, %c0_26, %c0_27] : memref<10x10x8xf32, #tpu.memory_space<vmem>>, vector<8x8x8xf32>
    %23 = vector.shape_cast %22 : vector<8x8x8xf32> to vector<64x8xf32>
    %24 = arith.truncf %23 : vector<64x8xf32> to vector<64x8xbf16>
    %c0_28 = arith.constant 0 : index
    %c0_29 = arith.constant 0 : index
    %c0_30 = arith.constant 0 : index
    %c0_31 = arith.constant 0 : index
    %25 = vector.load %arg4[%c0_28, %c0_29, %c0_30, %c0_31] : memref<3x3x8x8xbf16, #tpu.memory_space<vmem>>, vector<1x1x8x8xbf16>
    %26 = vector.shape_cast %25 : vector<1x1x8x8xbf16> to vector<8x8xbf16>
    %cst_32 = arith.constant dense<0.000000e+00> : vector<64x8xf32>
    %27 = tpu.matmul %24, %26, %cst_32 {dimension_numbers = #tpu.dot_dimension_numbers<[1], [0], [0], [1], [0, 0, 1, 1], [], []>} : vector<64x8xbf16>, vector<8x8xbf16>, vector<64x8xf32> -> vector<64x8xf32>
    %28 = arith.addf %21, %27 : vector<64x8xf32>
    %c0_33 = arith.constant 0 : index
    %c1_34 = arith.constant 1 : index
    %c0_35 = arith.constant 0 : index
    %29 = vector.load %arg7[%c0_33, %c1_34, %c0_35] : memref<10x10x8xf32, #tpu.memory_space<vmem>>, vector<8x8x8xf32>
    %30 = vector.shape_cast %29 : vector<8x8x8xf32> to vector<64x8xf32>
    %31 = arith.truncf %30 : vector<64x8xf32> to vector<64x8xbf16>
    %c0_36 = arith.constant 0 : index
    %c1_37 = arith.constant 1 : index
    %c0_38 = arith.constant 0 : index
    %c0_39 = arith.constant 0 : index
    %32 = vector.load %arg4[%c0_36, %c1_37, %c0_38, %c0_39] : memref<3x3x8x8xbf16, #tpu.memory_space<vmem>>, vector<1x1x8x8xbf16>
    %33 = vector.shape_cast %32 : vector<1x1x8x8xbf16> to vector<8x8xbf16>
    %cst_40 = arith.constant dense<0.000000e+00> : vector<64x8xf32>
    %34 = tpu.matmul %31, %33, %cst_40 {dimension_numbers = #tpu.dot_dimension_numbers<[1], [0], [0], [1], [0, 0, 1, 1], [], []>} : vector<64x8xbf16>, vector<8x8xbf16>, vector<64x8xf32> -> vector<64x8xf32>
    %35 = arith.addf %28, %34 : vector<64x8xf32>
    %c0_41 = arith.constant 0 : index
    %c2 = arith.constant 2 : index
    %c0_42 = arith.constant 0 : index
    %36 = vector.load %arg7[%c0_41, %c2, %c0_42] : memref<10x10x8xf32, #tpu.memory_space<vmem>>, vector<8x8x8xf32>
    %37 = vector.shape_cast %36 : vector<8x8x8xf32> to vector<64x8xf32>
    %38 = arith.truncf %37 : vector<64x8xf32> to vector<64x8xbf16>
    %c0_43 = arith.constant 0 : index
    %c2_44 = arith.constant 2 : index
    %c0_45 = arith.constant 0 : index
    %c0_46 = arith.constant 0 : index
    %39 = vector.load %arg4[%c0_43, %c2_44, %c0_45, %c0_46] : memref<3x3x8x8xbf16, #tpu.memory_space<vmem>>, vector<1x1x8x8xbf16>
    %40 = vector.shape_cast %39 : vector<1x1x8x8xbf16> to vector<8x8xbf16>
    %cst_47 = arith.constant dense<0.000000e+00> : vector<64x8xf32>
    %41 = tpu.matmul %38, %40, %cst_47 {dimension_numbers = #tpu.dot_dimension_numbers<[1], [0], [0], [1], [0, 0, 1, 1], [], []>} : vector<64x8xbf16>, vector<8x8xbf16>, vector<64x8xf32> -> vector<64x8xf32>
    %42 = arith.addf %35, %41 : vector<64x8xf32>
    %c1_48 = arith.constant 1 : index
    %c0_49 = arith.constant 0 : index
    %c0_50 = arith.constant 0 : index
    %43 = vector.load %arg7[%c1_48, %c0_49, %c0_50] : memref<10x10x8xf32, #tpu.memory_space<vmem>>, vector<8x8x8xf32>
    %44 = vector.shape_cast %43 : vector<8x8x8xf32> to vector<64x8xf32>
    %45 = arith.truncf %44 : vector<64x8xf32> to vector<64x8xbf16>
    %c1_51 = arith.constant 1 : index
    %c0_52 = arith.constant 0 : index
    %c0_53 = arith.constant 0 : index
    %c0_54 = arith.constant 0 : index
    %46 = vector.load %arg4[%c1_51, %c0_52, %c0_53, %c0_54] : memref<3x3x8x8xbf16, #tpu.memory_space<vmem>>, vector<1x1x8x8xbf16>
    %47 = vector.shape_cast %46 : vector<1x1x8x8xbf16> to vector<8x8xbf16>
    %cst_55 = arith.constant dense<0.000000e+00> : vector<64x8xf32>
    %48 = tpu.matmul %45, %47, %cst_55 {dimension_numbers = #tpu.dot_dimension_numbers<[1], [0], [0], [1], [0, 0, 1, 1], [], []>} : vector<64x8xbf16>, vector<8x8xbf16>, vector<64x8xf32> -> vector<64x8xf32>
    %49 = arith.addf %42, %48 : vector<64x8xf32>
    %c1_56 = arith.constant 1 : index
    %c1_57 = arith.constant 1 : index
    %c0_58 = arith.constant 0 : index
    %50 = vector.load %arg7[%c1_56, %c1_57, %c0_58] : memref<10x10x8xf32, #tpu.memory_space<vmem>>, vector<8x8x8xf32>
    %51 = vector.shape_cast %50 : vector<8x8x8xf32> to vector<64x8xf32>
    %52 = arith.truncf %51 : vector<64x8xf32> to vector<64x8xbf16>
    %c1_59 = arith.constant 1 : index
    %c1_60 = arith.constant 1 : index
    %c0_61 = arith.constant 0 : index
    %c0_62 = arith.constant 0 : index
    %53 = vector.load %arg4[%c1_59, %c1_60, %c0_61, %c0_62] : memref<3x3x8x8xbf16, #tpu.memory_space<vmem>>, vector<1x1x8x8xbf16>
    %54 = vector.shape_cast %53 : vector<1x1x8x8xbf16> to vector<8x8xbf16>
    %cst_63 = arith.constant dense<0.000000e+00> : vector<64x8xf32>
    %55 = tpu.matmul %52, %54, %cst_63 {dimension_numbers = #tpu.dot_dimension_numbers<[1], [0], [0], [1], [0, 0, 1, 1], [], []>} : vector<64x8xbf16>, vector<8x8xbf16>, vector<64x8xf32> -> vector<64x8xf32>
    %56 = arith.addf %49, %55 : vector<64x8xf32>
    %c1_64 = arith.constant 1 : index
    %c2_65 = arith.constant 2 : index
    %c0_66 = arith.constant 0 : index
    %57 = vector.load %arg7[%c1_64, %c2_65, %c0_66] : memref<10x10x8xf32, #tpu.memory_space<vmem>>, vector<8x8x8xf32>
    %58 = vector.shape_cast %57 : vector<8x8x8xf32> to vector<64x8xf32>
    %59 = arith.truncf %58 : vector<64x8xf32> to vector<64x8xbf16>
    %c1_67 = arith.constant 1 : index
    %c2_68 = arith.constant 2 : index
    %c0_69 = arith.constant 0 : index
    %c0_70 = arith.constant 0 : index
    %60 = vector.load %arg4[%c1_67, %c2_68, %c0_69, %c0_70] : memref<3x3x8x8xbf16, #tpu.memory_space<vmem>>, vector<1x1x8x8xbf16>
    %61 = vector.shape_cast %60 : vector<1x1x8x8xbf16> to vector<8x8xbf16>
    %cst_71 = arith.constant dense<0.000000e+00> : vector<64x8xf32>
    %62 = tpu.matmul %59, %61, %cst_71 {dimension_numbers = #tpu.dot_dimension_numbers<[1], [0], [0], [1], [0, 0, 1, 1], [], []>} : vector<64x8xbf16>, vector<8x8xbf16>, vector<64x8xf32> -> vector<64x8xf32>
    %63 = arith.addf %56, %62 : vector<64x8xf32>
    %c2_72 = arith.constant 2 : index
    %c0_73 = arith.constant 0 : index
    %c0_74 = arith.constant 0 : index
    %64 = vector.load %arg7[%c2_72, %c0_73, %c0_74] : memref<10x10x8xf32, #tpu.memory_space<vmem>>, vector<8x8x8xf32>
    %65 = vector.shape_cast %64 : vector<8x8x8xf32> to vector<64x8xf32>
    %66 = arith.truncf %65 : vector<64x8xf32> to vector<64x8xbf16>
    %c2_75 = arith.constant 2 : index
    %c0_76 = arith.constant 0 : index
    %c0_77 = arith.constant 0 : index
    %c0_78 = arith.constant 0 : index
    %67 = vector.load %arg4[%c2_75, %c0_76, %c0_77, %c0_78] : memref<3x3x8x8xbf16, #tpu.memory_space<vmem>>, vector<1x1x8x8xbf16>
    %68 = vector.shape_cast %67 : vector<1x1x8x8xbf16> to vector<8x8xbf16>
    %cst_79 = arith.constant dense<0.000000e+00> : vector<64x8xf32>
    %69 = tpu.matmul %66, %68, %cst_79 {dimension_numbers = #tpu.dot_dimension_numbers<[1], [0], [0], [1], [0, 0, 1, 1], [], []>} : vector<64x8xbf16>, vector<8x8xbf16>, vector<64x8xf32> -> vector<64x8xf32>
    %70 = arith.addf %63, %69 : vector<64x8xf32>
    %c2_80 = arith.constant 2 : index
    %c1_81 = arith.constant 1 : index
    %c0_82 = arith.constant 0 : index
    %71 = vector.load %arg7[%c2_80, %c1_81, %c0_82] : memref<10x10x8xf32, #tpu.memory_space<vmem>>, vector<8x8x8xf32>
    %72 = vector.shape_cast %71 : vector<8x8x8xf32> to vector<64x8xf32>
    %73 = arith.truncf %72 : vector<64x8xf32> to vector<64x8xbf16>
    %c2_83 = arith.constant 2 : index
    %c1_84 = arith.constant 1 : index
    %c0_85 = arith.constant 0 : index
    %c0_86 = arith.constant 0 : index
    %74 = vector.load %arg4[%c2_83, %c1_84, %c0_85, %c0_86] : memref<3x3x8x8xbf16, #tpu.memory_space<vmem>>, vector<1x1x8x8xbf16>
    %75 = vector.shape_cast %74 : vector<1x1x8x8xbf16> to vector<8x8xbf16>
    %cst_87 = arith.constant dense<0.000000e+00> : vector<64x8xf32>
    %76 = tpu.matmul %73, %75, %cst_87 {dimension_numbers = #tpu.dot_dimension_numbers<[1], [0], [0], [1], [0, 0, 1, 1], [], []>} : vector<64x8xbf16>, vector<8x8xbf16>, vector<64x8xf32> -> vector<64x8xf32>
    %77 = arith.addf %70, %76 : vector<64x8xf32>
    %c2_88 = arith.constant 2 : index
    %c2_89 = arith.constant 2 : index
    %c0_90 = arith.constant 0 : index
    %78 = vector.load %arg7[%c2_88, %c2_89, %c0_90] : memref<10x10x8xf32, #tpu.memory_space<vmem>>, vector<8x8x8xf32>
    %79 = vector.shape_cast %78 : vector<8x8x8xf32> to vector<64x8xf32>
    %80 = arith.truncf %79 : vector<64x8xf32> to vector<64x8xbf16>
    %c2_91 = arith.constant 2 : index
    %c2_92 = arith.constant 2 : index
    %c0_93 = arith.constant 0 : index
    %c0_94 = arith.constant 0 : index
    %81 = vector.load %arg4[%c2_91, %c2_92, %c0_93, %c0_94] : memref<3x3x8x8xbf16, #tpu.memory_space<vmem>>, vector<1x1x8x8xbf16>
    %82 = vector.shape_cast %81 : vector<1x1x8x8xbf16> to vector<8x8xbf16>
    %cst_95 = arith.constant dense<0.000000e+00> : vector<64x8xf32>
    %83 = tpu.matmul %80, %82, %cst_95 {dimension_numbers = #tpu.dot_dimension_numbers<[1], [0], [0], [1], [0, 0, 1, 1], [], []>} : vector<64x8xbf16>, vector<8x8xbf16>, vector<64x8xf32> -> vector<64x8xf32>
    %84 = arith.addf %77, %83 : vector<64x8xf32>
    %c0_96 = arith.constant 0 : index
    %c0_97 = arith.constant 0 : index
    %c0_98 = arith.constant 0 : index
    %c0_99 = arith.constant 0 : index
    %c0_100 = arith.constant 0 : index
    %85 = vector.load %arg5[%c0_96, %c0_97, %c0_98, %c0_99, %c0_100] : memref<1x8x1x8x8xf32, #tpu.memory_space<vmem>>, vector<1x8x1x8x4xf32>
    %86 = vector.shape_cast %85 : vector<1x8x1x8x4xf32> to vector<8x8x4xf32>
    %87 = vector.shape_cast %86 : vector<8x8x4xf32> to vector<64x4xf32>
    %cst_101 = arith.constant 0.000000e+00 : f32
    %88 = vector.broadcast %cst_101 : f32 to vector<64x4xf32>
    %89 = tpu.concatenate %87, %88 in 1 : vector<64x4xf32>, vector<64x4xf32> -> vector<64x8xf32>
    %90 = arith.addf %84, %89 : vector<64x8xf32>
    %91 = vector.shape_cast %90 : vector<64x8xf32> to vector<8x8x8xf32>
    %c0_102 = arith.constant 0 : index
    %c0_103 = arith.constant 0 : index
    %c0_104 = arith.constant 0 : index
    %92 = vector.load %arg8[%c0_102, %c0_103, %c0_104] : memref<8x8x8xf32, #tpu.memory_space<vmem>>, vector<8x8x8xf32>
    tpu.vector_store %arg8[%c0_102, %c0_103, %c0_104], %91 {strides = array<i32>} : memref<8x8x8xf32, #tpu.memory_space<vmem>>, vector<8x8x8xf32>,
    %c0_105 = arith.constant 0 : index
    %c0_106 = arith.constant 0 : index
    %c0_107 = arith.constant 0 : index
    %93 = vector.load %arg8[%c0_105, %c0_106, %c0_107] : memref<8x8x8xf32, #tpu.memory_space<vmem>>, vector<8x1x8xf32>
    %94 = vector.shape_cast %93 : vector<8x1x8xf32> to vector<8x8xf32>
    %c0_108 = arith.constant 0 : index
    %c1_109 = arith.constant 1 : index
    %c0_110 = arith.constant 0 : index
    %95 = vector.load %arg8[%c0_108, %c1_109, %c0_110] : memref<8x8x8xf32, #tpu.memory_space<vmem>>, vector<8x1x8xf32>
    %96 = vector.shape_cast %95 : vector<8x1x8xf32> to vector<8x8xf32>
    %c0_111 = arith.constant 0 : index
    %c2_112 = arith.constant 2 : index
    %c0_113 = arith.constant 0 : index
    %97 = vector.load %arg8[%c0_111, %c2_112, %c0_113] : memref<8x8x8xf32, #tpu.memory_space<vmem>>, vector<8x1x8xf32>
    %98 = vector.shape_cast %97 : vector<8x1x8xf32> to vector<8x8xf32>
    %c0_114 = arith.constant 0 : index
    %c3 = arith.constant 3 : index
    %c0_115 = arith.constant 0 : index
    %99 = vector.load %arg8[%c0_114, %c3, %c0_115] : memref<8x8x8xf32, #tpu.memory_space<vmem>>, vector<8x1x8xf32>
    %100 = vector.shape_cast %99 : vector<8x1x8xf32> to vector<8x8xf32>
    %c0_116 = arith.constant 0 : index
    %c4 = arith.constant 4 : index
    %c0_117 = arith.constant 0 : index
    %101 = vector.load %arg8[%c0_116, %c4, %c0_117] : memref<8x8x8xf32, #tpu.memory_space<vmem>>, vector<8x1x8xf32>
    %102 = vector.shape_cast %101 : vector<8x1x8xf32> to vector<8x8xf32>
    %c0_118 = arith.constant 0 : index
    %c5 = arith.constant 5 : index
    %c0_119 = arith.constant 0 : index
    %103 = vector.load %arg8[%c0_118, %c5, %c0_119] : memref<8x8x8xf32, #tpu.memory_space<vmem>>, vector<8x1x8xf32>
    %104 = vector.shape_cast %103 : vector<8x1x8xf32> to vector<8x8xf32>
    %c0_120 = arith.constant 0 : index
    %c6 = arith.constant 6 : index
    %c0_121 = arith.constant 0 : index
    %105 = vector.load %arg8[%c0_120, %c6, %c0_121] : memref<8x8x8xf32, #tpu.memory_space<vmem>>, vector<8x1x8xf32>
    %106 = vector.shape_cast %105 : vector<8x1x8xf32> to vector<8x8xf32>
    %c0_122 = arith.constant 0 : index
    %c7 = arith.constant 7 : index
    %c0_123 = arith.constant 0 : index
    %107 = vector.load %arg8[%c0_122, %c7, %c0_123] : memref<8x8x8xf32, #tpu.memory_space<vmem>>, vector<8x1x8xf32>
    %108 = vector.shape_cast %107 : vector<8x1x8xf32> to vector<8x8xf32>
    %109 = tpu.concatenate %94, %96, %98, %100, %102, %104, %106, %108 in 1 : vector<8x8xf32>, vector<8x8xf32>, vector<8x8xf32>, vector<8x8xf32>, vector<8x8xf32>, vector<8x8xf32>, vector<8x8xf32>, vector<8x8xf32> -> vector<8x64xf32>
    %c0_124 = arith.constant 0 : index
    %c0_125 = arith.constant 0 : index
    %c0_126 = arith.constant 0 : index
    %110 = vector.load %arg6[%c0_124, %c0_125, %c0_126] : memref<1x8x64xf32, #tpu.memory_space<vmem>>, vector<1x8x64xf32>
    %111 = vector.shape_cast %110 : vector<1x8x64xf32> to vector<8x64xf32>
    %112 = vector.shape_cast %109 : vector<8x64xf32> to vector<1x8x64xf32>
    tpu.vector_store %arg6[%c0_124, %c0_125, %c0_126], %112 {strides = array<i32>} : memref<1x8x64xf32, #tpu.memory_space<vmem>>, vector<1x8x64xf32>,
    return
  }
  func.func @transform_0(%arg0: i32) -> (i32, i32, i32, i32) {
    %c0_i32 = arith.constant 0 : i32
    %c0_i32_0 = arith.constant 0 : i32
    %c0_i32_1 = arith.constant 0 : i32
    %c0_i32_2 = arith.constant 0 : i32
    return %arg0, %c0_i32, %c0_i32_0, %c0_i32_1 : i32, i32, i32, i32
  }
  func.func @transform_1(%arg0: i32) -> (i32, i32) {
    %c0_i32 = arith.constant 0 : i32
    %c0_i32_0 = arith.constant 0 : i32
    %c0_i32_1 = arith.constant 0 : i32
    return %c0_i32, %c0_i32_0 : i32, i32
  }
  func.func @transform_2(%arg0: i32) -> (i32, i32) {
    %c0_i32 = arith.constant 0 : i32
    %c0_i32_0 = arith.constant 0 : i32
    %c0_i32_1 = arith.constant 0 : i32
    return %c0_i32, %c0_i32_0 : i32, i32
  }
  func.func @transform_3(%arg0: i32) -> (i32, i32, i32, i32) {
    %c0_i32 = arith.constant 0 : i32
    %c0_i32_0 = arith.constant 0 : i32
    %c0_i32_1 = arith.constant 0 : i32
    %c0_i32_2 = arith.constant 0 : i32
    %c0_i32_3 = arith.constant 0 : i32
    return %c0_i32, %c0_i32_0, %c0_i32_1, %c0_i32_2 : i32, i32, i32, i32
  }
  func.func @transform_4(%arg0: i32) -> (i32, i32, i32, i32, i32) {
    %c0_i32 = arith.constant 0 : i32
    %c0_i32_0 = arith.constant 0 : i32
    %c0_i32_1 = arith.constant 0 : i32
    %c0_i32_2 = arith.constant 0 : i32
    %c0_i32_3 = arith.constant 0 : i32
    return %arg0, %c0_i32, %c0_i32_0, %c0_i32_1, %c0_i32_2 : i32, i32, i32, i32, i32
  }
  func.func @transform_5(%arg0: i32) -> (i32, i32, i32) {
    %c0_i32 = arith.constant 0 : i32
    %c0_i32_0 = arith.constant 0 : i32
    %c0_i32_1 = arith.constant 0 : i32
    return %arg0, %c0_i32, %c0_i32_0 : i32, i32, i32
  }
}

</mosaic_0001>

<bundles_post_ra>
// kernel: residual_module_forward.3
= control target key start
LH: loop header
LB: loop body
LE: loop exit
PB: predicated region body
PF: predicated region fallthrough
CT: control target
= control target key end

     0   :  { %s2925_s0 = inlined_call_operand.hbm [shape: f32[2,8,8,8], index: 0, kind: input, shape index: {}]   ;;  %s2926_s1 = inlined_call_operand.hbm [shape: f32[1,8], index: 1, kind: input, shape index: {}]   ;;  %s2927_s2 = inlined_call_operand.hbm [shape: f32[1,8], index: 2, kind: input, shape index: {}]   ;;  %s2928_s3 = inlined_call_operand.hbm [shape: bf16[3,3,8,8], index: 3, kind: input, shape index: {}]   ;;  %s2929_s4 = inlined_call_operand.hbm [shape: f32[2,8,2,8,8], index: 4, kind: input, shape index: {}]   ;;  %s2930_s5 = inlined_call_operand.hbm [shape: f32[2,8,64], index: 5, kind: output, shape index: {}]  }
   0x1   :  { %2943 = sst [smem:[#allocation22_spill]] %s2925_s0 }
   0x2   :  { %2944 = sst [smem:[#allocation23_spill]] %s2926_s1 }
   0x3   :  { %10 = vsyncpa [#allocation5], 0 }
   0x4   :  { %12 = vsyncpa [#allocation5 + $0x1], 0 }
   0x5   :  { %13 = vsyncpa [#allocation8], 0 }
   0x6   :  { %14 = vsyncpa [#allocation11], 0 }
   0x7   :  { %15 = vsyncpa [#allocation6], 0 }
   0x8   :  { %17 = vsyncpa [#allocation6 + $0x1], 0  ;;  %s2399_s18 = smov 0   ;;  %s2401_s19 = smov 0  }
   0x9   :  { %s2403_s20 = smov 0   ;;  %s2405_s21 = smov 0  }
   0xa LB: > { %2945 = sst [smem:[#allocation19_spill]] %s2344_s20  ;;  %s2420_s22 = sadd.s32 4294967295, %s2348_s21   ;;  %s2348_s21 = sphi %s2405_s21, %s2975_s21   ;;  %s2344_s20 = sphi %s2403_s20, %s2977_s20   ;;  %s2340_s19 = sphi %s2401_s19, %s2979_s19   ;;  %s2336_s18 = sphi %s2399_s18, %s2978_s18  }
   0xb   : > { %s1757_s23 = sadd.s32 4294967294, %s2348_s21   ;;  %p43_p0 = scmp.ne.s32.totalorder %s2340_s19, %s2336_s18 }
   0xc   : > { %p2931_p1 = scmp.eq.s32.totalorder %s2420_s22, 0  ;;  %p162_p3 = scmp.eq.s32.totalorder %s1757_s23, 1 }
   0xd   : > { %p1758_p5 = scmp.ge.s32.totalorder %s2348_s21, 1  ;;  %p169_p7 = scmp.lt.s32.totalorder %s2348_s21, 3 }
   0xe   : > { %p2429_p4 = por %p2931_p1, %p43_p0  ;;  %p2434_p6 = por %p162_p3, %p43_p0 }
   0xf   : > { %p2439_p8 = pnand %p1758_p5, %p169_p7  ;;  %s2350_s27 = smov [#allocation7]  }
  0x10   : > { %s2946_s24 = scalar_select %p2429_p4, 1, 0 }
  0x11   : > { %s2947_s25 = scalar_select %p2434_p6, 1, 0 }
  0x12   : > { %s2948_s26 = scalar_select %p2439_p8, 1, 0 }
  0x13   : > { %s182_s28 = sshll.u32 %s2350_s27, 4  ;;  %p2049_p10 = pneg %p2439_p8  ;;  %s183_s28 = int_to_ptr.vmem [resolvable:$true] %s182_s28 }
  0x14   : > { %s2447_s29 = sadd.s32 1, %s2348_s21   ;;  %s30_s8 = sadd.s32 1, %s2344_s20 }
  0x15   : > { %2949 = sst [smem:[#allocation20_spill]] %s2447_s29  ;;  %p2451_p11 = pnand %p2049_p10, %p2931_p1 }
  0x16   : > { %s27_s6 = ssub.s32 %s2348_s21, %s2447_s29  ;;  %s2952_s1 = sld [smem:[#allocation23_spill]] }
  0x17   : > { %s2950_s30 = scalar_select %p2451_p11, 1, 0 }
  0x18   : > { %p2457_p12 = scmp.eq.s32.totalorder %s27_s6, 0  ;;  %p2472_p3 = pneg %p2451_p11 }
  0x1a   : > { %s2951_s7 = scalar_select %p2457_p12, 1, 0 }
  0x1c   : > { %s2126_s11 = scalar_lea.hbm %s2952_s1, 16 }
  0x1d   : > { %p2127_p0 = scmp.ne.s32.totalorder %s2952_s1, %s2126_s11  ;;  %p2133_p10 = scmp.lt.u32.totalorder %s2126_s11, %s2952_s1 }
  0x1f   : > { %p2129_p5 = pnand %p2472_p3, %p2127_p0 }
  0x21   : > { %p2130_p7 = pneg %p2129_p5 }
  0x23   : > { %p2135_p9 = pnand %p2133_p10, %p2130_p7 }
  0x25   : > { %2138 = shalt.err (!%p2135_p9)
}
  0x26   : > { %s2139_s17 = scalar_lea.vmem %s183_s28, 16  ;;  %s2146_s23 = scalar_lea.vmem %s183_s28, 32 }
  0x27   : > { %p2140_p1 = scmp.ne.s32.totalorder %s183_s28, %s2139_s17  ;;  %p2147_p6 = scmp.lt.s32.totalorder %s183_s28, %s183_s28 }
  0x28   : > { %p2148_p4 = scmp.lt.s32.totalorder %s2146_s23, %s2139_s17 }
  0x29   : > { %p2142_p2 = pnand %p2140_p1, %p2472_p3 }
  0x2a   : > { %p2149_p8 = por %p2148_p4, %p2147_p6 }
  0x2b   : > { %p2143_p13 = pneg %p2142_p2 }
  0x2d   : > { %p2150_p12 = pnand %p2149_p8, %p2143_p13 }
  0x2f   : > { %2153 = shalt.err (!%p2150_p12)
}
  0x30   : > { %2052 = dma.hbm_to_vmem [thread:$0]  (!%p2451_p11), %s2952_s1, 16, %s183_s28, [#allocation8]  }
  0x31   : > { %p2954_p1 = scmp.ne.s32.totalorder %s2951_s7, 0  ;;  %p38_p2 = scmp.eq.s32.totalorder %s2348_s21, 0 }
  0x32   : > { %p2956_p4 = scmp.ne.s32.totalorder %s2344_s20, %s2340_s19  ;;  %p2957_p6 = scmp.eq.s32.totalorder %s2420_s22, 1 }
  0x33   : > { %s2491_s9 = scalar_select %p2954_p1, %s2344_s20, %s30_s8  }
  0x34   : > { %p2499_p8 = por %p2957_p6, %p2956_p4  ;;  %p2073_p9 = scmp.lt.s32.totalorder %s2348_s21, 2 }
  0x35   : > { %2955 = sst [smem:[#allocation21_spill]] %s2491_s9  ;;  %s217_s11 = sand.u32 1, %s2348_s21  }
  0x36   : > { %s2958_s10 = scalar_select %p2499_p8, 1, 0 }
  0x37   : > { %p2959_p12 = pmov %p2956_p4  ;;  %s219_s12 = sand.u32 1, %s2344_s20  }
  0x38   : > { %s1818_s13 = sshll.u32 %s2348_s21, 10  ;;  %s2510_s15 = sshll.u32 %s219_s12, 6 }
  0x39   : > { %p39_p13 = por %p38_p2, %p2959_p12  ;;  %s2960_s0 = sld [smem:[#allocation22_spill]] }
  0x3a   : > { %s221_s17 = scalar_lea.vmem [#allocation4], %s2510_s15  ;;  %s2524_s27 = scalar_lea.sflag [#allocation5], %s217_s11 }
  0x3b   : > { %p2517_p0 = pnand %p2073_p9, %p39_p13  ;;  %s228_s23 = sshll.u32 %s221_s17, 4  ;;  %s2522_s23 = int_to_ptr.vmem [resolvable:$true] %s228_s23 }
  0x3d   : > { %s2961_s8 = scalar_select %p2517_p0, 1, 0 }
  0x3e   : > { %p2940_p7 = pneg %p2517_p0 }
  0x3f   : > { %s2515_s7 = scalar_lea.hbm %s2960_s0, %s1818_s13  ;;  %s2159_s16 = scalar_lea.hbm %s2960_s0, 2048 }
  0x40   : > { %s2154_s6 = scalar_lea.hbm %s2515_s7, 1024  ;;  %p2160_p2 = scmp.lt.u32.totalorder %s2515_s7, %s2960_s0 }
  0x41   : > { %p2155_p5 = scmp.ne.s32.totalorder %s2515_s7, %s2154_s6  ;;  %p2161_p4 = scmp.lt.u32.totalorder %s2159_s16, %s2154_s6 }
  0x42   : > { %p2163_p9 = scmp.lt.u32.totalorder %s2154_s6, %s2515_s7 }
  0x43   : > { %p2157_p10 = pnand %p2940_p7, %p2155_p5  ;;  %p2162_p6 = por %p2161_p4, %p2160_p2 }
  0x45   : > { %p2158_p1 = pneg %p2157_p10  ;;  %p2164_p12 = por %p2163_p9, %p2162_p6 }
  0x47   : > { %p2165_p13 = pnand %p2164_p12, %p2158_p1 }
  0x49   : > { %2168 = shalt.err (!%p2165_p13)
}
  0x4a   : > { %s2169_s11 = scalar_lea.vmem %s2522_s23, 1024  ;;  %s2351_s17 = smov [#allocation4]  }
  0x4b   : > { %p2170_p5 = scmp.ne.s32.totalorder %s2522_s23, %s2169_s11  ;;  %s2174_s12 = sshll.u32 %s2351_s17, 4  ;;  %s2175_s12 = int_to_ptr.vmem [resolvable:$false] %s2174_s12 }
  0x4c   : > { %s2176_s1 = scalar_lea.vmem %s2175_s12, 2048  ;;  %p2177_p11 = scmp.lt.s32.totalorder %s2522_s23, %s2175_s12 }
  0x4d   : > { %p2172_p10 = pnand %p2170_p5, %p2940_p7  ;;  %p2178_p2 = scmp.lt.s32.totalorder %s2176_s1, %s2169_s11 }
  0x4f   : > { %p2173_p8 = pneg %p2172_p10  ;;  %p2179_p4 = por %p2178_p2, %p2177_p11 }
  0x51   : > { %p2180_p6 = pnand %p2179_p4, %p2173_p8 }
  0x53   : > { %2183 = shalt.err (!%p2180_p6)
}
  0x54   : > { %s2352_s6 = smov 128   ;;  %s2353_s13 = smov 8  }
  0x55   : > { %2062 = dma.hbm_to_vmem [thread:$0]  (!%p2517_p0), %s2515_s7, 1024, %s2522_s23, %s2524_s27, %s2352_s6, %s2352_s6, %s2353_s13  }
  0x56   : > { %s242_s16 = scalar_lea.vmem [#allocation12], %s2510_s15  ;;  %s2354_s11 = smov [#allocation9]  }
  0x57   : > { %s249_s28 = sshll.u32 %s242_s16, 4  ;;  %s193_s17 = sshll.u32 %s2354_s11, 4  ;;  %s2556_s28 = int_to_ptr.vmem [resolvable:$true] %s249_s28  ;;  %s194_s17 = int_to_ptr.vmem [resolvable:$true] %s193_s17 }
  0x58   : > { %s2184_s0 = scalar_lea.hbm %s2927_s2, 16 }
  0x59   : > { %p2185_p11 = scmp.ne.s32.totalorder %s2927_s2, %s2184_s0  ;;  %p2191_p9 = scmp.lt.u32.totalorder %s2184_s0, %s2927_s2 }
  0x5b   : > { %p2187_p8 = pnand %p2185_p11, %p2472_p3 }
  0x5d   : > { %p2188_p1 = pneg %p2187_p8 }
  0x5f   : > { %p2193_p12 = pnand %p2191_p9, %p2188_p1 }
  0x61   : > { %2196 = shalt.err (!%p2193_p12)
}
  0x62   : > { %s2197_s15 = scalar_lea.vmem %s194_s17, 16  ;;  %s2204_s23 = scalar_lea.vmem %s194_s17, 32 }
  0x63   : > { %p2198_p13 = scmp.ne.s32.totalorder %s194_s17, %s2197_s15  ;;  %p2205_p2 = scmp.lt.s32.totalorder %s194_s17, %s194_s17 }
  0x64   : > { %p2206_p4 = scmp.lt.s32.totalorder %s2204_s23, %s2197_s15 }
  0x65   : > { %p2200_p5 = pnand %p2198_p13, %p2472_p3 }
  0x66   : > { %p2207_p6 = por %p2206_p4, %p2205_p2 }
  0x67   : > { %p2201_p10 = pneg %p2200_p5 }
  0x69   : > { %p2208_p7 = pnand %p2207_p6, %p2201_p10 }
  0x6b   : > { %2211 = shalt.err (!%p2208_p7)
}
  0x6c   : > { %p2962_p11 = scmp.ne.s32.totalorder %s2950_s30, 0  ;;  %s2355_s0 = smov [#allocation10]  }
  0x6d   : > { %s203_s29 = sshll.u32 %s2355_s0, 4  ;;  %s2212_s12 = scalar_lea.hbm %s2928_s3, 576  ;;  %s204_s29 = int_to_ptr.vmem [resolvable:$true] %s203_s29 }
  0x6e   : > { %2055 = dma.hbm_to_vmem [thread:$0]  (!%p2962_p11), %s2927_s2, 16, %s194_s17, [#allocation8]  }
  0x6f   : > { %p2213_p8 = scmp.ne.s32.totalorder %s2928_s3, %s2212_s12  ;;  %p2219_p9 = scmp.lt.u32.totalorder %s2212_s12, %s2928_s3 }
  0x71   : > { %p2215_p7 = pnand %p2213_p8, %p2472_p3 }
  0x73   : > { %p2216_p1 = pneg %p2215_p7 }
  0x75   : > { %p2221_p12 = pnand %p2219_p9, %p2216_p1 }
  0x77   : > { %2224 = shalt.err (!%p2221_p12)
}
  0x78   : > { %s2225_s17 = scalar_lea.vmem %s204_s29, 576  ;;  %p2233_p2 = scmp.lt.s32.totalorder %s204_s29, %s204_s29 }
  0x79   : > { %p2226_p13 = scmp.ne.s32.totalorder %s204_s29, %s2225_s17  ;;  %p2234_p4 = scmp.lt.s32.totalorder %s2225_s17, %s2225_s17 }
  0x7b   : > { %p2228_p5 = pnand %p2226_p13, %p2472_p3  ;;  %p2235_p6 = por %p2234_p4, %p2233_p2 }
  0x7d   : > { %p2229_p10 = pneg %p2228_p5 }
  0x7f   : > { %p2236_p0 = pnand %p2235_p6, %p2229_p10 }
  0x81   : > { %2239 = shalt.err (!%p2236_p0)
}
  0x82   : > { %s2356_s20 = smov 64   ;;  %s2357_s9 = smov 4  }
  0x83   : > { %2058 = dma.hbm_to_vmem [thread:$0]  (!%p2962_p11), %s2928_s3, 576, %s204_s29, [#allocation11], %s2356_s20, %s2356_s20, %s2357_s9  }
  0x84   : > { %s1819_s11 = sshll.u32 %s2348_s21, 11  ;;  %p2963_p0 = scmp.ne.s32.totalorder %s2961_s8, 0 }
  0x85   : > { %s2598_s1 = scalar_lea.hbm %s2929_s4, %s1819_s11  ;;  %s2245_s29 = scalar_lea.hbm %s2929_s4, 4096 }
  0x86   : > { %s2240_s7 = scalar_lea.hbm %s2598_s1, 1024  ;;  %p2964_p8 = pneg %p2963_p0 }
  0x87   : > { %p2241_p3 = scmp.ne.s32.totalorder %s2598_s1, %s2240_s7  ;;  %p2246_p11 = scmp.lt.u32.totalorder %s2598_s1, %s2929_s4 }
  0x88   : > { %p2247_p9 = scmp.lt.u32.totalorder %s2245_s29, %s2240_s7  ;;  %p2249_p13 = scmp.lt.u32.totalorder %s2240_s7, %s2598_s1 }
  0x89   : > { %p2243_p7 = pnand %p2241_p3, %p2964_p8 }
  0x8a   : > { %p2248_p12 = por %p2247_p9, %p2246_p11 }
  0x8b   : > { %p2244_p1 = pneg %p2243_p7 }
  0x8c   : > { %p2250_p5 = por %p2249_p13, %p2248_p12 }
  0x8e   : > { %p2251_p10 = pnand %p2250_p5, %p2244_p1 }
  0x90   : > { %2254 = shalt.err (!%p2251_p10)
}
  0x91   : > { %s2255_s20 = scalar_lea.vmem %s2556_s28, 1024  ;;  %p2965_p4 = pmov %p2964_p8 }
  0x92   : > { %p2256_p2 = scmp.ne.s32.totalorder %s2556_s28, %s2255_s20  ;;  %s2358_s9 = smov [#allocation12]  }
  0x93   : > { %s2260_s0 = sshll.u32 %s2358_s9, 4  ;;  %s2261_s0 = int_to_ptr.vmem [resolvable:$false] %s2260_s0 }
  0x94   : > { %p2258_p6 = pnand %p2256_p2, %p2965_p4  ;;  %s2262_s16 = scalar_lea.vmem %s2261_s0, 2048 }
  0x95   : > { %p2263_p8 = scmp.lt.s32.totalorder %s2556_s28, %s2261_s0  ;;  %p2264_p7 = scmp.lt.s32.totalorder %s2262_s16, %s2255_s20 }
  0x96   : > { %p2259_p3 = pneg %p2258_p6 }
  0x97   : > { %p2265_p11 = por %p2264_p7, %p2263_p8 }
  0x99   : > { %p2266_p9 = pnand %p2265_p11, %p2259_p3 }
  0x9b   : > { %2269 = shalt.err (!%p2266_p9)
}
  0x9c   : > { %s2359_s11 = smov 256   ;;  %p2966_p1 = scmp.ne.s32.totalorder %s2948_s26, 0 }
  0x9d   : > { %2065 = dma.hbm_to_vmem [thread:$0]  (!%p2963_p0), %s2598_s1, 1024, %s2556_s28, %s2524_s27, %s2359_s11, %s2352_s6, %s2353_s13  }
  0x9e   : > { %261 = sbr.rel (%p2966_p1) target bundleno = 649 (0x289), region = 40  ;;  %s263_s12 = sand.u32 (!%p2966_p1), 1, %s2420_s22  }
  0x9f   : > { %s2630_s14 = sand.u32 (!%p2966_p1), 1, %s2340_s19   ;;  %s264_s30 = scalar_lea.sflag (!%p2966_p1), [#allocation5], %s263_s12 }
  0xa0   : > { %s1770_s7 = sshll.u32 (!%p2966_p1), %s2630_s14, 6  ;;  %p2967_p12 = scmp.ne.s32.totalorder (!%p2966_p1), %s2946_s24, 0 }
  0xa1   : > { %s2633_s15 = scalar_lea.vmem (!%p2966_p1), [#allocation4], %s1770_s7 }
  0xa5   : > { %2315 = dma.done.wait (%p2967_p12), %s264_s30, 1024  }
  0xa6   : > { %2317 = vsyncadd (%p2967_p12), %s264_s30, 4294966272  ;;  %p2968_p0 = scmp.eq.s32.totalorder %s2420_s22, 0 }
  0xa8   : > { %2319 = dma.done.wait (%p2968_p0), [#allocation8], 32   ;;  %p2969_p13 = pmov %p2968_p0 }
  0xa9   : > { %p2970_p5 = pmov %p2968_p0 }
  0xaa   : > { %2321 = vsyncadd (%p2969_p13), [#allocation8], 4294967264 }
  0xab   : > { %2323 = dma.done.wait (%p2970_p5), [#allocation11], 576   ;;  %p2971_p10 = pmov %p2968_p0 }
  0xac   : > { %s2647_s26 = scalar_lea.vmem [#allocation12], %s1770_s7 }
  0xad   : > { %2325 = vsyncadd (%p2971_p10), [#allocation11], 4294966720 }
  0xae   : > { %2327 = dma.done.wait (%p2967_p12), %s264_s30, 1024  }
  0xaf   : > { %2329 = vsyncadd (%p2967_p12), %s264_s30, 4294966272  ;;  %vm321_vm0 = vcmask 64512   ;;  %vm323_vm1 = vcmask 58368   ;;  %v2360_v0 = vmov 0.0   ;;  %vm328_vm2 = vcmask 57344   ;;  %v349_v3 = vld [vmem:[%s2633_s15] sm:$0xff] }
  0xb0   : > { %322 = vst.msk [vmem:[#allocation2] sm:$0xff] %vm321_vm0, %v2360_v0  ;;  %326 = vst.msk [vmem:[#allocation2 + $0x90] sm:$0xff] %vm321_vm0, %v2360_v0  ;;  %vm443_vm3 = vcmask 1043456   ;;  %v430_v1 = vld [vmem:[#allocation10 + $0x4] sm:$0xf]  ;;  %v351_v13 = vld [vmem:[%s2633_s15 + $0x10] sm:$0xff] }
  0xb1   : > { %324 = vst.msk [vmem:[#allocation2 + $0x8] sm:$0x3] %vm323_vm1, %v2360_v0  ;;  %327 = vst.msk [vmem:[#allocation2 + $0x98] sm:$0x3] %vm323_vm1, %v2360_v0  ;;  %v2675_v2 = vld [vmem:[#allocation10 + $0x10] sm:$0xf]  ;;  %2021 = vmatprep.subr.msk.bf16.mxu1 %vm443_vm3, %v430_v1 }
  0xb2   : > { %329 = vst.msk [vmem:[#allocation2] sm:$0x1] %vm328_vm2, %v2360_v0  ;;  %339 = vst.msk [vmem:[#allocation2 + $0x9] sm:$0x1] %vm328_vm2, %v2360_v0  ;;  %2025 = vmatprep.subr.msk.bf16.mxu0 %vm443_vm3, %v2675_v2  ;;  %v445_v4 = vsel %vm443_vm3, %v430_v1, 0  ;;  %v2684_v5 = vsel %vm443_vm3, %v2675_v2, 0 }
  0xb3   : > { %330 = vst.msk [vmem:[#allocation2 + $0x10] sm:$0x1] %vm328_vm2, %v2360_v0  ;;  %331 = vst.msk [vmem:[#allocation2 + $0x20] sm:$0x1] %vm328_vm2, %v2360_v0  ;;  %v1776_v6 = vld [vmem:[#allocation7] ss:$0 sm:$0xff]  ;;  %1866 = vmatpush3.bf16.msra.mxu1 %v445_v4  ;;  %1906 = vmatpush3.bf16.msra.mxu0 %v2684_v5 }
  0xb4   : > { %332 = vst.msk [vmem:[#allocation2 + $0x30] sm:$0x1] %vm328_vm2, %v2360_v0  ;;  %333 = vst.msk [vmem:[#allocation2 + $0x40] sm:$0x1] %vm328_vm2, %v2360_v0  ;;  %v1777_v7 = vld [vmem:[#allocation9] ss:$0 sm:$0xff]  ;;  %v364_v8 = vmul.f32 %v1776_v6, %v349_v3  ;;  %v366_v16 = vmul.f32 %v1776_v6, %v351_v13 }
  0xb5   : > { %334 = vst.msk [vmem:[#allocation2 + $0x50] sm:$0x1] %vm328_vm2, %v2360_v0  ;;  %335 = vst.msk [vmem:[#allocation2 + $0x60] sm:$0x1] %vm328_vm2, %v2360_v0  ;;  %v416_v9 = vld [vmem:[#allocation10] sm:$0xf] }
  0xb6   : > { %336 = vst.msk [vmem:[#allocation2 + $0x70] sm:$0x1] %vm328_vm2, %v2360_v0  ;;  %337 = vst.msk [vmem:[#allocation2 + $0x80] sm:$0x1] %vm328_vm2, %v2360_v0  ;;  %v350_v10 = vld [vmem:[%s2633_s15 + $0x8] sm:$0xff]  ;;  %2022 = vmatprep.subr.msk.bf16.mxu1 %vm443_vm3, %v416_v9  ;;  %v352_v14 = vld [vmem:[%s2633_s15 + $0x18] sm:$0xff]  ;;  %v379_v15 = vadd.f32 %v1777_v7, %v364_v8  ;;  %v381_v26 = vadd.f32 %v1777_v7, %v366_v16 }
  0xb7   : > { %340 = vst.msk [vmem:[#allocation2 + $0x19] sm:$0x1] %vm328_vm2, %v2360_v0  ;;  %341 = vst.msk [vmem:[#allocation2 + $0x29] sm:$0x1] %vm328_vm2, %v2360_v0  ;;  %v365_v11 = vmul.f32 %v1776_v6, %v350_v10  ;;  %v911_v12 = vld [vmem:[#allocation10 + $0x14] sm:$0xf]  ;;  %v367_v17 = vmul.f32 %v1776_v6, %v352_v14 }
  0xb8   : > { %342 = vst.msk [vmem:[#allocation2 + $0x39] sm:$0x1] %vm328_vm2, %v2360_v0  ;;  %343 = vst.msk [vmem:[#allocation2 + $0x49] sm:$0x1] %vm328_vm2, %v2360_v0  ;;  %2027 = vmatprep.subr.msk.bf16.mxu0 %vm443_vm3, %v911_v12  ;;  %v353_v18 = vld [vmem:[%s2633_s15 + $0x20] sm:$0xff]  ;;  %v354_v19 = vld [vmem:[%s2633_s15 + $0x28] sm:$0xff] }
  0xb9   : > { %344 = vst.msk [vmem:[#allocation2 + $0x59] sm:$0x1] %vm328_vm2, %v2360_v0  ;;  %345 = vst.msk [vmem:[#allocation2 + $0x69] sm:$0x1] %vm328_vm2, %v2360_v0  ;;  %v355_v20 = vld [vmem:[%s2633_s15 + $0x30] sm:$0xff]  ;;  %v380_v21 = vadd.f32 %v1777_v7, %v365_v11  ;;  %v368_v22 = vmul.f32 %v1776_v6, %v353_v18  ;;  %v369_v23 = vmul.f32 %v1776_v6, %v354_v19  ;;  %v387_v25 = vmax.f32 %v379_v15, 0.0 }
  0xba   : > { %346 = vst.msk [vmem:[#allocation2 + $0x79] sm:$0x1] %vm328_vm2, %v2360_v0  ;;  %347 = vst.msk [vmem:[#allocation2 + $0x89] sm:$0x1] %vm328_vm2, %v2360_v0  ;;  %v370_v24 = vmul.f32 %v1776_v6, %v355_v20  ;;  %v382_v27 = vadd.f32 %v1777_v7, %v367_v17  ;;  %v356_v28 = vld [vmem:[%s2633_s15 + $0x38] sm:$0xff]  ;;  %v389_v33 = vmax.f32 %v381_v26, 0.0 }
  0xbb   : > { %348 = vst.msk [vmem:[#allocation2 + $0x99] sm:$0x1] %vm328_vm2, %v2360_v0  ;;  %338 = vst.msk [vmem:[#allocation2 + $0x90] sm:$0x1] %vm328_vm2, %v2360_v0  ;;  %v388_v29 = vmax.f32 %v380_v21, 0.0  ;;  %v383_v30 = vadd.f32 %v1777_v7, %v368_v22  ;;  %v384_v31 = vadd.f32 %v1777_v7, %v369_v23  ;;  %v371_v35 = vmul.f32 %v1776_v6, %v356_v28  ;;  %v417_v41 = vld [vmem:[#allocation2 + $0x1] sm:$0xff] }
  0xbc   : > { %v385_v32 = vadd.f32 %v1777_v7, %v370_v24  ;;  %396 = vst.msk [vmem:[#allocation2 + $0x11] sm:$0xff] %vm321_vm0, %v387_v25  ;;  %v390_v34 = vmax.f32 %v382_v27, 0.0  ;;  %398 = vst.msk [vmem:[#allocation2 + $0x31] sm:$0xff] %vm321_vm0, %v389_v33  ;;  %v525_v49 = vsel %vm443_vm3, %v416_v9, 0  ;;  %v925_v53 = vsel %vm443_vm3, %v911_v12, 0  ;;  %v404_v61 = vld [vmem:[#allocation2] sm:$0xff] }
  0xbd   : > { %397 = vst.msk [vmem:[#allocation2 + $0x21] sm:$0xff] %vm321_vm0, %v388_v29  ;;  %v391_v36 = vmax.f32 %v383_v30, 0.0  ;;  %v392_v37 = vmax.f32 %v384_v31, 0.0  ;;  %v386_v39 = vadd.f32 %v1777_v7, %v371_v35  ;;  %v1014_v57 = vld [vmem:[#allocation10 + $0x18] sm:$0xf]  ;;  %v592_v24 = vld [vmem:[#allocation2 + $0x2] sm:$0xff] }
  0xbe   : > { %v393_v38 = vmax.f32 %v385_v32, 0.0  ;;  %399 = vst.msk [vmem:[#allocation2 + $0x41] sm:$0xff] %vm321_vm0, %v390_v34  ;;  %v605_v58 = vld [vmem:[#allocation10 + $0x8] sm:$0xf]  ;;  %v1028_v11 = vsel %vm443_vm3, %v1014_v57, 0  ;;  %vm1315_vm4 = vcmask 31744  }
  0xbf   : > { %400 = vst.msk [vmem:[#allocation2 + $0x51] sm:$0xff] %vm321_vm0, %v391_v36  ;;  %401 = vst.msk [vmem:[#allocation2 + $0x61] sm:$0xff] %vm321_vm0, %v392_v37  ;;  %v394_v40 = vmax.f32 %v386_v39, 0.0  ;;  %v1116_v14 = vld [vmem:[#allocation10 + $0x1c] sm:$0xf]  ;;  %v619_v19 = vsel %vm443_vm3, %v605_v58, 0 }
  0xc0   : > { %402 = vst.msk [vmem:[#allocation2 + $0x71] sm:$0xff] %vm321_vm0, %v393_v38  ;;  %v707_v20 = vld [vmem:[#allocation10 + $0xc] sm:$0xf]  ;;  %v1130_v27 = vsel %vm443_vm3, %v1116_v14, 0  ;;  %v1218_v28 = vld [vmem:[#allocation10 + $0x20] sm:$0xf] }
  0xc1   : > { %403 = vst.msk [vmem:[#allocation2 + $0x81] sm:$0xff] %vm321_vm0, %v394_v40  ;;  %v721_v33 = vsel %vm443_vm3, %v707_v20, 0  ;;  %v1232_v37 = vsel %vm443_vm3, %v1218_v28, 0  ;;  %v1110_v39 = vld [vmem:[#allocation2 + $0x91] sm:$0xff]  ;;  %vm1413_vm5 = vcmask 1041409   ;;  %vm1416_vm6 = vcmask 1042434  }
  0xc2   : > { %v1008_v31 = vld [vmem:[#allocation2 + $0x90] sm:$0xff]  ;;  %vm1419_vm7 = vcmask 1043459   ;;  %vm1422_vm8 = vcmask 1044484   ;;  %vm1425_vm9 = vcmask 1045509   ;;  %vm1428_vm10 = vcmask 1046534   ;;  %s2361_s24 = smov 24  }
  0xc3   : > { %v418_v42 = vld [vmem:[#allocation2 + $0x11] sm:$0xff]  ;;  %vm1431_vm11 = vcmask 1047559   ;;  %s2362_s8 = smov 8   ;;  %s2363_s27 = smov 32   ;;  %vm1610_vm12 = vcmask 130048   ;;  %vm1612_vm13 = vcmask 195584  }
  0xc4   : > { %v2704_v43 = vld [vmem:[#allocation2 + $0x12] sm:$0xff]  ;;  %v425_v44 = vpack.c.bf16 %v418_v42, %v417_v41  ;;  %v797_v45 = vld [vmem:[#allocation2 + $0x21] sm:$0xff]  ;;  %s2364_s6 = smov 16   ;;  %s2365_s13 = smov 48   ;;  %vm1614_vm14 = vcmask 261120   ;;  %vm1616_vm15 = vcmask 326656  }
  0xc5   : > { %v2706_v46 = vld [vmem:[#allocation2 + $0x22] sm:$0xff]  ;;  %v804_v47 = vpack.c.bf16 %v797_v45, %v418_v42  ;;  %v420_v48 = vld [vmem:[#allocation2 + $0x31] sm:$0xff]  ;;  %v600_v26 = vpack.c.bf16 %v2704_v43, %v592_v24  ;;  %s2366_s28 = smov 40   ;;  %s2367_s1 = smov 56   ;;  %vm1618_vm1 = vcmask 392192   ;;  %vm1620_vm2 = vcmask 457728  }
  0xc6   : > { %v799_v50 = vld [vmem:[#allocation2 + $0x41] sm:$0xff]  ;;  %1867 = vmatprep.mubr.msk.bf16.mxu1 %vm321_vm0, %v425_v44  ;;  %v2710_v51 = vpack.c.bf16 %v420_v48, %v797_v45  ;;  %v2713_v54 = vld [vmem:[#allocation2 + $0x51] sm:$0xff]  ;;  %v906_v55 = vpack.c.bf16 %v2706_v46, %v2704_v43  ;;  %s1775_s29 = sshll.u32 %s2630_s14, 3  ;;  %s1815_s23 = sshll.u32 %s2420_s22, 7 }
  0xc7   : > { %v805_v52 = vpack.c.bf16 %v799_v50, %v420_v48  ;;  %1907 = vmatprep.mubr.msk.bf16.mxu0 %vm321_vm0, %v804_v47  ;;  %v2719_v56 = vpack.c.bf16 %v2713_v54, %v799_v50  ;;  %v2724_v59 = vld [vmem:[#allocation2 + $0x61] sm:$0xff]  ;;  %v2726_v60 = vld [vmem:[#allocation2 + $0x71] sm:$0xff]  ;;  %s319_s17 = scalar_lea.vmem [#allocation13], %s1775_s29  ;;  %s2881_s16 = scalar_lea.hbm %s2930_s5, %s1815_s23 }
  0xc8   : > { %1868 = vmatmul.mubr.msk.bf16.vlgmr.msra.gmra.mrb[0].mxu1 %vm321_vm0, %v2710_v51  ;;  %v2731_v62 = vld [vmem:[#allocation2 + $0x10] sm:$0xff]  ;;  %v2737_v63 = vpack.c.bf16 %v2726_v60, %v2724_v59  ;;  %v901_v1 = vld [vmem:[#allocation2 + $0x42] sm:$0xff]  ;;  %v806_v43 = vpack.c.bf16 %v2724_v59, %v2713_v54  ;;  %v1309_v50 = vld [vmem:[%s2647_s26 + $0x10] sm:$0xff]  ;;  %s1638_s20 = sshll.u32 %s319_s17, 4  ;;  %s1625_s11 = scalar_lea.sflag [#allocation6], %s2630_s14  ;;  %s2883_s20 = int_to_ptr.vmem [resolvable:$true] %s1638_s20 }
  0xc9   : > { %1908 = vmatmul.mubr.msk.bf16.vlgmr.msra.gmra.mrb[0].mxu0 %vm321_vm0, %v805_v52  ;;  %1876 = vmatpush3.bf16.msra.mxu1 %v525_v49  ;;  %v900_v0 = vld [vmem:[#allocation2 + $0x32] sm:$0xff]  ;;  %v412_v3 = vpack.c.bf16 %v2731_v62, %v404_v61  ;;  %v903_v6 = vld [vmem:[#allocation2 + $0x62] sm:$0xff]  ;;  %v1318_v54 = vsel %vm1315_vm4, %v1309_v50, 0.0  ;;  %s2270_s22 = scalar_lea.vmem %s2883_s20, 128  ;;  %p2972_p4 = scmp.ne.s32.totalorder %s2958_s10, 0 }
  0xca   : > { %1916 = vmatpush3.bf16.msra.mxu0 %v925_v53  ;;  %1871 = vmatprep.mubr.msk.bf16.mxu1 %vm321_vm0, %v2719_v56  ;;  %v902_v4 = vld [vmem:[#allocation2 + $0x52] sm:$0xff]  ;;  %v907_v7 = vpack.c.bf16 %v901_v1, %v900_v0  ;;  %v406_v8 = vld [vmem:[#allocation2 + $0x20] sm:$0xff]  ;;  %v601_v29 = vpack.c.bf16 %v900_v0, %v2706_v46  ;;  %p2271_p2 = scmp.ne.s32.totalorder %s2883_s20, %s2270_s22  ;;  %s2368_s12 = smov [#allocation13]  }
  0xcb   : > { %1917 = vmatprep.mubr.msk.bf16.mxu0 %vm321_vm0, %v906_v55  ;;  %2028 = vmatprep.subr.msk.bf16.mxu0 %vm443_vm3, %v1014_v57  ;;  %v407_v9 = vld [vmem:[#allocation2 + $0x30] sm:$0xff]  ;;  %v908_v10 = vpack.c.bf16 %v903_v6, %v902_v4  ;;  %v408_v12 = vld [vmem:[#allocation2 + $0x40] sm:$0xff]  ;;  %v602_v32 = vpack.c.bf16 %v902_v4, %v901_v1  ;;  %v702_v36 = vpack.c.bf16 %v406_v8, %v2731_v62  ;;  %s2274_s7 = sshll.u32 %s2368_s12, 4  ;;  %s2275_s7 = int_to_ptr.vmem [resolvable:$false] %s2274_s7 }
  0xcc   : > { %2023 = vmatprep.subr.msk.bf16.mxu1 %vm443_vm3, %v605_v58  ;;  %v409_v13 = vld [vmem:[#allocation2 + $0x50] sm:$0xff]  ;;  %v413_v15 = vpack.c.bf16 %v407_v9, %v406_v8  ;;  %v2746_v17 = vld [vmem:[#allocation2 + $0x82] sm:$0xff]  ;;  %v703_v38 = vpack.c.bf16 %v408_v12, %v407_v9  ;;  %p2272_p6 = pnand %p2271_p2, %p2972_p4  ;;  %s2276_s30 = scalar_lea.vmem %s2275_s7, 256 }
  0xcd   : > { %v904_v16 = vld [vmem:[#allocation2 + $0x72] sm:$0xff]  ;;  %v414_v18 = vpack.c.bf16 %v409_v13, %v408_v12  ;;  %v410_v22 = vld [vmem:[#allocation2 + $0x60] sm:$0xff]  ;;  %v1311_v9 = vld [vmem:[%s2647_s26 + $0x20] sm:$0xff]  ;;  %p2277_p8 = scmp.lt.s32.totalorder %s2883_s20, %s2275_s7  ;;  %p2278_p7 = scmp.lt.s32.totalorder %s2276_s30, %s2270_s22 }
  0xce   : > { %v909_v21 = vpack.c.bf16 %v2746_v17, %v904_v16  ;;  %v411_v23 = vld [vmem:[#allocation2 + $0x70] sm:$0xff]  ;;  %v1007_v30 = vld [vmem:[#allocation2 + $0x80] sm:$0xff]  ;;  %v603_v35 = vpack.c.bf16 %v904_v16, %v903_v6  ;;  %v704_v40 = vpack.c.bf16 %v410_v22, %v409_v13  ;;  %p2273_p3 = pneg %p2272_p6 }
  0xcf   : > { %v415_v25 = vpack.c.bf16 %v411_v23, %v410_v22  ;;  %v1012_v34 = vpack.c.bf16 %v1008_v31, %v1007_v30  ;;  %v705_v42 = vpack.c.bf16 %v1007_v30, %v411_v23  ;;  %v1310_v52 = vld [vmem:[%s2647_s26 + $0x18] sm:$0xff]  ;;  %v1308_v55 = vld [vmem:[%s2647_s26 + $0x8] sm:$0xff]  ;;  %p2279_p11 = por %p2278_p7, %p2277_p8 }
  0xd0   : > { %1872 = vmatmul.mubr.msk.bf16.gmra.mrb[4].mxu1 %vm321_vm0, %v2737_v63  ;;  %v1319_v61 = vsel %vm1315_vm4, %v1310_v52, 0.0  ;;  %v1317_v1 = vsel %vm1315_vm4, %v1308_v55, 0.0 }
  0xd1   : > { %1877 = vmatprep.mubr.msk.bf16.mxu1 %vm321_vm0, %v412_v3  ;;  %p2280_p9 = pnand %p2279_p11, %p2273_p3 }
  0xd5   : > { %1918 = vmatmul.mubr.msk.bf16.vlgmr.msra.gmra.mrb[0].mxu0 %vm321_vm0, %v907_v7  ;;  %v1313_v7 = vld [vmem:[%s2647_s26 + $0x30] sm:$0xff] }
  0xd6   : > { %1926 = vmatpush3.bf16.msra.mxu0 %v1028_v11  ;;  %1921 = vmatprep.mubr.msk.bf16.mxu0 %vm321_vm0, %v908_v10  ;;  %v1314_v10 = vld [vmem:[%s2647_s26 + $0x38] sm:$0xff]  ;;  %v1322_v13 = vsel %vm1315_vm4, %v1313_v7, 0.0 }
  0xd7   : > { %2029 = vmatprep.subr.msk.bf16.mxu0 %vm443_vm3, %v1116_v14  ;;  %v1312_v14 = vld [vmem:[%s2647_s26 + $0x28] sm:$0xff]  ;;  %v1323_v22 = vsel %vm1315_vm4, %v1314_v10, 0.0 }
  0xd8   : > { %1878 = vmatmul.mubr.msk.bf16.vlgmr.msra.gmra.mrb[0].mxu1 %vm321_vm0, %v413_v15 }
  0xd9   : > { %1886 = vmatpush3.bf16.msra.mxu1 %v619_v19  ;;  %1881 = vmatprep.mubr.msk.bf16.mxu1 %vm321_vm0, %v414_v18 }
  0xda   : > { %2024 = vmatprep.subr.msk.bf16.mxu1 %vm443_vm3, %v707_v20 }
  0xdd   : > { %1922 = vmatmul.mubr.msk.bf16.gmra.mrb[4].mxu0 %vm321_vm0, %v909_v21 }
  0xde   : > { %1927 = vmatprep.mubr.msk.bf16.mxu0 %vm321_vm0, %v413_v15 }
  0xe0   : > { %1882 = vmatmul.mubr.msk.bf16.gmra.mrb[4].mxu1 %vm321_vm0, %v415_v25 }
  0xe1   : > { %1887 = vmatprep.mubr.msk.bf16.mxu1 %vm321_vm0, %v600_v26 }
  0xe5   : > { %1928 = vmatmul.mubr.msk.bf16.vlgmr.msra.gmra.mrb[0].mxu0 %vm321_vm0, %v414_v18  ;;  %v1320_v18 = vsel %vm1315_vm4, %v1311_v9, 0.0 }
  0xe6   : > { %1936 = vmatpush3.bf16.msra.mxu0 %v1130_v27  ;;  %1931 = vmatprep.mubr.msk.bf16.mxu0 %vm321_vm0, %v415_v25  ;;  %v1321_v27 = vsel %vm1315_vm4, %v1312_v14, 0.0 }
  0xe7   : > { %2030 = vmatprep.subr.msk.bf16.mxu0 %vm443_vm3, %v1218_v28 }
  0xe8   : > { %1888 = vmatmul.mubr.msk.bf16.vlgmr.msra.gmra.mrb[0].mxu1 %vm321_vm0, %v601_v29 }
  0xe9   : > { %1896 = vmatpush3.bf16.msra.mxu1 %v721_v33  ;;  %1891 = vmatprep.mubr.msk.bf16.mxu1 %vm321_vm0, %v602_v32 }
  0xea   : > { %2026 = vmatprep.subr.msk.bf16.mxu1 %vm443_vm3, %v2675_v2  ;;  %v1109_v2 = vld [vmem:[#allocation2 + $0x81] sm:$0xff] }
  0xeb   : > { %v1114_v41 = vpack.c.bf16 %v1110_v39, %v1109_v2  ;;  %v807_v44 = vpack.c.bf16 %v1109_v2, %v2726_v60 }
  0xed   : > { %1932 = vmatmul.mubr.msk.bf16.gmra.mrb[4].mxu0 %vm321_vm0, %v1012_v34 }
  0xee   : > { %1937 = vmatprep.mubr.msk.bf16.mxu0 %vm321_vm0, %v2710_v51  ;;  %v1307_v51 = vld [vmem:[%s2647_s26] sm:$0xff] }
  0xef   : > { %v1316_v58 = vsel %vm1315_vm4, %v1307_v51, 0.0 }
  0xf0   : > { %1892 = vmatmul.mubr.msk.bf16.gmra.mrb[4].mxu1 %vm321_vm0, %v603_v35 }
  0xf1   : > { %1897 = vmatprep.mubr.msk.bf16.mxu1 %vm321_vm0, %v702_v36 }
  0xf5   : > { %1938 = vmatmul.mubr.msk.bf16.vlgmr.msra.gmra.mrb[0].mxu0 %vm321_vm0, %v2719_v56 }
  0xf6   : > { %1946 = vmatpush3.bf16.msra.mxu0 %v1232_v37  ;;  %1941 = vmatprep.mubr.msk.bf16.mxu0 %vm321_vm0, %v2737_v63 }
  0xf8   : > { %1898 = vmatmul.mubr.msk.bf16.vlgmr.msra.gmra.mrb[0].mxu1 %vm321_vm0, %v703_v38 }
  0xf9   : > { %1956 = vmatpush3.bf16.msra.mxu1 %v2684_v5  ;;  %1901 = vmatprep.mubr.msk.bf16.mxu1 %vm321_vm0, %v704_v40  ;;  %v1212_v5 = vld [vmem:[#allocation2 + $0x92] sm:$0xff] }
  0xfa   : > { %v1216_v45 = vpack.c.bf16 %v1212_v5, %v2746_v17 }
  0xfd   : > { %1942 = vmatmul.mubr.msk.bf16.gmra.mrb[4].mxu0 %vm321_vm0, %v1114_v41 }
  0xfe   : > { %1947 = vmatprep.mubr.msk.bf16.mxu0 %vm321_vm0, %v601_v29 }
 0x100   : > { %1902 = vmatmul.mubr.msk.bf16.gmra.mrb[4].mxu1 %vm321_vm0, %v705_v42 }
 0x101   : > { %1911 = vmatprep.mubr.msk.bf16.mxu1 %vm321_vm0, %v806_v43 }
 0x105   : > { %1948 = vmatmul.mubr.msk.bf16.vlgmr.msra.gmra.mrb[0].mxu0 %vm321_vm0, %v602_v32 }
 0x106   : > { %1951 = vmatprep.mubr.msk.bf16.mxu0 %vm321_vm0, %v603_v35 }
 0x10c   : > { %1912 = vmatmul.mubr.msk.bf16.vlgmr.msra.gmra.mrb[4].mxu1 %vm321_vm0, %v807_v44 }
 0x10d   : > { %1952 = vmatmul.mubr.msk.bf16.gmra.mrb[4].mxu0 %vm321_vm0, %v1216_v45 }
 0x1cb   : > { %v1899_v46 = vpop.f32.mrb[0].mxu1 }
 0x1cc   : > { %v757_v47 = vpop.f32.mrb[1].mxu1 }
 0x1cd   : > { %v1900_v48 = vpop.f32.mrb[2].mxu1 }
 0x1ce   : > { %v760_v49 = vpop.f32.mrb[3].mxu1 }
 0x1d8   : > { %v1949_v53 = vpop.f32.mrb[0].mxu0 }
 0x1d9   : > { %v1957_v56 = vadd.f32 %v1949_v53, %v1899_v46  ;;  %v1268_v57 = vpop.f32.mrb[1].mxu0 }
 0x1da   : > { %v1958_v59 = vadd.f32 %v1268_v57, %v757_v47  ;;  %v1950_v60 = vpop.f32.mrb[2].mxu0 }
 0x1db   : > { %v1326_v62 = vadd.f32 %v1957_v56, %v1318_v54  ;;  %v1959_v63 = vadd.f32 %v1950_v60, %v1900_v48  ;;  %v1271_v0 = vpop.f32.mrb[3].mxu0 }
 0x1dc   : > { %v1324_v3 = vadd.f32 %v1958_v59, %v1316_v58  ;;  %v1960_v4 = vadd.f32 %v1271_v0, %v760_v49 }
 0x1dd   : > { %1334 = vst.msk [vmem:[#allocation3 + $0x10] sm:$0xff] %vm321_vm0, %v1326_v62  ;;  %v1327_v6 = vadd.f32 %v1959_v63, %v1319_v61 }
 0x1de   : > { %1332 = vst.msk [vmem:[#allocation3] sm:$0xff] %vm321_vm0, %v1324_v3  ;;  %v1325_v8 = vadd.f32 %v1960_v4, %v1317_v1 }
 0x1df   : > { %1335 = vst.msk [vmem:[#allocation3 + $0x18] sm:$0xff] %vm321_vm0, %v1327_v6  ;;  %v1913_v11 = vpop.f32.mrb[4].mxu1 }
 0x1e0   : > { %1333 = vst.msk [vmem:[#allocation3 + $0x8] sm:$0xff] %vm321_vm0, %v1325_v8  ;;  %v1953_v12 = vpop.f32.mrb[4].mxu0  ;;  %v875_v16 = vpop.f32.mrb[5].mxu1 }
 0x1e1   : > { %v1961_v15 = vadd.f32 %v1953_v12, %v1913_v11  ;;  %v1284_v17 = vpop.f32.mrb[5].mxu0  ;;  %v1914_v20 = vpop.f32.mrb[6].mxu1 }
 0x1e2   : > { %v1962_v19 = vadd.f32 %v1284_v17, %v875_v16  ;;  %v1954_v21 = vpop.f32.mrb[6].mxu0  ;;  %v878_v25 = vpop.f32.mrb[7].mxu1 }
 0x1e3   : > { %v1330_v23 = vadd.f32 %v1961_v15, %v1322_v13  ;;  %v1963_v24 = vadd.f32 %v1954_v21, %v1914_v20  ;;  %v1287_v26 = vpop.f32.mrb[7].mxu0 }
 0x1e4   : > { %v1328_v28 = vadd.f32 %v1962_v19, %v1320_v18  ;;  %v1964_v29 = vadd.f32 %v1287_v26, %v878_v25  ;;  %v1366_v30 = vld [vmem:[#allocation3 + $0x13] sm:$0x1]  ;;  %v1350_v32 = vld [vmem:[#allocation3 + $0x11] sm:$0x1]  ;;  %v1374_v36 = vld [vmem:[#allocation3 + $0x14] sm:$0x1] }
 0x1e5   : > { %1338 = vst.msk [vmem:[#allocation3 + $0x30] sm:$0xff] %vm321_vm0, %v1330_v23  ;;  %v1331_v31 = vadd.f32 %v1963_v24, %v1323_v22  ;;  %v1364_v37 = vld [vmem:[#allocation3 + $0x3] sm:$0x1]  ;;  %v1494_v2 = vrot.slane %v1366_v30, 6  ;;  %v1348_v44 = vld [vmem:[#allocation3 + $0x1] sm:$0x1] }
 0x1e6   : > { %1336 = vst.msk [vmem:[#allocation3 + $0x20] sm:$0xff] %vm321_vm0, %v1328_v28  ;;  %v1329_v33 = vadd.f32 %v1964_v29, %v1321_v27  ;;  %v1367_v34 = vld [vmem:[#allocation3 + $0x1b] sm:$0x1]  ;;  %v1351_v35 = vld [vmem:[#allocation3 + $0x19] sm:$0x1]  ;;  %v1444_v45 = vrot.slane %v1350_v32, 6 }
 0x1e7   : > { %1339 = vst.msk [vmem:[#allocation3 + $0x38] sm:$0xff] %vm321_vm0, %v1331_v31  ;;  %v1365_v38 = vld [vmem:[#allocation3 + $0xb] sm:$0x1]  ;;  %v1349_v39 = vld [vmem:[#allocation3 + $0x9] sm:$0x1]  ;;  %v1496_v5 = vrot.slane %v1367_v34, 5 }
 0x1e8   : > { %1337 = vst.msk [vmem:[#allocation3 + $0x28] sm:$0xff] %vm321_vm0, %v1329_v33  ;;  %v1492_v40 = vrot.slane %v1365_v38, 7  ;;  %v1442_v41 = vrot.slane %v1349_v39, 7  ;;  %v1373_v42 = vld [vmem:[#allocation3 + $0xc] sm:$0x1]  ;;  %v1446_v46 = vrot.slane %v1351_v35, 5 }
 0x1e9   : > { %v1375_v43 = vld [vmem:[#allocation3 + $0x1c] sm:$0x1]  ;;  %v1517_v47 = vrot.slane %v1373_v42, 7  ;;  %v1372_v50 = vld [vmem:[#allocation3 + $0x4] sm:$0x1]  ;;  %v1519_v51 = vrot.slane %v1374_v36, 6 }
 0x1ea   : > { %v1493_v48 = vsel %vm1413_vm5, %v1492_v40, %v1364_v37  ;;  %v1443_v49 = vsel %vm1413_vm5, %v1442_v41, %v1348_v44  ;;  %v1521_v52 = vrot.slane %v1375_v43, 5  ;;  %v1357_v53 = vld [vmem:[#allocation3 + $0xa] sm:$0x1]  ;;  %v1356_v62 = vld [vmem:[#allocation3 + $0x2] sm:$0x1] }
 0x1eb   : > { %v1495_v54 = vsel %vm1416_vm6, %v1494_v2, %v1493_v48  ;;  %v1445_v55 = vsel %vm1416_vm6, %v1444_v45, %v1443_v49  ;;  %v1518_v56 = vsel %vm1413_vm5, %v1517_v47, %v1372_v50  ;;  %v1467_v57 = vrot.slane %v1357_v53, 7  ;;  %v1358_v63 = vld [vmem:[#allocation3 + $0x12] sm:$0x1]  ;;  %v1359_v6 = vld [vmem:[#allocation3 + $0x1a] sm:$0x1] }
 0x1ec   : > { %v1370_v58 = vld [vmem:[#allocation3 + $0x33] sm:$0x1]  ;;  %v1354_v59 = vld [vmem:[#allocation3 + $0x31] sm:$0x1]  ;;  %v1378_v60 = vld [vmem:[#allocation3 + $0x34] sm:$0x1]  ;;  %v1520_v61 = vsel %vm1416_vm6, %v1519_v51, %v1518_v56  ;;  %v1497_v8 = vsel %vm1419_vm7, %v1496_v5, %v1495_v54  ;;  %v1447_v11 = vsel %vm1419_vm7, %v1446_v46, %v1445_v55 }
 0x1ed   : > { %v1368_v0 = vld [vmem:[#allocation3 + $0x23] sm:$0x1]  ;;  %v1502_v1 = vrot.slane %v1370_v58, 2  ;;  %v1352_v3 = vld [vmem:[#allocation3 + $0x21] sm:$0x1]  ;;  %v1452_v4 = vrot.slane %v1354_v59, 2  ;;  %v1522_v17 = vsel %vm1419_vm7, %v1521_v52, %v1520_v61  ;;  %v1468_v18 = vsel %vm1413_vm5, %v1467_v57, %v1356_v62 }
 0x1ee   : > { %v1371_v7 = vld [vmem:[#allocation3 + $0x3b] sm:$0x1]  ;;  %v1498_v9 = vrot.slane %v1368_v0, 4  ;;  %v1355_v10 = vld [vmem:[#allocation3 + $0x39] sm:$0x1]  ;;  %v1448_v12 = vrot.slane %v1352_v3, 4 }
 0x1ef   : > { %v1369_v13 = vld [vmem:[#allocation3 + $0x2b] sm:$0x1]  ;;  %v1504_v14 = vrot.slane %v1371_v7, 1  ;;  %v1353_v15 = vld [vmem:[#allocation3 + $0x29] sm:$0x1]  ;;  %v1454_v16 = vrot.slane %v1355_v10, 1 }
 0x1f0   : > { %v1499_v19 = vsel %vm1422_vm8, %v1498_v9, %v1497_v8  ;;  %v1500_v20 = vrot.slane %v1369_v13, 3  ;;  %v1449_v21 = vsel %vm1422_vm8, %v1448_v12, %v1447_v11  ;;  %v1450_v22 = vrot.slane %v1353_v15, 3  ;;  %v1376_v23 = vld [vmem:[#allocation3 + $0x24] sm:$0x1]  ;;  %v1377_v24 = vld [vmem:[#allocation3 + $0x2c] sm:$0x1] }
 0x1f1   : > { %v1379_v25 = vld [vmem:[#allocation3 + $0x3c] sm:$0x1]  ;;  %v1523_v26 = vrot.slane %v1376_v23, 4  ;;  %v1525_v27 = vrot.slane %v1377_v24, 3  ;;  %v1527_v28 = vrot.slane %v1378_v60, 2  ;;  %v1469_v29 = vrot.slane %v1358_v63, 6 }
 0x1f2   : > { %v1501_v30 = vsel %vm1425_vm9, %v1500_v20, %v1499_v19  ;;  %v1451_v31 = vsel %vm1425_vm9, %v1450_v22, %v1449_v21  ;;  %v1529_v32 = vrot.slane %v1379_v25, 1  ;;  %v1360_v33 = vld [vmem:[#allocation3 + $0x22] sm:$0x1]  ;;  %v1361_v34 = vld [vmem:[#allocation3 + $0x2a] sm:$0x1]  ;;  %v1471_v35 = vrot.slane %v1359_v6, 5 }
 0x1f3   : > { %v1503_v36 = vsel %vm1428_vm10, %v1502_v1, %v1501_v30  ;;  %v1453_v37 = vsel %vm1428_vm10, %v1452_v4, %v1451_v31  ;;  %v1524_v38 = vsel %vm1422_vm8, %v1523_v26, %v1522_v17  ;;  %v1362_v2 = vld [vmem:[#allocation3 + $0x32] sm:$0x1]  ;;  %v1363_v39 = vld [vmem:[#allocation3 + $0x3a] sm:$0x1]  ;;  %v1470_v40 = vsel %vm1416_vm6, %v1469_v29, %v1468_v18  ;;  %v1389_v41 = vld [vmem:[#allocation3 + $0xe] sm:$0x1] }
 0x1f4   : > { %v1505_v42 = vsel %vm1431_vm11, %v1504_v14, %v1503_v36  ;;  %v1455_v43 = vsel %vm1431_vm11, %v1454_v16, %v1453_v37  ;;  %v1526_v5 = vsel %vm1425_vm9, %v1525_v27, %v1524_v38  ;;  %v1390_v44 = vld [vmem:[#allocation3 + $0x16] sm:$0x1]  ;;  %v1391_v45 = vld [vmem:[#allocation3 + $0x1e] sm:$0x1]  ;;  %v1392_v46 = vld [vmem:[#allocation3 + $0x26] sm:$0x1]  ;;  %v1472_v48 = vsel %vm1419_vm7, %v1471_v35, %v1470_v40 }
 0x1f5   : > { %1506 = vrot.lane.b32.xlu1 %v1505_v42, %s2361_s24  ;;  %1456 = vrot.lane.b32.xlu0 %v1455_v43, %s2362_s8  ;;  %v1528_v47 = vsel %vm1428_vm10, %v1527_v28, %v1526_v5  ;;  %v1473_v49 = vrot.slane %v1360_v33, 4  ;;  %v1475_v50 = vrot.slane %v1361_v34, 3  ;;  %v1393_v51 = vld [vmem:[#allocation3 + $0x2e] sm:$0x1]  ;;  %v1394_v52 = vld [vmem:[#allocation3 + $0x36] sm:$0x1] }
 0x1f6   : > { %v1530_v53 = vsel %vm1431_vm11, %v1529_v32, %v1528_v47  ;;  %v1477_v54 = vrot.slane %v1362_v2, 2  ;;  %v1479_v55 = vrot.slane %v1363_v39, 1  ;;  %v1388_v56 = vld [vmem:[#allocation3 + $0x6] sm:$0x1]  ;;  %v1567_v57 = vrot.slane %v1389_v41, 7 }
 0x1f7   : > { %v1474_v58 = vsel %vm1422_vm8, %v1473_v49, %v1472_v48  ;;  %v1395_v59 = vld [vmem:[#allocation3 + $0x3e] sm:$0x1]  ;;  %v1569_v60 = vrot.slane %v1390_v44, 6  ;;  %v1571_v61 = vrot.slane %v1391_v45, 5  ;;  %v1573_v62 = vrot.slane %v1392_v46, 4 }
 0x1f8   : > { %v1476_v63 = vsel %vm1425_vm9, %v1475_v50, %v1474_v58  ;;  %v1568_v0 = vsel %vm1413_vm5, %v1567_v57, %v1388_v56  ;;  %v1575_v1 = vrot.slane %v1393_v51, 3  ;;  %v1577_v3 = vrot.slane %v1394_v52, 2  ;;  %v1381_v4 = vld [vmem:[#allocation3 + $0xd] sm:$0x1]  ;;  %v1382_v6 = vld [vmem:[#allocation3 + $0x15] sm:$0x1] }
 0x1f9   : > { %1531 = vrot.lane.b32.xlu1 %v1530_v53, %s2363_s27  ;;  %v1478_v7 = vsel %vm1428_vm10, %v1477_v54, %v1476_v63  ;;  %v1570_v8 = vsel %vm1416_vm6, %v1569_v60, %v1568_v0  ;;  %v1383_v9 = vld [vmem:[#allocation3 + $0x1d] sm:$0x1]  ;;  %v1384_v10 = vld [vmem:[#allocation3 + $0x25] sm:$0x1]  ;;  %v1385_v11 = vld [vmem:[#allocation3 + $0x2d] sm:$0x1] }
 0x1fa   : > { %v1480_v12 = vsel %vm1431_vm11, %v1479_v55, %v1478_v7  ;;  %v1572_v13 = vsel %vm1419_vm7, %v1571_v61, %v1570_v8  ;;  %v1579_v14 = vrot.slane %v1395_v59, 1  ;;  %v1380_v15 = vld [vmem:[#allocation3 + $0x5] sm:$0x1]  ;;  %v1386_v16 = vld [vmem:[#allocation3 + $0x35] sm:$0x1]  ;;  %v1542_v17 = vrot.slane %v1381_v4, 7 }
 0x1fb   : > { %1481 = vrot.lane.b32.xlu0 %v1480_v12, %s2364_s6  ;;  %v1574_v18 = vsel %vm1422_vm8, %v1573_v62, %v1572_v13  ;;  %v1387_v19 = vld [vmem:[#allocation3 + $0x3d] sm:$0x1]  ;;  %v1544_v20 = vrot.slane %v1382_v6, 6  ;;  %v1546_v21 = vrot.slane %v1383_v9, 5  ;;  %v1548_v22 = vrot.slane %v1384_v10, 4 }
 0x1fc   : > { %v1576_v23 = vsel %vm1425_vm9, %v1575_v1, %v1574_v18  ;;  %v1543_v24 = vsel %vm1413_vm5, %v1542_v17, %v1380_v15  ;;  %v1550_v25 = vrot.slane %v1385_v11, 3  ;;  %v1552_v26 = vrot.slane %v1386_v16, 2  ;;  %v1397_v27 = vld [vmem:[#allocation3 + $0xf] sm:$0x1]  ;;  %v1398_v28 = vld [vmem:[#allocation3 + $0x17] sm:$0x1] }
 0x1fd   : > { %v1578_v29 = vsel %vm1428_vm10, %v1577_v3, %v1576_v23  ;;  %v1545_v30 = vsel %vm1416_vm6, %v1544_v20, %v1543_v24  ;;  %v1399_v31 = vld [vmem:[#allocation3 + $0x1f] sm:$0x1]  ;;  %v1400_v32 = vld [vmem:[#allocation3 + $0x27] sm:$0x1]  ;;  %v1401_v33 = vld [vmem:[#allocation3 + $0x2f] sm:$0x1] }
 0x1fe   : > { %v1580_v34 = vsel %vm1431_vm11, %v1579_v14, %v1578_v29  ;;  %v1547_v35 = vsel %vm1419_vm7, %v1546_v21, %v1545_v30  ;;  %v1554_v36 = vrot.slane %v1387_v19, 1  ;;  %v1396_v37 = vld [vmem:[#allocation3 + $0x7] sm:$0x1]  ;;  %v1592_v38 = vrot.slane %v1397_v27, 7  ;;  %v1402_v39 = vld [vmem:[#allocation3 + $0x37] sm:$0x1] }
 0x1ff   : > { %1581 = vrot.lane.b32.xlu1 %v1580_v34, %s2365_s13  ;;  %v1549_v2 = vsel %vm1422_vm8, %v1548_v22, %v1547_v35  ;;  %v1403_v40 = vld [vmem:[#allocation3 + $0x3f] sm:$0x1]  ;;  %v1594_v41 = vrot.slane %v1398_v28, 6  ;;  %v1598_v42 = vrot.slane %v1400_v32, 4  ;;  %v1596_v44 = vrot.slane %v1399_v31, 5 }
 0x200   : > { %v1551_v43 = vsel %vm1425_vm9, %v1550_v25, %v1549_v2  ;;  %v1593_v5 = vsel %vm1413_vm5, %v1592_v38, %v1396_v37  ;;  %v1600_v45 = vrot.slane %v1401_v33, 3  ;;  %v1341_v46 = vld [vmem:[#allocation3 + $0x8] sm:$0x1]  ;;  %v1342_v47 = vld [vmem:[#allocation3 + $0x10] sm:$0x1]  ;;  %v1602_v54 = vrot.slane %v1402_v39, 2 }
 0x201   : > { %v1553_v48 = vsel %vm1428_vm10, %v1552_v26, %v1551_v43  ;;  %v1595_v49 = vsel %vm1416_vm6, %v1594_v41, %v1593_v5  ;;  %v1343_v50 = vld [vmem:[#allocation3 + $0x18] sm:$0x1]  ;;  %v1344_v51 = vld [vmem:[#allocation3 + $0x20] sm:$0x1]  ;;  %v1412_v55 = vrot.slane %v1341_v46, 7  ;;  %v1604_v58 = vrot.slane %v1403_v40, 1 }
 0x202   : > { %v1555_v52 = vsel %vm1431_vm11, %v1554_v36, %v1553_v48  ;;  %v1597_v53 = vsel %vm1419_vm7, %v1596_v44, %v1595_v49  ;;  %v1345_v56 = vld [vmem:[#allocation3 + $0x28] sm:$0x1]  ;;  %v1340_v59 = vld [vmem:[#allocation3] sm:$0x1]  ;;  %v1415_v60 = vrot.slane %v1342_v47, 6  ;;  %v1421_v61 = vrot.slane %v1344_v51, 4 }
 0x203   : > { %1556 = vrot.lane.b32.xlu0 %v1555_v52, %s2366_s28  ;;  %v1599_v57 = vsel %vm1422_vm8, %v1598_v42, %v1597_v53  ;;  %v1346_v63 = vld [vmem:[#allocation3 + $0x30] sm:$0x1]  ;;  %v1414_v0 = vsel %vm1413_vm5, %v1412_v55, %v1340_v59  ;;  %v1418_v1 = vrot.slane %v1343_v50, 5  ;;  %v1424_v3 = vrot.slane %v1345_v56, 3  ;;  %v1347_v6 = vld [vmem:[#allocation3 + $0x38] sm:$0x1] }
 0x204   : > { %v1601_v62 = vsel %vm1425_vm9, %v1600_v45, %v1599_v57  ;;  %v1417_v7 = vsel %vm1416_vm6, %v1415_v60, %v1414_v0  ;;  %v1427_v11 = vrot.slane %v1346_v63, 2  ;;  %v1430_v12 = vrot.slane %v1347_v6, 1 }
 0x205   : > { %v1603_v4 = vsel %vm1428_vm10, %v1602_v54, %v1601_v62  ;;  %v1420_v9 = vsel %vm1419_vm7, %v1418_v1, %v1417_v7 }
 0x206   : > { %v1605_v8 = vsel %vm1431_vm11, %v1604_v58, %v1603_v4  ;;  %v1423_v10 = vsel %vm1422_vm8, %v1421_v61, %v1420_v9 }
 0x207   : > { %1606 = vrot.lane.b32.xlu0 %v1605_v8, %s2367_s1  ;;  %v1426_v13 = vsel %vm1425_vm9, %v1424_v3, %v1423_v10 }
 0x208   : > { %v1429_v14 = vsel %vm1428_vm10, %v1427_v11, %v1426_v13 }
 0x209   : > { %v1432_v15 = vsel %vm1431_vm11, %v1430_v12, %v1429_v14 }
 0x267   : > { %v1457_v16 = vpop.permute.xlu0 %1456  ;;  %v1507_v17 = vpop.permute.xlu1 %1506 }
 0x268   : > { %v1609_v18 = vsel %vm321_vm0, %v1432_v15, %v1457_v16  ;;  %vm1622_vm0 = vcmask 523264  }
 0x26b   : > { %v1532_v21 = vpop.permute.xlu1 %1531 }
 0x26d   : > { %v1482_v19 = vpop.permute.xlu0 %1481 }
 0x26e   : > { %v1611_v20 = vsel %vm1610_vm12, %v1609_v18, %v1482_v19 }
 0x26f   : > { %v1613_v22 = vsel %vm1612_vm13, %v1611_v20, %v1507_v17 }
 0x270   : > { %v1615_v23 = vsel %vm1614_vm14, %v1613_v22, %v1532_v21 }
 0x271   : > { %v1582_v25 = vpop.permute.xlu1 %1581 }
 0x275   : > { %v1557_v24 = vpop.permute.xlu0 %1556 }
 0x276   : > { %v1617_v26 = vsel %vm1616_vm15, %v1615_v23, %v1557_v24 }
 0x277   : > { %v1619_v28 = vsel %vm1618_vm1, %v1617_v26, %v1582_v25 }
 0x279   : > { %v1607_v27 = vpop.permute.xlu0 %1606 }
 0x27a   : > { %v1621_v29 = vsel %vm1620_vm2, %v1619_v28, %v1607_v27 }
 0x27b   : > { %1623 = vst.msk [vmem:[%s319_s17] sm:$0xff] %vm1622_vm0, %v1621_v29 }
 0x27c   : > { %2283 = shalt.err (!%p2280_p9)
}
 0x27d   : > { %s2284_s14 = scalar_lea.hbm %s2881_s16, 128  ;;  %s2288_s24 = scalar_lea.hbm %s2930_s5, 256 }
 0x27e   : > { %p2285_p1 = scmp.ne.s32.totalorder %s2881_s16, %s2284_s14  ;;  %p2289_p13 = scmp.lt.u32.totalorder %s2881_s16, %s2930_s5 }
 0x27f   : > { %p2290_p5 = scmp.lt.u32.totalorder %s2288_s24, %s2284_s14  ;;  %p2292_p2 = scmp.lt.u32.totalorder %s2284_s14, %s2881_s16 }
 0x280   : > { %p2286_p12 = pnand %p2285_p1, %p2972_p4 }
 0x281   : > { %p2291_p10 = por %p2290_p5, %p2289_p13 }
 0x282   : > { %p2287_p0 = pneg %p2286_p12 }
 0x283   : > { %p2293_p6 = por %p2292_p2, %p2291_p10 }
 0x285   : > { %p2294_p3 = pnand %p2293_p6, %p2287_p0 }
 0x287   : > { %2297 = shalt.err (!%p2294_p3)
}
 0x288   : > { %2047 = dma.vmem_to_hbm [thread:$0]  (%p2972_p4), %s2883_s20, 128, %s2881_s16, %s1625_s11  }
 0x289 PF: > { %s1650_s6 = sand.u32 1, %s2336_s18   ;;  %p2973_p8 = scmp.ne.s32.totalorder %s2947_s25, 0 }
 0x28a   : > { %p2974_p7 = scmp.ge.s32.totalorder %s2348_s21, 2  ;;  %s1651_s13 = scalar_lea.sflag [#allocation6], %s1650_s6 }
 0x28c   : > { %p2067_p11 = pnand %p2974_p7, %p2973_p8 }
 0x28e   : > { %2331 = dma.done.wait (!%p2067_p11), %s1651_s13, 128  }
 0x28f   : > { %2333 = vsyncadd (!%p2067_p11), %s1651_s13, 4294967168  ;;  %s2975_s21 = sld [smem:[#allocation20_spill]]  ;;  %s2976_s28 = sld [smem:[#allocation19_spill]] }
 0x290   : > { %s2977_s20 = sld [smem:[#allocation21_spill]]  ;;  %s2978_s18 = smov %s2340_s19 }
 0x295   : > { %p20_p9 = scmp.ge.s32.totalorder %s2975_s21, 4   ;;  %s2979_s19 = smov %s2976_s28 }
 0x297   :  { %22 = sbr.rel (!%p20_p9) target bundleno = 10 (0xa), region = 119 }
 0x29e   :  { %1656 = vsyncpa [#allocation5], 1 }
 0x29f   :  { %1658 = vsyncpa [#allocation5 + $0x1], 1 }
 0x2a0   :  { %1659 = vsyncpa [#allocation8], 1 }
 0x2a1   :  { %1660 = vsyncpa [#allocation11], 1 }
 0x2a2   :  { %1661 = vsyncpa [#allocation6], 1 }
 0x2a3   :  { %1663 = vsyncpa [#allocation6 + $0x1], 1 }

// kernel: residual_module_forward.2
= control target key start
LH: loop header
LB: loop body
LE: loop exit
PB: predicated region body
PF: predicated region fallthrough
CT: control target
= control target key end

     0   :  { %9 = vsyncpa [#allocation5], 0  ;;  %s3186_s0 = inlined_call_operand.hbm [shape: f32[2,8,2,8,8], index: 0, kind: input, shape index: {}]   ;;  %s3187_s1 = inlined_call_operand.hbm [shape: f32[1,4], index: 1, kind: input, shape index: {}]   ;;  %s3188_s2 = inlined_call_operand.hbm [shape: f32[1,4], index: 2, kind: input, shape index: {}]   ;;  %s3189_s3 = inlined_call_operand.hbm [shape: bf16[3,3,4,8], index: 3, kind: input, shape index: {}]   ;;  %s3190_s4 = inlined_call_operand.hbm [shape: f32[2,8,64], index: 4, kind: output, shape index: {}]  }
   0x1   :  { %11 = vsyncpa [#allocation5 + $0x1], 0 }
   0x2   :  { %12 = vsyncpa [#allocation8], 0 }
   0x3   :  { %13 = vsyncpa [#allocation11], 0 }
   0x4   :  { %14 = vsyncpa [#allocation6], 0 }
   0x5   :  { %16 = vsyncpa [#allocation6 + $0x1], 0  ;;  %s2522_s15 = smov 0   ;;  %s2524_s16 = smov 0  }
   0x6   :  { %s2526_s17 = smov 0   ;;  %s2528_s18 = smov 0  }
   0x7 LB: > { %s2543_s19 = sadd.s32 4294967295, %s2476_s18   ;;  %s1906_s20 = sadd.s32 4294967294, %s2476_s18   ;;  %s2476_s18 = sphi %s2528_s18, %s3213_s18   ;;  %s2472_s17 = sphi %s2526_s17, %s3212_s17   ;;  %s2468_s16 = sphi %s2524_s16, %s3211_s16   ;;  %s2464_s15 = sphi %s2522_s15, %s3210_s15  }
   0x8   : > { %p42_p0 = scmp.ne.s32.totalorder %s2468_s16, %s2464_s15  ;;  %p3191_p1 = scmp.eq.s32.totalorder %s2543_s19, 0 }
   0x9   : > { %p135_p3 = scmp.eq.s32.totalorder %s1906_s20, 1  ;;  %p1907_p5 = scmp.ge.s32.totalorder %s2476_s18, 1 }
   0xa   : > { %p2552_p4 = por %p3191_p1, %p42_p0  ;;  %p142_p7 = scmp.lt.s32.totalorder %s2476_s18, 3 }
   0xb   : > { %p2557_p6 = por %p135_p3, %p42_p0  ;;  %s2478_s24 = smov [#allocation7]  }
   0xc   : > { %s3194_s21 = scalar_select %p2552_p4, 1, 0 }
   0xd   : > { %s3195_s22 = scalar_select %p2557_p6, 1, 0 }
   0xe   : > { %p2562_p8 = pnand %p1907_p5, %p142_p7  ;;  %s155_s25 = sshll.u32 %s2478_s24, 4  ;;  %s156_s25 = int_to_ptr.vmem [resolvable:$true] %s155_s25 }
   0xf   : > { %s2479_s26 = smov [#allocation9]   ;;  %s2480_s29 = smov [#allocation10]  }
  0x10   : > { %s3196_s23 = scalar_select %p2562_p8, 1, 0 }
  0x11   : > { %p2213_p10 = pneg %p2562_p8  ;;  %s166_s27 = sshll.u32 %s2479_s26, 4  ;;  %s2575_s27 = int_to_ptr.vmem [resolvable:$true] %s166_s27 }
  0x12   : > { %s176_s30 = sshll.u32 %s2480_s29, 4  ;;  %s2288_s7 = scalar_lea.hbm %s3187_s1, 16  ;;  %s2577_s30 = int_to_ptr.vmem [resolvable:$true] %s176_s30 }
  0x13   : > { %p2571_p11 = pnand %p2213_p10, %p3191_p1  ;;  %p2289_p12 = scmp.ne.s32.totalorder %s3187_s1, %s2288_s7 }
  0x14   : > { %p2295_p5 = scmp.lt.u32.totalorder %s2288_s7, %s3187_s1 }
  0x15   : > { %p2587_p13 = pneg %p2571_p11 }
  0x17   : > { %p2291_p0 = pnand %p2587_p13, %p2289_p12 }
  0x19   : > { %p2292_p3 = pneg %p2291_p0 }
  0x1b   : > { %p2297_p7 = pnand %p2295_p5, %p2292_p3 }
  0x1d   : > { %2300 = shalt.err (!%p2297_p7)
}
  0x1e   : > { %s2301_s13 = scalar_lea.vmem %s156_s25, 16  ;;  %s2308_s14 = scalar_lea.vmem %s156_s25, 32 }
  0x1f   : > { %p2302_p10 = scmp.ne.s32.totalorder %s156_s25, %s2301_s13  ;;  %p2309_p2 = scmp.lt.s32.totalorder %s156_s25, %s156_s25 }
  0x20   : > { %p2310_p6 = scmp.lt.s32.totalorder %s2308_s14, %s2301_s13 }
  0x21   : > { %p2304_p9 = pnand %p2302_p10, %p2587_p13 }
  0x22   : > { %p2311_p4 = por %p2310_p6, %p2309_p2 }
  0x23   : > { %p2305_p1 = pneg %p2304_p9 }
  0x25   : > { %p2312_p8 = pnand %p2311_p4, %p2305_p1 }
  0x27   : > { %2315 = shalt.err (!%p2312_p8)
}
  0x28   : > { %2216 = dma.hbm_to_vmem [thread:$0]  (!%p2571_p11), %s3187_s1, 16, %s156_s25, [#allocation8]  }
  0x29   : > { %s2316_s5 = scalar_lea.hbm %s3188_s2, 16 }
  0x2a   : > { %p2317_p9 = scmp.ne.s32.totalorder %s3188_s2, %s2316_s5  ;;  %p2323_p1 = scmp.lt.u32.totalorder %s2316_s5, %s3188_s2 }
  0x2c   : > { %p2319_p12 = pnand %p2317_p9, %p2587_p13 }
  0x2e   : > { %p2320_p2 = pneg %p2319_p12 }
  0x30   : > { %p2325_p4 = pnand %p2323_p1, %p2320_p2 }
  0x32   : > { %2328 = shalt.err (!%p2325_p4)
}
  0x33   : > { %s2329_s25 = scalar_lea.vmem %s2575_s27, 16  ;;  %s2336_s11 = scalar_lea.vmem %s2575_s27, 32 }
  0x34   : > { %p2330_p6 = scmp.ne.s32.totalorder %s2575_s27, %s2329_s25  ;;  %p2337_p3 = scmp.lt.s32.totalorder %s2575_s27, %s2575_s27 }
  0x35   : > { %p2338_p5 = scmp.lt.s32.totalorder %s2336_s11, %s2329_s25 }
  0x36   : > { %p2332_p8 = pnand %p2330_p6, %p2587_p13 }
  0x37   : > { %p2339_p7 = por %p2338_p5, %p2337_p3 }
  0x38   : > { %p2333_p0 = pneg %p2332_p8 }
  0x3a   : > { %p2340_p10 = pnand %p2339_p7, %p2333_p0 }
  0x3c   : > { %2343 = shalt.err (!%p2340_p10)
}
  0x3d   : > { %2219 = dma.hbm_to_vmem [thread:$0]  (!%p2571_p11), %s3188_s2, 16, %s2575_s27, [#allocation8]  }
  0x3e   : > { %s2344_s24 = scalar_lea.hbm %s3189_s3, 288 }
  0x3f   : > { %p2345_p9 = scmp.ne.s32.totalorder %s3189_s3, %s2344_s24  ;;  %p2351_p1 = scmp.lt.u32.totalorder %s2344_s24, %s3189_s3 }
  0x41   : > { %p2347_p12 = pnand %p2345_p9, %p2587_p13 }
  0x43   : > { %p2348_p2 = pneg %p2347_p12 }
  0x45   : > { %p2353_p4 = pnand %p2351_p1, %p2348_p2 }
  0x47   : > { %2356 = shalt.err (!%p2353_p4)
}
  0x48   : > { %s2357_s27 = scalar_lea.vmem %s2577_s30, 288  ;;  %p2365_p3 = scmp.lt.s32.totalorder %s2577_s30, %s2577_s30 }
  0x49   : > { %p2358_p6 = scmp.ne.s32.totalorder %s2577_s30, %s2357_s27  ;;  %p2366_p5 = scmp.lt.s32.totalorder %s2357_s27, %s2357_s27 }
  0x4b   : > { %p2360_p8 = pnand %p2358_p6, %p2587_p13  ;;  %p2367_p7 = por %p2366_p5, %p2365_p3 }
  0x4d   : > { %p2361_p0 = pneg %p2360_p8 }
  0x4f   : > { %p2368_p10 = pnand %p2367_p7, %p2361_p0 }
  0x51   : > { %2371 = shalt.err (!%p2368_p10)
}
  0x52   : > { %s2481_s7 = smov 32   ;;  %s2482_s10 = smov 2  }
  0x53   : > { %2222 = dma.hbm_to_vmem [thread:$0]  (!%p2571_p11), %s3189_s3, 288, %s2577_s30, [#allocation11], %s2481_s7, %s2481_s7, %s2482_s10  }
  0x54   : > { %s2651_s25 = sadd.s32 1, %s2476_s18   ;;  %s29_s12 = sadd.s32 1, %s2472_s17 }
  0x55   : > { %s26_s11 = ssub.s32 %s2476_s18, %s2651_s25  ;;  %p36_p9 = scmp.ne.s32.totalorder %s2472_s17, %s2468_s16 }
  0x56   : > { %p27_p13 = scmp.eq.s32.totalorder %s26_s11, 0  ;;  %p37_p12 = scmp.eq.s32.totalorder %s2476_s18, 0 }
  0x57   : > { %p2234_p2 = scmp.lt.s32.totalorder %s2476_s18, 2  ;;  %p3199_p4 = scmp.eq.s32.totalorder %s2543_s19, 1 }
  0x58   : > { %s2661_s13 = scalar_select %p27_p13, %s2472_s17, %s29_s12  }
  0x59   : > { %p38_p1 = por %p37_p12, %p36_p9  ;;  %p2665_p6 = por %p3199_p4, %p36_p9 }
  0x5a   : > { %s190_s28 = sand.u32 1, %s2472_s17   ;;  %s1985_s20 = sshll.u32 %s2476_s18, 11 }
  0x5b   : > { %s1912_s30 = sshll.u32 %s190_s28, 7  ;;  %s2674_s29 = scalar_lea.hbm %s3186_s0, %s1985_s20 }
  0x5c   : > { %s194_s5 = scalar_lea.vmem [#allocation4], %s1912_s30  ;;  %p2676_p11 = pnand %p2234_p2, %p38_p1 }
  0x5d   : > { %s201_s6 = sshll.u32 %s194_s5, 4  ;;  %s2682_s7 = scalar_lea.sflag [#allocation5], %s190_s28  ;;  %s2680_s6 = int_to_ptr.vmem [resolvable:$true] %s201_s6 }
  0x5e   : > { %s2372_s10 = scalar_lea.hbm %s2674_s29, 2048  ;;  %p2374_p0 = pneg %p2676_p11 }
  0x5f   : > { %p2373_p8 = scmp.ne.s32.totalorder %s2674_s29, %s2372_s10  ;;  %s2377_s11 = scalar_lea.hbm %s3186_s0, 4096 }
  0x60   : > { %p2378_p7 = scmp.lt.u32.totalorder %s2674_s29, %s3186_s0  ;;  %p2379_p10 = scmp.lt.u32.totalorder %s2377_s11, %s2372_s10 }
  0x61   : > { %p2375_p3 = pnand %p2374_p0, %p2373_p8  ;;  %p2381_p9 = scmp.lt.u32.totalorder %s2372_s10, %s2674_s29 }
  0x62   : > { %p2380_p13 = por %p2379_p10, %p2378_p7 }
  0x63   : > { %p2376_p5 = pneg %p2375_p3 }
  0x64   : > { %p2382_p12 = por %p2381_p9, %p2380_p13 }
  0x66   : > { %p2383_p2 = pnand %p2382_p12, %p2376_p5 }
  0x68   : > { %2386 = shalt.err (!%p2383_p2)
}
  0x69   : > { %s2387_s28 = scalar_lea.vmem %s2680_s6, 2048  ;;  %s2483_s30 = smov [#allocation4]  }
  0x6a   : > { %p2388_p1 = scmp.ne.s32.totalorder %s2680_s6, %s2387_s28  ;;  %s2392_s24 = sshll.u32 %s2483_s30, 4  ;;  %s2393_s24 = int_to_ptr.vmem [resolvable:$false] %s2392_s24 }
  0x6b   : > { %s2394_s26 = scalar_lea.vmem %s2393_s24, 4096  ;;  %p2395_p3 = scmp.lt.s32.totalorder %s2680_s6, %s2393_s24 }
  0x6c   : > { %p2390_p4 = pnand %p2388_p1, %p2374_p0  ;;  %p2396_p7 = scmp.lt.s32.totalorder %s2394_s26, %s2387_s28 }
  0x6e   : > { %p2391_p8 = pneg %p2390_p4  ;;  %p2397_p10 = por %p2396_p7, %p2395_p3 }
  0x70   : > { %p2398_p13 = pnand %p2397_p10, %p2391_p8 }
  0x72   : > { %2401 = shalt.err (!%p2398_p13)
}
  0x73   : > { %s2484_s5 = smov 128   ;;  %s2485_s10 = smov 8  }
  0x74   : > { %2226 = dma.hbm_to_vmem [thread:$0]  (!%p2676_p11), %s2674_s29, 2048, %s2680_s6, %s2682_s7, %s2484_s5, %s2484_s5, %s2485_s10  }
  0x75   : > { %p3202_p0 = scmp.ne.s32.totalorder %s3196_s23, 0 }
  0x76   : > { %s2713_s8 = sand.u32 (!%p3202_p0), 1, %s2468_s16   ;;  %p3203_p5 = scmp.ne.s32.totalorder (!%p3202_p0), %s3194_s21, 0 }
  0x77   : > { %213 = sbr.rel (%p3202_p0) target bundleno = 829 (0x33d), region = 36  ;;  %s1916_s9 = sshll.u32 (!%p3202_p0), %s2713_s8, 7 }
  0x78   : > { %s216_s11 = scalar_lea.sflag (!%p3202_p0), [#allocation5], %s2713_s8  ;;  %s2717_s12 = scalar_lea.vmem (!%p3202_p0), [#allocation4], %s1916_s9 }
  0x7e   : > { %2447 = dma.done.wait (%p3203_p5), %s216_s11, 2048  }
  0x7f   : > { %2449 = vsyncadd (%p3203_p5), %s216_s11, 4294965248  ;;  %p3204_p11 = scmp.eq.s32.totalorder %s2543_s19, 0 }
  0x81   : > { %2451 = dma.done.wait (%p3204_p11), [#allocation8], 32   ;;  %p3205_p9 = pmov %p3204_p11 }
  0x83   : > { %2453 = vsyncadd (%p3205_p9), [#allocation8], 4294967264  ;;  %p3206_p12 = pmov %p3205_p9 }
  0x84   : > { %p3207_p2 = pmov %p3205_p9 }
  0x85   : > { %2455 = dma.done.wait (%p3206_p12), [#allocation11], 288  }
  0x86   : > { %2457 = vsyncadd (%p3207_p2), [#allocation11], 4294967008  ;;  %v2731_v0 = vld [vmem:[#allocation7] ss:$0 sm:$0xff]  ;;  %s2486_s21 = smov 4   ;;  %vm637_vm0 = vcmask 1041408  }
  0x87   : > { %372 = vrot.lane.b32.xlu0 %v2731_v0, %s2486_s21  ;;  %519 = vrot.lane.b32.xlu1 %v2731_v0, %s2486_s21  ;;  %v2735_v1 = vld [vmem:[#allocation9] ss:$0 sm:$0xff]  ;;  %v2739_v2 = vld [vmem:[#allocation10 + $0x8] sm:$0x3]  ;;  %v2749_v4 = vld [vmem:[%s2717_s12 + $0x10] sm:$0xff]  ;;  %vm257_vm1 = vcmask 31744  }
  0x88   : > { %2191 = vmatprep.subr.msk.bf16.mxu0 %vm637_vm0, %v2739_v2  ;;  %v2745_v3 = vsel %vm637_vm0, %v2739_v2, 0  ;;  %v2752_v5 = vld [vmem:[%s2717_s12] sm:$0xff]  ;;  %v2755_v6 = vld [vmem:[%s2717_s12 + $0x30] sm:$0xff]  ;;  %v319_v9 = vmul.f32 %v2731_v0, %v2749_v4  ;;  %v2771_v14 = vld [vmem:[%s2717_s12 + $0x8] sm:$0xff]  ;;  %vm259_vm2 = vcmask 24576   ;;  %v2487_v33 = vmov 0.0  }
  0x89   : > { %2072 = vmatpush3.bf16.msra.mxu0 %v2745_v3  ;;  %v2758_v7 = vld [vmem:[%s2717_s12 + $0x20] sm:$0xff]  ;;  %v318_v8 = vmul.f32 %v2731_v0, %v2752_v5  ;;  %v321_v11 = vmul.f32 %v2731_v0, %v2755_v6  ;;  %v2776_v17 = vld [vmem:[%s2717_s12 + $0x18] sm:$0xff]  ;;  %v2779_v18 = vld [vmem:[%s2717_s12 + $0x28] sm:$0xff]  ;;  %v465_v21 = vmul.f32 %v2771_v14, %v2731_v0  ;;  %263 = vst.msk [vmem:[#allocation2 + $0x120] sm:$0xff] %vm257_vm1, %v2487_v33  ;;  %s2488_s23 = smov 124   ;;  %vm1500_vm3 = vcmask 64512  }
  0x8a   : > { %v320_v10 = vmul.f32 %v2731_v0, %v2758_v7  ;;  %v334_v13 = vadd.f32 %v2735_v1, %v319_v9  ;;  %v466_v24 = vmul.f32 %v2776_v17, %v2731_v0  ;;  %v467_v25 = vmul.f32 %v2779_v18, %v2731_v0  ;;  %v624_v32 = vld [vmem:[#allocation10 + $0x2] sm:$0x3]  ;;  %264 = vst.msk [vmem:[#allocation2 + $0x128] sm:$0x1] %vm259_vm2, %v2487_v33  ;;  %v1105_v43 = vld [vmem:[#allocation10 + $0xa] sm:$0x3] }
  0x8b   : > { %389 = vrot.lane.b32.xlu0 %v2735_v1, %s2486_s21  ;;  %536 = vrot.lane.b32.xlu1 %v2735_v1, %s2486_s21  ;;  %v333_v12 = vadd.f32 %v2735_v1, %v318_v8  ;;  %v336_v16 = vadd.f32 %v2735_v1, %v321_v11  ;;  %v480_v26 = vadd.f32 %v2735_v1, %v465_v21  ;;  %v639_v34 = vsel %vm637_vm0, %v624_v32, 0  ;;  %v2838_v48 = vld [vmem:[%s2717_s12 + $0x38] sm:$0xff]  ;;  %v2841_v49 = vld [vmem:[%s2717_s12 + $0x48] sm:$0xff]  ;;  %v609_v62 = vld [vmem:[#allocation10] sm:$0x3]  ;;  %s2489_s29 = smov 16  }
  0x8c   : > { %v335_v15 = vadd.f32 %v2735_v1, %v320_v10  ;;  %v342_v20 = vmax.f32 %v334_v13, 0.0  ;;  %v481_v27 = vadd.f32 %v2735_v1, %v466_v24  ;;  %v482_v28 = vadd.f32 %v2735_v1, %v467_v25  ;;  %265 = vst.msk [vmem:[#allocation2 + $0x1b0] sm:$0xff] %vm257_vm1, %v2487_v33  ;;  %2187 = vmatprep.subr.msk.bf16.mxu1 %vm637_vm0, %v624_v32  ;;  %v2855_v58 = vld [vmem:[%s2717_s12 + $0x40] sm:$0xff]  ;;  %v2860_v60 = vld [vmem:[%s2717_s12 + $0x58] sm:$0xff]  ;;  %v2863_v61 = vld [vmem:[%s2717_s12 + $0x68] sm:$0xff]  ;;  %s2490_s6 = smov 8  }
  0x8d   : > { %v341_v19 = vmax.f32 %v333_v12, 0.0  ;;  %v344_v23 = vmax.f32 %v336_v16, 0.0  ;;  %v488_v29 = vmax.f32 %v480_v26, 0.0  ;;  %266 = vst.msk [vmem:[#allocation2 + $0x1b8] sm:$0x1] %vm259_vm2, %v2487_v33  ;;  %2032 = vmatpush3.bf16.msra.mxu1 %v639_v34  ;;  %2193 = vmatprep.subr.msk.bf16.mxu0 %vm637_vm0, %v1105_v43  ;;  %v468_v52 = vmul.f32 %v2838_v48, %v2731_v0  ;;  %v2894_v24 = vld [vmem:[%s2717_s12 + $0x60] sm:$0xff] }
  0x8e   : > { %v343_v22 = vmax.f32 %v335_v15, 0.0  ;;  %351 = vst.msk [vmem:[#allocation2 + $0x21] sm:$0xff] %vm257_vm1, %v342_v20  ;;  %v489_v30 = vmax.f32 %v481_v27, 0.0  ;;  %v490_v31 = vmax.f32 %v482_v28, 0.0  ;;  %v469_v53 = vmul.f32 %v2841_v49, %v2731_v0  ;;  %2188 = vmatprep.subr.msk.bf16.mxu1 %vm637_vm0, %v609_v62  ;;  %v2897_v25 = vld [vmem:[%s2717_s12 + $0x50] sm:$0xff]  ;;  %s2491_s27 = smov 32  }
  0x8f   : > { %350 = vst.msk [vmem:[#allocation2 + $0x11] sm:$0xff] %vm257_vm1, %v341_v19  ;;  %353 = vst.msk [vmem:[#allocation2 + $0x41] sm:$0xff] %vm257_vm1, %v344_v23  ;;  %v483_v13 = vadd.f32 %v2735_v1, %v468_v52  ;;  %v1119_v23 = vsel %vm637_vm0, %v1105_v43, 0  ;;  %vm1582_vm4 = vcmask 1041409   ;;  %vm1585_vm5 = vcmask 1042434   ;;  %s2492_s7 = smov 24  }
  0x90   : > { %352 = vst.msk [vmem:[#allocation2 + $0x31] sm:$0xff] %vm257_vm1, %v343_v22  ;;  %497 = vst.msk [vmem:[#allocation2 + $0x131] sm:$0xff] %vm257_vm1, %v488_v29  ;;  %vm1588_vm6 = vcmask 1043459   ;;  %vm1591_vm7 = vcmask 1044484   ;;  %vm1594_vm8 = vcmask 1045509   ;;  %vm1597_vm9 = vcmask 1046534  }
  0x91   : > { %277 = vst.msk [vmem:[#allocation2 + $0xa0] sm:$0x1] %vm259_vm2, %v2487_v33  ;;  %278 = vst.msk [vmem:[#allocation2 + $0xb0] sm:$0x1] %vm259_vm2, %v2487_v33  ;;  %v491_v26 = vmax.f32 %v483_v13, 0.0  ;;  %vm1600_vm10 = vcmask 1047559  }
  0x92   : > { %279 = vst.msk [vmem:[#allocation2 + $0xc0] sm:$0x1] %vm259_vm2, %v2487_v33  ;;  %280 = vst.msk [vmem:[#allocation2 + $0xd0] sm:$0x1] %vm259_vm2, %v2487_v33  ;;  %s2493_s20 = smov 48   ;;  %s2494_s28 = smov 40  }
  0x93   : > { %281 = vst.msk [vmem:[#allocation2 + $0xe0] sm:$0x1] %vm259_vm2, %v2487_v33  ;;  %282 = vst.msk [vmem:[#allocation2 + $0xf0] sm:$0x1] %vm259_vm2, %v2487_v33  ;;  %s2495_s30 = smov 56   ;;  %vm1779_vm11 = vcmask 130048  }
  0x94   : > { %283 = vst.msk [vmem:[#allocation2 + $0x100] sm:$0x1] %vm259_vm2, %v2487_v33  ;;  %284 = vst.msk [vmem:[#allocation2 + $0x110] sm:$0x1] %vm259_vm2, %v2487_v33  ;;  %vm1781_vm12 = vcmask 195584   ;;  %s1920_s24 = sshll.u32 %s2713_s8, 3 }
  0x95   : > { %295 = vst.msk [vmem:[#allocation2 + $0x1c0] sm:$0x1] %vm259_vm2, %v2487_v33  ;;  %296 = vst.msk [vmem:[#allocation2 + $0x1d0] sm:$0x1] %vm259_vm2, %v2487_v33  ;;  %v991_v36 = vld [vmem:[#allocation2 + $0x21] sm:$0xff]  ;;  %vm1783_vm13 = vcmask 261120  }
  0x96   : > { %297 = vst.msk [vmem:[#allocation2 + $0x1e0] sm:$0x1] %vm259_vm2, %v2487_v33  ;;  %298 = vst.msk [vmem:[#allocation2 + $0x1f0] sm:$0x1] %vm259_vm2, %v2487_v33  ;;  %v990_v35 = vld [vmem:[#allocation2 + $0x11] sm:$0xff]  ;;  %vm1785_vm14 = vcmask 326656  }
  0x97   : > { %299 = vst.msk [vmem:[#allocation2 + $0x200] sm:$0x1] %vm259_vm2, %v2487_v33  ;;  %300 = vst.msk [vmem:[#allocation2 + $0x210] sm:$0x1] %vm259_vm2, %v2487_v33  ;;  %v998_v38 = vpack.c.bf16 %v991_v36, %v990_v35  ;;  %v992_v63 = vld [vmem:[#allocation2 + $0x31] sm:$0xff]  ;;  %vm1787_vm15 = vcmask 392192  }
  0x98   : > { %301 = vst.msk [vmem:[#allocation2 + $0x220] sm:$0x1] %vm259_vm2, %v2487_v33  ;;  %302 = vst.msk [vmem:[#allocation2 + $0x230] sm:$0x1] %vm259_vm2, %v2487_v33  ;;  %v2875_v10 = vld [vmem:[#allocation2 + $0x131] sm:$0xff]  ;;  %s1982_s26 = sshll.u32 %s2543_s19, 7 }
  0x99   : > { %498 = vst.msk [vmem:[#allocation2 + $0x141] sm:$0xff] %vm257_vm1, %v489_v30  ;;  %499 = vst.msk [vmem:[#allocation2 + $0x151] sm:$0xff] %vm257_vm1, %v490_v31  ;;  %2073 = vmatprep.mubr.msk.bf16.mxu0 %vm257_vm1, %v998_v38  ;;  %s255_s5 = scalar_lea.vmem [#allocation12], %s1920_s24  ;;  %s1794_s21 = scalar_lea.sflag [#allocation6], %s2713_s8 }
  0x9a   : > { %294 = vst.msk [vmem:[#allocation2 + $0x1b0] sm:$0x1] %vm259_vm2, %v2487_v33  ;;  %v719_v33 = vsel %vm637_vm0, %v609_v62, 0  ;;  %s1807_s10 = sshll.u32 %s255_s5, 4  ;;  %s3144_s10 = int_to_ptr.vmem [resolvable:$true] %s1807_s10 }
  0x9b   : > { %500 = vst.msk [vmem:[#allocation2 + $0x161] sm:$0xff] %vm257_vm1, %v491_v26  ;;  %v324_v26 = vmul.f32 %v2731_v0, %v2894_v24  ;;  %s2402_s19 = scalar_lea.vmem %s3144_s10, 128 }
  0x9c   : > { %p2403_p1 = scmp.ne.s32.totalorder %s3144_s10, %s2402_s19 }
  0x9e   : > { %p2404_p4 = pnand %p2403_p1, %p2665_p6 }
  0xa0   : > { %v2877_v11 = vld [vmem:[#allocation2 + $0x141] sm:$0xff]  ;;  %v2879_v12 = vld [vmem:[#allocation2 + $0x151] sm:$0xff]  ;;  %p2405_p8 = pneg %p2404_p4 }
  0xa1   : > { %v620_v22 = vpack.c.bf16 %v2879_v12, %v2877_v11 }
  0xf9   : > { %v2820_v37 = vpop.permute.xlu0 %372  ;;  %v2822_v39 = vpop.permute.xlu1 %519 }
  0xfa   : > { %v376_v40 = vmul.f32 %v2820_v37, %v2749_v4  ;;  %v375_v41 = vmul.f32 %v2820_v37, %v2752_v5  ;;  %v378_v46 = vmul.f32 %v2820_v37, %v2755_v6  ;;  %v377_v47 = vmul.f32 %v2820_v37, %v2758_v7  ;;  %v993_v4 = vld [vmem:[#allocation2 + $0x41] sm:$0xff] }
  0xfb   : > { %v523_v50 = vmul.f32 %v2776_v17, %v2822_v39  ;;  %v522_v51 = vmul.f32 %v2771_v14, %v2822_v39  ;;  %v611_v5 = vld [vmem:[#allocation2 + $0x121] sm:$0xff]  ;;  %v470_v6 = vmul.f32 %v2860_v60, %v2731_v0  ;;  %v471_v7 = vmul.f32 %v2863_v61, %v2731_v0 }
  0xfc   : > { %v379_v8 = vmul.f32 %v2820_v37, %v2855_v58  ;;  %v524_v9 = vmul.f32 %v2779_v18, %v2822_v39  ;;  %v484_v14 = vadd.f32 %v2735_v1, %v469_v53  ;;  %v999_v20 = vpack.c.bf16 %v993_v4, %v992_v63 }
  0xfd   : > { %v2829_v42 = vpop.permute.xlu0 %389  ;;  %v2857_v59 = vpop.permute.xlu1 %536  ;;  %v619_v21 = vpack.c.bf16 %v2875_v10, %v611_v5  ;;  %v485_v28 = vadd.f32 %v2735_v1, %v470_v6  ;;  %v486_v29 = vadd.f32 %v2735_v1, %v471_v7  ;;  %v381_v36 = vmul.f32 %v2820_v37, %v2894_v24 }
  0xfe   : > { %v393_v44 = vadd.f32 %v2829_v42, %v376_v40  ;;  %v392_v45 = vadd.f32 %v2829_v42, %v375_v41  ;;  %v395_v56 = vadd.f32 %v2829_v42, %v378_v46  ;;  %v394_v57 = vadd.f32 %v2829_v42, %v377_v47  ;;  %2074 = vmatmul.mubr.msk.bf16.vlgmr.msra.gmra.mrb[0].mxu0 %vm257_vm1, %v999_v20  ;;  %v365_v41 = vld [vmem:[%s2717_s12 + $0x70] sm:$0xff] }
  0xff   : > { %v540_v17 = vadd.f32 %v2857_v59, %v523_v50  ;;  %v539_v18 = vadd.f32 %v2857_v59, %v522_v51  ;;  %v396_v19 = vadd.f32 %v2829_v42, %v379_v8  ;;  %v492_v27 = vmax.f32 %v484_v14, 0.0  ;;  %2033 = vmatprep.mubr.msk.bf16.mxu1 %vm257_vm1, %v619_v21  ;;  %2082 = vmatpush3.bf16.msra.mxu0 %v1119_v23  ;;  %v2921_v47 = vld [vmem:[#allocation10 + $0xc] sm:$0x3] }
 0x100   : > { %v401_v54 = vmax.f32 %v393_v44, 0.0  ;;  %v400_v55 = vmax.f32 %v392_v45, 0.0  ;;  %v403_v15 = vmax.f32 %v395_v56, 0.0  ;;  %v402_v16 = vmax.f32 %v394_v57, 0.0  ;;  %2034 = vmatmul.mubr.msk.bf16.vlgmr.msra.gmra.mrb[0].mxu1 %vm257_vm1, %v620_v22  ;;  %2194 = vmatprep.subr.msk.bf16.mxu0 %vm637_vm0, %v2921_v47  ;;  %v1942_v56 = vld [vmem:[%s2717_s12 + $0x78] sm:$0xff]  ;;  %v2935_v57 = vld [vmem:[#allocation2 + $0x161] sm:$0xff]  ;;  %s3142_s12 = scalar_lea.hbm %s3190_s4, %s1982_s26 }
 0x101   : > { %v548_v30 = vmax.f32 %v540_v17, 0.0  ;;  %v547_v31 = vmax.f32 %v539_v18, 0.0  ;;  %v541_v32 = vadd.f32 %v2857_v59, %v524_v9  ;;  %501 = vst.msk [vmem:[#allocation2 + $0x171] sm:$0xff] %vm257_vm1, %v492_v27  ;;  %v493_v34 = vmax.f32 %v485_v28, 0.0  ;;  %2042 = vmatpush3.bf16.msra.mxu1 %v719_v33 }
 0x102   : > { %418 = vrot.lane.b32.xlu1 %v401_v54, %s2488_s23  ;;  %416 = vrot.lane.b32.xlu0 %v400_v55, %s2488_s23  ;;  %v494_v35 = vmax.f32 %v486_v29, 0.0  ;;  %v380_v38 = vmul.f32 %v2820_v37, %v2897_v25  ;;  %v525_v40 = vmul.f32 %v2838_v48, %v2822_v39  ;;  %v404_v43 = vmax.f32 %v396_v19, 0.0 }
 0x103   : > { %502 = vst.msk [vmem:[#allocation2 + $0x181] sm:$0xff] %vm257_vm1, %v493_v34  ;;  %v549_v44 = vmax.f32 %v541_v32, 0.0  ;;  %v398_v45 = vadd.f32 %v2829_v42, %v381_v36  ;;  %v382_v48 = vmul.f32 %v2820_v37, %v365_v41  ;;  %v527_v50 = vmul.f32 %v2860_v60, %v2822_v39  ;;  %v2941_v60 = vld [vmem:[#allocation10 + $0x4] sm:$0x3] }
 0x104   : > { %503 = vst.msk [vmem:[#allocation2 + $0x191] sm:$0xff] %vm257_vm1, %v494_v35  ;;  %v397_v46 = vadd.f32 %v2829_v42, %v380_v38  ;;  %v526_v51 = vmul.f32 %v2841_v49, %v2822_v39  ;;  %v542_v54 = vadd.f32 %v2857_v59, %v525_v40  ;;  %v528_v4 = vmul.f32 %v2863_v61, %v2822_v39 }
 0x105   : > { %v406_v52 = vmax.f32 %v398_v45, 0.0  ;;  %v399_v55 = vadd.f32 %v2829_v42, %v382_v48  ;;  %v529_v42 = vmul.f32 %v1942_v56, %v2822_v39  ;;  %2189 = vmatprep.subr.msk.bf16.mxu1 %vm637_vm0, %v2941_v60  ;;  %v544_v8 = vadd.f32 %v2857_v59, %v527_v50 }
 0x106   : > { %422 = vrot.lane.b32.xlu1 %v403_v15, %s2488_s23  ;;  %420 = vrot.lane.b32.xlu0 %v402_v16, %s2488_s23  ;;  %v405_v53 = vmax.f32 %v397_v46, 0.0  ;;  %v550_v6 = vmax.f32 %v542_v54, 0.0  ;;  %v543_v9 = vadd.f32 %v2857_v59, %v526_v51  ;;  %v545_v14 = vadd.f32 %v2857_v59, %v528_v4  ;;  %v597_v51 = vld [vmem:[#allocation2 + $0x1b0] sm:$0xff] }
 0x107   : > { %v407_v7 = vmax.f32 %v399_v55, 0.0  ;;  %v552_v39 = vmax.f32 %v544_v8, 0.0  ;;  %v546_v13 = vadd.f32 %v2857_v59, %v529_v42  ;;  %v1304_v17 = vpack.c.bf16 %v2877_v11, %v2875_v10 }
 0x108   : > { %v2937_v62 = vld [vmem:[#allocation2 + $0x171] sm:$0xff]  ;;  %v551_v61 = vmax.f32 %v543_v9, 0.0  ;;  %v553_v16 = vmax.f32 %v545_v14, 0.0  ;;  %v472_v18 = vmul.f32 %v1942_v56, %v2731_v0  ;;  %v1305_v59 = vpack.c.bf16 %v2935_v57, %v2879_v12 }
 0x109   : > { %v621_v37 = vpack.c.bf16 %v2937_v62, %v2935_v57  ;;  %v554_v15 = vmax.f32 %v546_v13, 0.0  ;;  %v322_v22 = vmul.f32 %v2731_v0, %v2855_v58  ;;  %v323_v23 = vmul.f32 %v2731_v0, %v2897_v25 }
 0x10a   : > { %565 = vrot.lane.b32.xlu1 %v548_v30, %s2488_s23  ;;  %563 = vrot.lane.b32.xlu0 %v547_v31, %s2488_s23  ;;  %v2945_v49 = vld [vmem:[#allocation2 + $0x181] sm:$0xff]  ;;  %v487_v19 = vadd.f32 %v2735_v1, %v472_v18  ;;  %v325_v27 = vmul.f32 %v2731_v0, %v365_v41  ;;  %v339_v30 = vadd.f32 %v2735_v1, %v324_v26  ;;  %v1221_v50 = vsel %vm637_vm0, %v2921_v47, 0 }
 0x10b   : > { %v2947_v63 = vld [vmem:[#allocation2 + $0x191] sm:$0xff]  ;;  %2037 = vmatprep.mubr.msk.bf16.mxu1 %vm257_vm1, %v621_v37  ;;  %v1306_v20 = vpack.c.bf16 %v2945_v49, %v2937_v62  ;;  %v337_v28 = vadd.f32 %v2735_v1, %v322_v22  ;;  %v338_v29 = vadd.f32 %v2735_v1, %v323_v23 }
 0x10c   : > { %v622_v5 = vpack.c.bf16 %v2947_v63, %v2945_v49  ;;  %v495_v21 = vmax.f32 %v487_v19, 0.0  ;;  %v340_v31 = vadd.f32 %v2735_v1, %v325_v27  ;;  %v347_v34 = vmax.f32 %v339_v30, 0.0  ;;  %v786_v27 = vld [vmem:[#allocation2 + $0x1b1] sm:$0xff] }
 0x10d   : > { %v345_v32 = vmax.f32 %v337_v28, 0.0  ;;  %v346_v33 = vmax.f32 %v338_v29, 0.0 }
 0x10e   : > { %424 = vrot.lane.b32.xlu1 %v404_v43, %s2488_s23  ;;  %567 = vrot.lane.b32.xlu0 %v549_v44, %s2488_s23  ;;  %504 = vst.msk [vmem:[#allocation2 + $0x1a1] sm:$0xff] %vm257_vm1, %v495_v21  ;;  %v348_v58 = vmax.f32 %v340_v31, 0.0  ;;  %356 = vst.msk [vmem:[#allocation2 + $0x71] sm:$0xff] %vm257_vm1, %v347_v34 }
 0x10f   : > { %2038 = vmatmul.mubr.msk.bf16.gmra.mrb[4].mxu1 %vm257_vm1, %v622_v5  ;;  %354 = vst.msk [vmem:[#allocation2 + $0x51] sm:$0xff] %vm257_vm1, %v345_v32  ;;  %355 = vst.msk [vmem:[#allocation2 + $0x61] sm:$0xff] %vm257_vm1, %v346_v33 }
 0x110   : > { %357 = vst.msk [vmem:[#allocation2 + $0x81] sm:$0xff] %vm257_vm1, %v348_v58  ;;  %v1411_v58 = vld [vmem:[#allocation10 + $0x10] sm:$0x3] }
 0x112   : > { %428 = vrot.lane.b32.xlu1 %v406_v52, %s2488_s23  ;;  %426 = vrot.lane.b32.xlu0 %v405_v53, %s2488_s23  ;;  %v1309_v52 = vld [vmem:[#allocation10 + $0xe] sm:$0x3] }
 0x113   : > { %v1323_v34 = vsel %vm637_vm0, %v1309_v52, 0 }
 0x115   : > { %v1303_v10 = vld [vmem:[#allocation2 + $0x1a1] sm:$0xff] }
 0x116   : > { %569 = vrot.lane.b32.xlu1 %v550_v6, %s2488_s23  ;;  %430 = vrot.lane.b32.xlu0 %v407_v7, %s2488_s23  ;;  %v813_v6 = vsel %vm637_vm0, %v2941_v60, 0  ;;  %v901_v7 = vld [vmem:[#allocation10 + $0x6] sm:$0x3]  ;;  %v994_v57 = vld [vmem:[#allocation2 + $0x51] sm:$0xff]  ;;  %v995_v62 = vld [vmem:[#allocation2 + $0x61] sm:$0xff] }
 0x11a   : > { %573 = vrot.lane.b32.xlu1 %v552_v39, %s2488_s23  ;;  %571 = vrot.lane.b32.xlu0 %v551_v61, %s2488_s23 }
 0x11e   : > { %577 = vrot.lane.b32.xlu1 %v554_v15, %s2488_s23  ;;  %575 = vrot.lane.b32.xlu0 %v553_v16, %s2488_s23  ;;  %s2496_s23 = smov [#allocation12]  }
 0x174   : > { %v419_v0 = vpop.permute.xlu1 %418  ;;  %v417_v24 = vpop.permute.xlu0 %416 }
 0x175   : > { %442 = vst.msk [vmem:[#allocation2 + $0xb1] sm:$0xff] %vm257_vm1, %v419_v0  ;;  %441 = vst.msk [vmem:[#allocation2 + $0xa1] sm:$0xff] %vm257_vm1, %v417_v24 }
 0x178   : > { %v423_v25 = vpop.permute.xlu1 %422  ;;  %v421_v1 = vpop.permute.xlu0 %420 }
 0x179   : > { %444 = vst.msk [vmem:[#allocation2 + $0xd1] sm:$0xff] %vm257_vm1, %v423_v25  ;;  %443 = vst.msk [vmem:[#allocation2 + $0xc1] sm:$0xff] %vm257_vm1, %v421_v1 }
 0x17c   : > { %v566_v35 = vpop.permute.xlu1 %565  ;;  %v564_v36 = vpop.permute.xlu0 %563  ;;  %v1092_v38 = vld [vmem:[#allocation2 + $0xa1] sm:$0xff]  ;;  %v1093_v40 = vld [vmem:[#allocation2 + $0xb1] sm:$0xff] }
 0x17d   : > { %589 = vst.msk [vmem:[#allocation2 + $0x1d1] sm:$0xff] %vm257_vm1, %v566_v35  ;;  %588 = vst.msk [vmem:[#allocation2 + $0x1c1] sm:$0xff] %vm257_vm1, %v564_v36  ;;  %v1100_v41 = vpack.c.bf16 %v1093_v40, %v1092_v38  ;;  %v915_v36 = vsel %vm637_vm0, %v901_v7, 0 }
 0x17f   : > { %2083 = vmatprep.mubr.msk.bf16.mxu0 %vm257_vm1, %v1100_v41 }
 0x180   : > { %v425_v43 = vpop.permute.xlu1 %424  ;;  %v568_v44 = vpop.permute.xlu0 %567  ;;  %v1094_v45 = vld [vmem:[#allocation2 + $0xc1] sm:$0xff]  ;;  %v1095_v46 = vld [vmem:[#allocation2 + $0xd1] sm:$0xff] }
 0x181   : > { %445 = vst.msk [vmem:[#allocation2 + $0xe1] sm:$0xff] %vm257_vm1, %v425_v43  ;;  %590 = vst.msk [vmem:[#allocation2 + $0x1e1] sm:$0xff] %vm257_vm1, %v568_v44  ;;  %v1101_v48 = vpack.c.bf16 %v1095_v46, %v1094_v45  ;;  %v888_v44 = vld [vmem:[#allocation2 + $0xa0] sm:$0xff]  ;;  %v889_v45 = vld [vmem:[#allocation2 + $0xb0] sm:$0xff] }
 0x182   : > { %v891_v11 = vld [vmem:[#allocation2 + $0xd0] sm:$0xff] }
 0x183   : > { %2084 = vmatmul.mubr.msk.bf16.vlgmr.msra.gmra.mrb[0].mxu0 %vm257_vm1, %v1101_v48 }
 0x184   : > { %v429_v53 = vpop.permute.xlu1 %428  ;;  %v427_v54 = vpop.permute.xlu0 %426  ;;  %v598_v55 = vld [vmem:[#allocation2 + $0x1c0] sm:$0xff]  ;;  %2092 = vmatpush3.bf16.msra.mxu0 %v1221_v50  ;;  %v599_v47 = vld [vmem:[#allocation2 + $0x1d0] sm:$0xff]  ;;  %v1425_v50 = vsel %vm637_vm0, %v1411_v58, 0 }
 0x185   : > { %447 = vst.msk [vmem:[#allocation2 + $0x101] sm:$0xff] %vm257_vm1, %v429_v53  ;;  %446 = vst.msk [vmem:[#allocation2 + $0xf1] sm:$0xff] %vm257_vm1, %v427_v54  ;;  %v605_v56 = vpack.c.bf16 %v598_v55, %v597_v51  ;;  %2195 = vmatprep.subr.msk.bf16.mxu0 %vm637_vm0, %v1309_v52  ;;  %v1202_v19 = vpack.c.bf16 %v599_v47, %v598_v55  ;;  %v787_v28 = vld [vmem:[#allocation2 + $0x1c1] sm:$0xff]  ;;  %v788_v1 = vld [vmem:[#allocation2 + $0x1d1] sm:$0xff]  ;;  %v896_v51 = vpack.c.bf16 %v889_v45, %v888_v44 }
 0x186   : > { %v794_v32 = vpack.c.bf16 %v787_v28, %v786_v27  ;;  %v1406_v12 = vpack.c.bf16 %v788_v1, %v787_v28 }
 0x187   : > { %2043 = vmatprep.mubr.msk.bf16.mxu1 %vm257_vm1, %v605_v56 }
 0x188   : > { %v570_v37 = vpop.permute.xlu1 %569  ;;  %v431_v42 = vpop.permute.xlu0 %430  ;;  %v600_v4 = vld [vmem:[#allocation2 + $0x1e0] sm:$0xff] }
 0x189   : > { %591 = vst.msk [vmem:[#allocation2 + $0x1f1] sm:$0xff] %vm257_vm1, %v570_v37  ;;  %448 = vst.msk [vmem:[#allocation2 + $0x111] sm:$0xff] %vm257_vm1, %v431_v42  ;;  %v606_v5 = vpack.c.bf16 %v600_v4, %v599_v47  ;;  %v1096_v39 = vld [vmem:[#allocation2 + $0xe1] sm:$0xff]  ;;  %v996_v42 = vld [vmem:[#allocation2 + $0x71] sm:$0xff] }
 0x18a   : > { %v789_v0 = vld [vmem:[#allocation2 + $0x1e1] sm:$0xff] }
 0x18b   : > { %2044 = vmatmul.mubr.msk.bf16.vlgmr.msra.gmra.mrb[0].mxu1 %vm257_vm1, %v606_v5  ;;  %v795_v35 = vpack.c.bf16 %v789_v0, %v788_v1  ;;  %v892_v54 = vld [vmem:[#allocation2 + $0xe0] sm:$0xff] }
 0x18c   : > { %v574_v8 = vpop.permute.xlu1 %573  ;;  %v572_v9 = vpop.permute.xlu0 %571  ;;  %v1097_v61 = vld [vmem:[#allocation2 + $0xf1] sm:$0xff]  ;;  %2052 = vmatpush3.bf16.msra.mxu1 %v813_v6  ;;  %v1098_v60 = vld [vmem:[#allocation2 + $0x101] sm:$0xff] }
 0x18d   : > { %593 = vst.msk [vmem:[#allocation2 + $0x211] sm:$0xff] %vm257_vm1, %v574_v8  ;;  %592 = vst.msk [vmem:[#allocation2 + $0x201] sm:$0xff] %vm257_vm1, %v572_v9  ;;  %v1102_v13 = vpack.c.bf16 %v1097_v61, %v1096_v39  ;;  %2190 = vmatprep.subr.msk.bf16.mxu1 %vm637_vm0, %v901_v7  ;;  %v893_v52 = vld [vmem:[#allocation2 + $0xf0] sm:$0xff]  ;;  %v997_v47 = vld [vmem:[#allocation2 + $0x81] sm:$0xff] }
 0x18e   : > { %v898_v55 = vpack.c.bf16 %v893_v52, %v892_v54  ;;  %v1001_v5 = vpack.c.bf16 %v997_v47, %v996_v42 }
 0x18f   : > { %2087 = vmatprep.mubr.msk.bf16.mxu0 %vm257_vm1, %v1102_v13 }
 0x190   : > { %v578_v14 = vpop.permute.xlu1 %577  ;;  %v576_v15 = vpop.permute.xlu0 %575  ;;  %v1099_v16 = vld [vmem:[#allocation2 + $0x111] sm:$0xff] }
 0x191   : > { %595 = vst.msk [vmem:[#allocation2 + $0x231] sm:$0xff] %vm257_vm1, %v578_v14  ;;  %594 = vst.msk [vmem:[#allocation2 + $0x221] sm:$0xff] %vm257_vm1, %v576_v15  ;;  %v1103_v18 = vpack.c.bf16 %v1099_v16, %v1098_v60  ;;  %v601_v21 = vld [vmem:[#allocation2 + $0x1f0] sm:$0xff] }
 0x192   : > { %v1203_v31 = vpack.c.bf16 %v601_v21, %v600_v4  ;;  %v790_v40 = vld [vmem:[#allocation2 + $0x1f1] sm:$0xff] }
 0x193   : > { %2088 = vmatmul.mubr.msk.bf16.gmra.mrb[4].mxu0 %vm257_vm1, %v1103_v18  ;;  %v895_v49 = vld [vmem:[#allocation2 + $0x110] sm:$0xff]  ;;  %v1407_v56 = vpack.c.bf16 %v790_v40, %v789_v0 }
 0x194   : > { %2093 = vmatprep.mubr.msk.bf16.mxu0 %vm257_vm1, %v1202_v19  ;;  %v602_v22 = vld [vmem:[#allocation2 + $0x200] sm:$0xff]  ;;  %v603_v26 = vld [vmem:[#allocation2 + $0x210] sm:$0xff] }
 0x195   : > { %v607_v23 = vpack.c.bf16 %v602_v22, %v601_v21  ;;  %v1204_v33 = vpack.c.bf16 %v603_v26, %v602_v22  ;;  %v791_v25 = vld [vmem:[#allocation2 + $0x201] sm:$0xff]  ;;  %v792_v46 = vld [vmem:[#allocation2 + $0x211] sm:$0xff] }
 0x196   : > { %v796_v41 = vpack.c.bf16 %v791_v25, %v790_v40  ;;  %v1408_v37 = vpack.c.bf16 %v792_v46, %v791_v25 }
 0x197   : > { %2047 = vmatprep.mubr.msk.bf16.mxu1 %vm257_vm1, %v607_v23 }
 0x198   : > { %v604_v29 = vld [vmem:[#allocation2 + $0x220] sm:$0xff]  ;;  %v1201_v24 = vld [vmem:[#allocation2 + $0x230] sm:$0xff] }
 0x199   : > { %v608_v30 = vpack.c.bf16 %v604_v29, %v603_v26  ;;  %v1205_v38 = vpack.c.bf16 %v1201_v24, %v604_v29  ;;  %v793_v43 = vld [vmem:[#allocation2 + $0x221] sm:$0xff] }
 0x19a   : > { %v797_v48 = vpack.c.bf16 %v793_v43, %v792_v46 }
 0x19b   : > { %2048 = vmatmul.mubr.msk.bf16.gmra.mrb[4].mxu1 %vm257_vm1, %v608_v30  ;;  %2094 = vmatmul.mubr.msk.bf16.vlgmr.msra.gmra.mrb[0].mxu0 %vm257_vm1, %v1203_v31 }
 0x19c   : > { %2053 = vmatprep.mubr.msk.bf16.mxu1 %vm257_vm1, %v794_v32  ;;  %2097 = vmatprep.mubr.msk.bf16.mxu0 %vm257_vm1, %v1204_v33 }
 0x19d   : > { %2102 = vmatpush3.bf16.msra.mxu0 %v1323_v34 }
 0x19e   : > { %2196 = vmatprep.subr.msk.bf16.mxu0 %vm637_vm0, %v1411_v58 }
 0x1a3   : > { %2054 = vmatmul.mubr.msk.bf16.vlgmr.msra.gmra.mrb[0].mxu1 %vm257_vm1, %v795_v35  ;;  %2098 = vmatmul.mubr.msk.bf16.gmra.mrb[4].mxu0 %vm257_vm1, %v1205_v38 }
 0x1a4   : > { %2062 = vmatpush3.bf16.msra.mxu1 %v915_v36  ;;  %2057 = vmatprep.mubr.msk.bf16.mxu1 %vm257_vm1, %v796_v41 }
 0x1a5   : > { %2103 = vmatprep.mubr.msk.bf16.mxu0 %vm257_vm1, %v1304_v17  ;;  %2192 = vmatprep.subr.msk.bf16.mxu1 %vm637_vm0, %v2739_v2  ;;  %v890_v2 = vld [vmem:[#allocation2 + $0xc0] sm:$0xff]  ;;  %v1307_v17 = vpack.c.bf16 %v1303_v10, %v2947_v63  ;;  %v1000_v63 = vpack.c.bf16 %v995_v62, %v994_v57  ;;  %vm1789_vm0 = vcmask 457728  }
 0x1a6   : > { %v897_v53 = vpack.c.bf16 %v891_v11, %v890_v2 }
 0x1ab   : > { %2058 = vmatmul.mubr.msk.bf16.gmra.mrb[4].mxu1 %vm257_vm1, %v797_v48  ;;  %2104 = vmatmul.mubr.msk.bf16.vlgmr.msra.gmra.mrb[0].mxu0 %vm257_vm1, %v1305_v59  ;;  %v894_v59 = vld [vmem:[#allocation2 + $0x100] sm:$0xff] }
 0x1ac   : > { %2063 = vmatprep.mubr.msk.bf16.mxu1 %vm257_vm1, %v896_v51  ;;  %2112 = vmatpush3.bf16.msra.mxu0 %v1425_v50 }
 0x1ad   : > { %2107 = vmatprep.mubr.msk.bf16.mxu0 %vm257_vm1, %v1306_v20  ;;  %v899_v20 = vpack.c.bf16 %v895_v49, %v894_v59 }
 0x1b3   : > { %2064 = vmatmul.mubr.msk.bf16.vlgmr.msra.gmra.mrb[0].mxu1 %vm257_vm1, %v897_v53  ;;  %2108 = vmatmul.mubr.msk.bf16.gmra.mrb[4].mxu0 %vm257_vm1, %v1307_v17 }
 0x1b4   : > { %2122 = vmatpush3.bf16.msra.mxu1 %v2745_v3  ;;  %2067 = vmatprep.mubr.msk.bf16.mxu1 %vm257_vm1, %v898_v55  ;;  %v1405_v3 = vld [vmem:[#allocation2 + $0x231] sm:$0xff] }
 0x1b5   : > { %2113 = vmatprep.mubr.msk.bf16.mxu0 %vm257_vm1, %v1406_v12  ;;  %v1409_v4 = vpack.c.bf16 %v1405_v3, %v793_v43 }
 0x1bb   : > { %2068 = vmatmul.mubr.msk.bf16.gmra.mrb[4].mxu1 %vm257_vm1, %v899_v20  ;;  %2114 = vmatmul.mubr.msk.bf16.vlgmr.msra.gmra.mrb[0].mxu0 %vm257_vm1, %v1407_v56 }
 0x1bc   : > { %2117 = vmatprep.mubr.msk.bf16.mxu0 %vm257_vm1, %v1408_v37  ;;  %2077 = vmatprep.mubr.msk.bf16.mxu1 %vm257_vm1, %v1000_v63 }
 0x1c3   : > { %2118 = vmatmul.mubr.msk.bf16.gmra.mrb[4].mxu0 %vm257_vm1, %v1409_v4 }
 0x1c7   : > { %2078 = vmatmul.mubr.msk.bf16.vlgmr.msra.gmra.mrb[4].mxu1 %vm257_vm1, %v1001_v5  ;;  %vm1791_vm1 = vcmask 523264  }
 0x286   : > { %v2065_v6 = vpop.f32.mrb[0].mxu1 }
 0x287   : > { %v951_v7 = vpop.f32.mrb[1].mxu1 }
 0x288   : > { %v2066_v8 = vpop.f32.mrb[2].mxu1 }
 0x289   : > { %v954_v9 = vpop.f32.mrb[3].mxu1 }
 0x28e   : > { %v2115_v39 = vpop.f32.mrb[0].mxu0 }
 0x28f   : > { %v2123_v61 = vadd.f32 %v2115_v39, %v2065_v6  ;;  %v1461_v13 = vpop.f32.mrb[1].mxu0 }
 0x290   : > { %v2124_v14 = vadd.f32 %v1461_v13, %v951_v7  ;;  %v2116_v15 = vpop.f32.mrb[2].mxu0 }
 0x291   : > { %1503 = vst.msk [vmem:[#allocation3 + $0x10] sm:$0xff] %vm1500_vm3, %v2123_v61  ;;  %v2125_v60 = vadd.f32 %v2116_v15, %v2066_v8  ;;  %v1464_v16 = vpop.f32.mrb[3].mxu0 }
 0x292   : > { %1501 = vst.msk [vmem:[#allocation3] sm:$0xff] %vm1500_vm3, %v2124_v14  ;;  %v2126_v18 = vadd.f32 %v1464_v16, %v954_v9 }
 0x293   : > { %1504 = vst.msk [vmem:[#allocation3 + $0x18] sm:$0xff] %vm1500_vm3, %v2125_v60 }
 0x294   : > { %1502 = vst.msk [vmem:[#allocation3 + $0x8] sm:$0xff] %vm1500_vm3, %v2126_v18 }
 0x296   : > { %v2119_v19 = vpop.f32.mrb[4].mxu0 }
 0x297   : > { %v1477_v21 = vpop.f32.mrb[5].mxu0 }
 0x298   : > { %v2120_v22 = vpop.f32.mrb[6].mxu0  ;;  %v1527_v26 = vld [vmem:[#allocation3 + $0x12] sm:$0x1]  ;;  %v1519_v28 = vld [vmem:[#allocation3 + $0x11] sm:$0x1] }
 0x299   : > { %v1480_v23 = vpop.f32.mrb[7].mxu0  ;;  %v1525_v31 = vld [vmem:[#allocation3 + $0x2] sm:$0x1]  ;;  %v1517_v33 = vld [vmem:[#allocation3 + $0x1] sm:$0x1]  ;;  %v1638_v1 = vrot.slane %v1527_v26, 6 }
 0x29a   : > { %v2079_v27 = vpop.f32.mrb[4].mxu1  ;;  %v1528_v24 = vld [vmem:[#allocation3 + $0x1a] sm:$0x1]  ;;  %v1520_v40 = vld [vmem:[#allocation3 + $0x19] sm:$0x1]  ;;  %v1613_v41 = vrot.slane %v1519_v28, 6 }
 0x29b   : > { %v2127_v29 = vadd.f32 %v2119_v19, %v2079_v27  ;;  %v1069_v30 = vpop.f32.mrb[5].mxu1  ;;  %v1526_v32 = vld [vmem:[#allocation3 + $0xa] sm:$0x1]  ;;  %v1518_v34 = vld [vmem:[#allocation3 + $0x9] sm:$0x1]  ;;  %v1640_v17 = vrot.slane %v1528_v24, 5 }
 0x29c   : > { %v2128_v58 = vadd.f32 %v1477_v21, %v1069_v30  ;;  %v2080_v0 = vpop.f32.mrb[6].mxu1  ;;  %v1636_v25 = vrot.slane %v1526_v32, 7  ;;  %v1611_v35 = vrot.slane %v1518_v34, 7  ;;  %v1542_v43 = vld [vmem:[#allocation3 + $0xc] sm:$0x1]  ;;  %v1615_v62 = vrot.slane %v1520_v40, 5 }
 0x29d   : > { %1507 = vst.msk [vmem:[#allocation3 + $0x30] sm:$0xff] %vm1500_vm3, %v2127_v29  ;;  %v2129_v36 = vadd.f32 %v2120_v22, %v2080_v0  ;;  %v1072_v38 = vpop.f32.mrb[7].mxu1  ;;  %v1541_v48 = vld [vmem:[#allocation3 + $0x4] sm:$0x1]  ;;  %v1543_v50 = vld [vmem:[#allocation3 + $0x14] sm:$0x1] }
 0x29e   : > { %1505 = vst.msk [vmem:[#allocation3 + $0x20] sm:$0xff] %vm1500_vm3, %v2128_v58  ;;  %v2130_v44 = vadd.f32 %v1480_v23, %v1072_v38  ;;  %v1637_v45 = vsel %vm1582_vm4, %v1636_v25, %v1525_v31  ;;  %v1612_v46 = vsel %vm1582_vm4, %v1611_v35, %v1517_v33  ;;  %v1686_v51 = vrot.slane %v1542_v43, 7  ;;  %v1544_v10 = vld [vmem:[#allocation3 + $0x1c] sm:$0x1]  ;;  %v1534_v2 = vld [vmem:[#allocation3 + $0xb] sm:$0x1] }
 0x29f   : > { %1508 = vst.msk [vmem:[#allocation3 + $0x38] sm:$0xff] %vm1500_vm3, %v2129_v36  ;;  %v1535_v11 = vld [vmem:[#allocation3 + $0x13] sm:$0x1]  ;;  %v1533_v53 = vld [vmem:[#allocation3 + $0x3] sm:$0x1]  ;;  %v1661_v55 = vrot.slane %v1534_v2, 7  ;;  %v1639_v12 = vsel %vm1585_vm5, %v1638_v1, %v1637_v45  ;;  %v1614_v57 = vsel %vm1585_vm5, %v1613_v41, %v1612_v46 }
 0x2a0   : > { %1506 = vst.msk [vmem:[#allocation3 + $0x28] sm:$0xff] %vm1500_vm3, %v2130_v44  ;;  %v1687_v52 = vsel %vm1582_vm4, %v1686_v51, %v1541_v48  ;;  %v1536_v54 = vld [vmem:[#allocation3 + $0x1b] sm:$0x1]  ;;  %v1688_v49 = vrot.slane %v1543_v50, 6  ;;  %v1558_v59 = vld [vmem:[#allocation3 + $0xe] sm:$0x1]  ;;  %v1641_v60 = vsel %vm1588_vm6, %v1640_v17, %v1639_v12  ;;  %v1616_v27 = vsel %vm1588_vm6, %v1615_v62, %v1614_v57 }
 0x2a1   : > { %v1559_v63 = vld [vmem:[#allocation3 + $0x16] sm:$0x1]  ;;  %v1690_v20 = vrot.slane %v1544_v10, 5  ;;  %v1662_v56 = vsel %vm1582_vm4, %v1661_v55, %v1533_v53  ;;  %v1663_v37 = vrot.slane %v1535_v11, 6  ;;  %v3075_v3 = vld [vmem:[#allocation3 + $0x1e] sm:$0x1] }
 0x2a2   : > { %v1736_v42 = vrot.slane %v1558_v59, 7  ;;  %v1689_v47 = vsel %vm1585_vm5, %v1688_v49, %v1687_v52  ;;  %v1665_v4 = vrot.slane %v1536_v54, 5  ;;  %v1557_v5 = vld [vmem:[#allocation3 + $0x6] sm:$0x1]  ;;  %v1738_v6 = vrot.slane %v1559_v63, 6 }
 0x2a3   : > { %v1740_v7 = vrot.slane %v3075_v3, 5  ;;  %v1664_v61 = vsel %vm1585_vm5, %v1663_v37, %v1662_v56  ;;  %v3081_v14 = vld [vmem:[#allocation3 + $0xd] sm:$0x1]  ;;  %v3084_v21 = vld [vmem:[#allocation3 + $0x15] sm:$0x1]  ;;  %v1691_v29 = vsel %vm1588_vm6, %v1690_v20, %v1689_v47 }
 0x2a4   : > { %v1531_v8 = vld [vmem:[#allocation3 + $0x32] sm:$0x1]  ;;  %v1523_v9 = vld [vmem:[#allocation3 + $0x31] sm:$0x1]  ;;  %v1547_v39 = vld [vmem:[#allocation3 + $0x34] sm:$0x1]  ;;  %v1737_v13 = vsel %vm1582_vm4, %v1736_v42, %v1557_v5  ;;  %v1666_v34 = vsel %vm1588_vm6, %v1665_v4, %v1664_v61 }
 0x2a5   : > { %v1529_v15 = vld [vmem:[#allocation3 + $0x22] sm:$0x1]  ;;  %v1646_v16 = vrot.slane %v1531_v8, 2  ;;  %v1521_v18 = vld [vmem:[#allocation3 + $0x21] sm:$0x1]  ;;  %v1621_v19 = vrot.slane %v1523_v9, 2  ;;  %v1739_v58 = vsel %vm1585_vm5, %v1738_v6, %v1737_v13 }
 0x2a6   : > { %v1532_v22 = vld [vmem:[#allocation3 + $0x3a] sm:$0x1]  ;;  %v1642_v23 = vrot.slane %v1529_v15, 4  ;;  %v1524_v26 = vld [vmem:[#allocation3 + $0x39] sm:$0x1]  ;;  %v1617_v28 = vrot.slane %v1521_v18, 4  ;;  %v1741_v5 = vsel %vm1588_vm6, %v1740_v7, %v1739_v58 }
 0x2a7   : > { %v1530_v30 = vld [vmem:[#allocation3 + $0x2a] sm:$0x1]  ;;  %v1648_v31 = vrot.slane %v1532_v22, 1  ;;  %v1522_v32 = vld [vmem:[#allocation3 + $0x29] sm:$0x1]  ;;  %v1623_v33 = vrot.slane %v1524_v26, 1 }
 0x2a8   : > { %v1643_v0 = vsel %vm1591_vm7, %v1642_v23, %v1641_v60  ;;  %v1644_v24 = vrot.slane %v1530_v30, 3  ;;  %v1618_v25 = vsel %vm1591_vm7, %v1617_v28, %v1616_v27  ;;  %v1619_v1 = vrot.slane %v1522_v32, 3  ;;  %v1545_v35 = vld [vmem:[#allocation3 + $0x24] sm:$0x1]  ;;  %v1546_v36 = vld [vmem:[#allocation3 + $0x2c] sm:$0x1] }
 0x2a9   : > { %v1548_v38 = vld [vmem:[#allocation3 + $0x3c] sm:$0x1]  ;;  %v1692_v40 = vrot.slane %v1545_v35, 4  ;;  %v1694_v41 = vrot.slane %v1546_v36, 3  ;;  %v1696_v43 = vrot.slane %v1547_v39, 2  ;;  %v1711_v44 = vrot.slane %v3081_v14, 7 }
 0x2aa   : > { %v1645_v45 = vsel %vm1594_vm8, %v1644_v24, %v1643_v0  ;;  %v1620_v46 = vsel %vm1594_vm8, %v1619_v1, %v1618_v25  ;;  %v1698_v48 = vrot.slane %v1548_v38, 1  ;;  %v1537_v50 = vld [vmem:[#allocation3 + $0x23] sm:$0x1]  ;;  %v1538_v51 = vld [vmem:[#allocation3 + $0x2b] sm:$0x1]  ;;  %v1713_v10 = vrot.slane %v3084_v21, 6 }
 0x2ab   : > { %v1647_v2 = vsel %vm1597_vm9, %v1646_v16, %v1645_v45  ;;  %v1622_v11 = vsel %vm1597_vm9, %v1621_v19, %v1620_v46  ;;  %v1693_v17 = vsel %vm1591_vm7, %v1692_v40, %v1691_v29  ;;  %v1539_v52 = vld [vmem:[#allocation3 + $0x33] sm:$0x1]  ;;  %v1540_v53 = vld [vmem:[#allocation3 + $0x3b] sm:$0x1]  ;;  %v1667_v54 = vrot.slane %v1537_v50, 4 }
 0x2ac   : > { %v1649_v55 = vsel %vm1600_vm10, %v1648_v31, %v1647_v2  ;;  %v1624_v12 = vsel %vm1600_vm10, %v1623_v33, %v1622_v11  ;;  %v1695_v57 = vsel %vm1594_vm8, %v1694_v41, %v1693_v17  ;;  %v1669_v62 = vrot.slane %v1538_v51, 3  ;;  %v1561_v49 = vld [vmem:[#allocation3 + $0x26] sm:$0x1]  ;;  %v1562_v59 = vld [vmem:[#allocation3 + $0x2e] sm:$0x1] }
 0x2ad   : > { %1650 = vrot.lane.b32.xlu1 %v1649_v55, %s2489_s29  ;;  %1625 = vrot.lane.b32.xlu0 %v1624_v12, %s2490_s6  ;;  %v1697_v63 = vsel %vm1597_vm9, %v1696_v43, %v1695_v57  ;;  %v1668_v20 = vsel %vm1591_vm7, %v1667_v54, %v1666_v34  ;;  %v1671_v56 = vrot.slane %v1539_v52, 2  ;;  %v1673_v37 = vrot.slane %v1540_v53, 1  ;;  %v1563_v42 = vld [vmem:[#allocation3 + $0x36] sm:$0x1]  ;;  %v1549_v47 = vld [vmem:[#allocation3 + $0x5] sm:$0x1] }
 0x2ae   : > { %v1670_v4 = vsel %vm1594_vm8, %v1669_v62, %v1668_v20  ;;  %v1742_v6 = vrot.slane %v1561_v49, 4  ;;  %v1744_v8 = vrot.slane %v1562_v59, 3  ;;  %v1552_v9 = vld [vmem:[#allocation3 + $0x1d] sm:$0x1]  ;;  %v1553_v39 = vld [vmem:[#allocation3 + $0x25] sm:$0x1]  ;;  %v1699_v61 = vsel %vm1600_vm10, %v1698_v48, %v1697_v63 }
 0x2af   : > { %v1672_v13 = vsel %vm1597_vm9, %v1671_v56, %v1670_v4  ;;  %v1564_v14 = vld [vmem:[#allocation3 + $0x3e] sm:$0x1]  ;;  %v1746_v15 = vrot.slane %v1563_v42, 2  ;;  %v1554_v60 = vld [vmem:[#allocation3 + $0x2d] sm:$0x1]  ;;  %v1712_v16 = vsel %vm1582_vm4, %v1711_v44, %v1549_v47  ;;  %v1715_v22 = vrot.slane %v1552_v9, 5 }
 0x2b0   : > { %v1674_v18 = vsel %vm1600_vm10, %v1673_v37, %v1672_v13  ;;  %v1743_v19 = vsel %vm1591_vm7, %v1742_v6, %v1741_v5  ;;  %v1555_v3 = vld [vmem:[#allocation3 + $0x35] sm:$0x1]  ;;  %v1556_v21 = vld [vmem:[#allocation3 + $0x3d] sm:$0x1]  ;;  %v1714_v7 = vsel %vm1585_vm5, %v1713_v10, %v1712_v16  ;;  %v1717_v26 = vrot.slane %v1553_v39, 4  ;;  %s2406_s29 = sshll.u32 %s2496_s23, 4  ;;  %s2407_s29 = int_to_ptr.vmem [resolvable:$false] %s2406_s29 }
 0x2b1   : > { %1700 = vrot.lane.b32.xlu1 %v1699_v61, %s2491_s27  ;;  %1675 = vrot.lane.b32.xlu0 %v1674_v18, %s2492_s7  ;;  %v1745_v23 = vsel %vm1594_vm8, %v1744_v8, %v1743_v19  ;;  %v1719_v27 = vrot.slane %v1554_v60, 3  ;;  %v1565_v28 = vld [vmem:[#allocation3 + $0x7] sm:$0x1]  ;;  %v1566_v29 = vld [vmem:[#allocation3 + $0xf] sm:$0x1]  ;;  %v1748_v31 = vrot.slane %v1564_v14, 1  ;;  %v1716_v32 = vsel %vm1588_vm6, %v1715_v22, %v1714_v7  ;;  %p2409_p3 = scmp.lt.s32.totalorder %s3144_s10, %s2407_s29 }
 0x2b2   : > { %v1747_v30 = vsel %vm1597_vm9, %v1746_v15, %v1745_v23  ;;  %v1567_v33 = vld [vmem:[#allocation3 + $0x17] sm:$0x1]  ;;  %v1568_v34 = vld [vmem:[#allocation3 + $0x1f] sm:$0x1]  ;;  %v1761_v58 = vrot.slane %v1566_v29, 7  ;;  %v1718_v0 = vsel %vm1591_vm7, %v1717_v26, %v1716_v32  ;;  %v1721_v24 = vrot.slane %v1555_v3, 2 }
 0x2b3   : > { %v1723_v25 = vrot.slane %v1556_v21, 1  ;;  %v1569_v1 = vld [vmem:[#allocation3 + $0x27] sm:$0x1]  ;;  %v1570_v35 = vld [vmem:[#allocation3 + $0x2f] sm:$0x1]  ;;  %v1749_v36 = vsel %vm1600_vm10, %v1748_v31, %v1747_v30  ;;  %v1720_v38 = vsel %vm1594_vm8, %v1719_v27, %v1718_v0  ;;  %v1763_v44 = vrot.slane %v1567_v33, 6 }
 0x2b4   : > { %v1571_v40 = vld [vmem:[#allocation3 + $0x37] sm:$0x1]  ;;  %v1572_v41 = vld [vmem:[#allocation3 + $0x3f] sm:$0x1]  ;;  %v1762_v43 = vsel %vm1582_vm4, %v1761_v58, %v1565_v28  ;;  %v1722_v45 = vsel %vm1597_vm9, %v1721_v24, %v1720_v38  ;;  %v1765_v46 = vrot.slane %v1568_v34, 5  ;;  %v1767_v48 = vrot.slane %v1569_v1, 4 }
 0x2b5   : > { %1750 = vrot.lane.b32.xlu1 %v1749_v36, %s2493_s20  ;;  %v1769_v50 = vrot.slane %v1570_v35, 3  ;;  %v1510_v51 = vld [vmem:[#allocation3 + $0x8] sm:$0x1]  ;;  %v1724_v10 = vsel %vm1600_vm10, %v1723_v25, %v1722_v45  ;;  %v1764_v2 = vsel %vm1585_vm5, %v1763_v44, %v1762_v43  ;;  %v1511_v11 = vld [vmem:[#allocation3 + $0x10] sm:$0x1]  ;;  %v1771_v57 = vrot.slane %v1571_v40, 2 }
 0x2b6   : > { %v1512_v17 = vld [vmem:[#allocation3 + $0x18] sm:$0x1]  ;;  %v1581_v52 = vrot.slane %v1510_v51, 7  ;;  %1725 = vrot.lane.b32.xlu0 %v1724_v10, %s2494_s28  ;;  %v1766_v53 = vsel %vm1588_vm6, %v1765_v46, %v1764_v2  ;;  %v1509_v54 = vld [vmem:[#allocation3] sm:$0x1]  ;;  %v1584_v49 = vrot.slane %v1511_v11, 6 }
 0x2b7   : > { %v1513_v55 = vld [vmem:[#allocation3 + $0x20] sm:$0x1]  ;;  %v1768_v12 = vsel %vm1591_vm7, %v1767_v48, %v1766_v53  ;;  %v1514_v59 = vld [vmem:[#allocation3 + $0x28] sm:$0x1]  ;;  %v1773_v20 = vrot.slane %v1572_v41, 1  ;;  %v1587_v37 = vrot.slane %v1512_v17, 5 }
 0x2b8   : > { %v1583_v62 = vsel %vm1582_vm4, %v1581_v52, %v1509_v54  ;;  %v1770_v63 = vsel %vm1594_vm8, %v1769_v50, %v1768_v12  ;;  %v1515_v56 = vld [vmem:[#allocation3 + $0x30] sm:$0x1]  ;;  %v1590_v42 = vrot.slane %v1513_v55, 4  ;;  %v1516_v4 = vld [vmem:[#allocation3 + $0x38] sm:$0x1]  ;;  %v1593_v6 = vrot.slane %v1514_v59, 3 }
 0x2b9   : > { %v1772_v47 = vsel %vm1597_vm9, %v1771_v57, %v1770_v63  ;;  %v1586_v5 = vsel %vm1585_vm5, %v1584_v49, %v1583_v62  ;;  %v1596_v61 = vrot.slane %v1515_v56, 2  ;;  %v1599_v13 = vrot.slane %v1516_v4, 1  ;;  %s2408_s6 = scalar_lea.vmem %s2407_s29, 256 }
 0x2ba   : > { %v1774_v8 = vsel %vm1600_vm10, %v1773_v20, %v1772_v47  ;;  %v1589_v9 = vsel %vm1588_vm6, %v1587_v37, %v1586_v5  ;;  %p2410_p7 = scmp.lt.s32.totalorder %s2408_s6, %s2402_s19 }
 0x2bb   : > { %1775 = vrot.lane.b32.xlu0 %v1774_v8, %s2495_s30  ;;  %v1592_v39 = vsel %vm1591_vm7, %v1590_v42, %v1589_v9 }
 0x2bc   : > { %v1595_v14 = vsel %vm1594_vm8, %v1593_v6, %v1592_v39  ;;  %p2411_p10 = por %p2410_p7, %p2409_p3 }
 0x2bd   : > { %v1598_v15 = vsel %vm1597_vm9, %v1596_v61, %v1595_v14 }
 0x2be   : > { %v1601_v60 = vsel %vm1600_vm10, %v1599_v13, %v1598_v15  ;;  %p2412_p13 = pnand %p2411_p10, %p2405_p8 }
 0x31f   : > { %v1651_v16 = vpop.permute.xlu1 %1650  ;;  %v1626_v18 = vpop.permute.xlu0 %1625 }
 0x320   : > { %v1778_v19 = vsel %vm1500_vm3, %v1601_v60, %v1626_v18 }
 0x321   : > { %v1780_v7 = vsel %vm1779_vm11, %v1778_v19, %v1651_v16 }
 0x323   : > { %v1676_v3 = vpop.permute.xlu0 %1675  ;;  %v1701_v21 = vpop.permute.xlu1 %1700 }
 0x324   : > { %v1782_v22 = vsel %vm1781_vm12, %v1780_v7, %v1676_v3 }
 0x325   : > { %v1784_v26 = vsel %vm1783_vm13, %v1782_v22, %v1701_v21 }
 0x327   : > { %v1751_v27 = vpop.permute.xlu1 %1750 }
 0x328   : > { %v1726_v23 = vpop.permute.xlu0 %1725 }
 0x329   : > { %v1786_v28 = vsel %vm1785_vm14, %v1784_v26, %v1726_v23 }
 0x32a   : > { %v1788_v30 = vsel %vm1787_vm15, %v1786_v28, %v1751_v27 }
 0x32d   : > { %v1776_v29 = vpop.permute.xlu0 %1775 }
 0x32e   : > { %v1790_v31 = vsel %vm1789_vm0, %v1788_v30, %v1776_v29 }
 0x32f   : > { %1792 = vst.msk [vmem:[%s255_s5] sm:$0xff] %vm1791_vm1, %v1790_v31 }
 0x330   : > { %2415 = shalt.err (!%p2412_p13)
}
 0x331   : > { %s2416_s8 = scalar_lea.hbm %s3142_s12, 128  ;;  %s2420_s20 = scalar_lea.hbm %s3190_s4, 256 }
 0x332   : > { %p2417_p0 = scmp.ne.s32.totalorder %s3142_s12, %s2416_s8  ;;  %p2421_p9 = scmp.lt.u32.totalorder %s3142_s12, %s3190_s4 }
 0x333   : > { %p2422_p12 = scmp.lt.u32.totalorder %s2420_s20, %s2416_s8  ;;  %p2424_p1 = scmp.lt.u32.totalorder %s2416_s8, %s3142_s12 }
 0x334   : > { %p2418_p5 = pnand %p2417_p0, %p2665_p6 }
 0x335   : > { %p2423_p2 = por %p2422_p12, %p2421_p9 }
 0x336   : > { %p2419_p11 = pneg %p2418_p5 }
 0x337   : > { %p2425_p4 = por %p2424_p1, %p2423_p2 }
 0x339   : > { %p2426_p8 = pnand %p2425_p4, %p2419_p11 }
 0x33b   : > { %2429 = shalt.err (!%p2426_p8)
}
 0x33c   : > { %2211 = dma.vmem_to_hbm [thread:$0]  (%p2665_p6), %s3144_s10, 128, %s3142_s12, %s1794_s21  }
 0x33d PF: > { %s1819_s24 = sand.u32 1, %s2464_s15   ;;  %p3208_p3 = scmp.ne.s32.totalorder %s3195_s22, 0 }
 0x33e   : > { %p3209_p7 = scmp.ge.s32.totalorder %s2476_s18, 2  ;;  %s1820_s26 = scalar_lea.sflag [#allocation6], %s1819_s24 }
 0x340   : > { %p2228_p10 = pnand %p3209_p7, %p3208_p3 }
 0x342   : > { %2459 = dma.done.wait (!%p2228_p10), %s1820_s26, 128  }
 0x343   : > { %2461 = vsyncadd (!%p2228_p10), %s1820_s26, 4294967168  ;;  %p19_p13 = scmp.ge.s32.totalorder %s2651_s25, 4   ;;  %s3210_s15 = smov %s2468_s16 }
 0x344   : > { %s3211_s16 = smov %s2472_s17  ;;  %s3212_s17 = smov %s2661_s13 }
 0x345   : > { %s3213_s18 = smov %s2651_s25  ;;  %21 = sbr.rel (!%p19_p13) target bundleno = 7 (0x7), region = 108 }
 0x34c   :  { %1825 = vsyncpa [#allocation5], 1 }
 0x34d   :  { %1827 = vsyncpa [#allocation5 + $0x1], 1 }
 0x34e   :  { %1828 = vsyncpa [#allocation8], 1 }
 0x34f   :  { %1829 = vsyncpa [#allocation11], 1 }
 0x350   :  { %1830 = vsyncpa [#allocation6], 1 }
 0x351   :  { %1832 = vsyncpa [#allocation6 + $0x1], 1 }

</bundles_post_ra>
